<compile_context>
chip_gen: v5e
topology: v5e:2x2
jax: 0.10.0
libtpu: 0.0.40
codegen_flags: <defaults>
</compile_context>

<pallas_src>
import functools

import jax
import jax.numpy as jnp
from jax.experimental import pallas as pl
from jax.experimental.pallas import tpu as pltpu

# Layer sizes from the PyTorch module's __init__.
LAYER_SIZES = [784, 800, 400, 100, 25, 10]


def _round_up(x, m):
    return ((x + m - 1) // m) * m


# Lane-dense (multiple-of-128) padded layer-output dims. The input dim (784)
# is left unpadded: a full-array block dim is always legal and padding K would
# only add HBM traffic / MXU work.
PADDED_OUT = [_round_up(n, 128) for n in LAYER_SIZES[1:]]   # [896, 512, 128, 128, 128]
PADDED_IN = [LAYER_SIZES[0]] + PADDED_OUT[:-1]              # [784, 896, 512, 128, 128]


def _mlp_kernel(x_ref,
                w1_ref, b1_ref,
                w2_ref, b2_ref,
                w3_ref, b3_ref,
                w4_ref, b4_ref,
                w5_ref, b5_ref,
                o_ref,
                *, num_chunks):
    """Fused 5x (Linear + Sigmoid) on one batch tile; weights VMEM-resident.

    The batch tile is split into `num_chunks` independent sub-chunks (static
    unroll) so the LLO scheduler can overlap one sub-chunk's MXU matmuls with
    the other's bias + sigmoid (EUP/VPU) epilogue.
    """
    tb = x_ref.shape[0]
    chunk = tb // num_chunks

    def layer(h_bf16, w_ref, b_ref):
        # bf16 MXU matmul with f32 accumulation.
        z = jnp.dot(h_bf16, w_ref[...], preferred_element_type=jnp.float32)
        z = z + b_ref[...]                      # b is (1, out) -> broadcasts
        # sigmoid(z) = 0.5 * tanh(0.5 * z) + 0.5 : single EUP transcendental
        # (no exp + divide). Kept in f32 (portable to v5e: no bf16 EUP/VPU).
        return 0.5 * jnp.tanh(0.5 * z) + 0.5

    for c in range(num_chunks):
        rows = pl.ds(c * chunk, chunk)
        h = x_ref[rows, :].astype(jnp.bfloat16)
        h = layer(h, w1_ref, b1_ref).astype(jnp.bfloat16)
        h = layer(h, w2_ref, b2_ref).astype(jnp.bfloat16)
        h = layer(h, w3_ref, b3_ref).astype(jnp.bfloat16)
        h = layer(h, w4_ref, b4_ref).astype(jnp.bfloat16)
        o_ref[rows, :] = layer(h, w5_ref, b5_ref).astype(o_ref.dtype)


@functools.partial(jax.jit, static_argnames=("tile_b",))
def digits_recog_forward(x, kernel_params, tile_b=512):
    """x: (batch, 784) f32. kernel_params: [(W bf16 (in_p,out_p), b f32 (1,out_p))]."""
    batch, in_dim = x.shape

    # Batch tile: multiple of 8 (sublane), capped at tile_b. No wrapper-side
    # padding of x: the grid uses cdiv and Pallas handles the partial block.
    tb = min(tile_b, _round_up(batch, 8))
    # Two independent sub-chunks per tile only when the tile splits cleanly
    # into two sublane-aligned halves.
    num_chunks = 2 if (tb >= 16 and tb % 16 == 0) else 1

    flat_params = []
    in_specs = [pl.BlockSpec((tb, in_dim), lambda i: (i, 0))]
    for w, b in kernel_params:
        flat_params.extend([w, b])
        # Constant index_map -> fetched once, stays resident across batch tiles.
        in_specs.append(pl.BlockSpec(w.shape, lambda i: (0, 0)))
        in_specs.append(pl.BlockSpec(b.shape, lambda i: (0, 0)))

    out_dim_p = PADDED_OUT[-1]
    out = pl.pallas_call(
        functools.partial(_mlp_kernel, num_chunks=num_chunks),
        out_shape=jax.ShapeDtypeStruct((batch, out_dim_p), jnp.float32),
        grid=(pl.cdiv(batch, tb),),
        in_specs=in_specs,
        out_specs=pl.BlockSpec((tb, out_dim_p), lambda i: (i, 0)),
        compiler_params=pltpu.CompilerParams(
            dimension_semantics=("parallel",),
            vmem_limit_bytes=32 * 1024 * 1024),
    )(x, *flat_params)

    return out[:, :LAYER_SIZES[-1]]


def init_params(key):
    """Unpadded f32 params mimicking nn.Linear default init, W as (in, out)."""
    params = []
    for i in range(len(LAYER_SIZES) - 1):
        fan_in, fan_out = LAYER_SIZES[i], LAYER_SIZES[i + 1]
        key, kw, kb = jax.random.split(key, 3)
        bound = 1.0 / jnp.sqrt(fan_in)
        w = jax.random.uniform(kw, (fan_in, fan_out), jnp.float32, -bound, bound)
        b = jax.random.uniform(kb, (1, fan_out), jnp.float32, -bound, bound)
        params.append((w, b))
    return params


def make_kernel_params(params_f32):
    """Zero-pad to lane-dense shapes; weights -> bf16, biases stay f32.

    Padded weight rows/cols and bias entries are exactly zero, so the
    sigmoid(0)=0.5 garbage lanes are multiplied by zero rows in the next layer
    and never leak into real outputs.
    """
    kparams = []
    for i, (w, b) in enumerate(params_f32):
        in_p, out_p = PADDED_IN[i], PADDED_OUT[i]
        w_p = jnp.zeros((in_p, out_p), jnp.float32).at[:w.shape[0], :w.shape[1]].set(w)
        b_p = jnp.zeros((1, out_p), jnp.float32).at[:, :b.shape[1]].set(b)
        kparams.append((w_p.astype(jnp.bfloat16), b_p))
    return kparams


def reference_forward(x, params_f32):
    """Pure-JAX f32 reference of the PyTorch forward."""
    h = x
    for w, b in params_f32:
        h = jax.nn.sigmoid(h @ w + b)
    return h


if __name__ == "__main__":
    key = jax.random.PRNGKey(0)
    key, kx = jax.random.split(key)

    params_f32 = init_params(key)
    kernel_params = make_kernel_params(params_f32)

    # Small single-tile test, plus a non-multiple-of-tile batch exercising the
    # partial last block and the 2-sub-chunk path.
    for batch in (8, 300):
        xk = jax.random.fold_in(kx, batch)
        x = jax.random.normal(xk, (batch, LAYER_SIZES[0]), jnp.float32)

        out = jax.block_until_ready(digits_recog_forward(x, kernel_params))
        ref = reference_forward(x, params_f32)

        assert out.shape == (batch, LAYER_SIZES[-1]), out.shape
        max_err = float(jnp.max(jnp.abs(out - ref)))
        # bf16 weights/activations vs f32 reference -> relaxed tolerance.
        assert max_err < 2e-2, max_err

    print("KERNEL_OK")
</pallas_src>

<mosaic_0001>
module attributes {stable_mosaic.version = 11 : i64} {
  func.func @_mlp_kernel(%arg0: i32, %arg1: memref<8x784xf32, #tpu.memory_space<vmem>>, %arg2: memref<784x896xbf16, #tpu.memory_space<vmem>>, %arg3: memref<1x896xf32, #tpu.memory_space<vmem>>, %arg4: memref<896x512xbf16, #tpu.memory_space<vmem>>, %arg5: memref<1x512xf32, #tpu.memory_space<vmem>>, %arg6: memref<512x128xbf16, #tpu.memory_space<vmem>>, %arg7: memref<1x128xf32, #tpu.memory_space<vmem>>, %arg8: memref<128x128xbf16, #tpu.memory_space<vmem>>, %arg9: memref<1x128xf32, #tpu.memory_space<vmem>>, %arg10: memref<128x128xbf16, #tpu.memory_space<vmem>>, %arg11: memref<1x128xf32, #tpu.memory_space<vmem>>, %arg12: memref<8x128xf32, #tpu.memory_space<vmem>>) attributes {dimension_semantics = [#tpu.dimension_semantics<parallel>], iteration_bounds = array<i64: 1>, scalar_prefetch = 0 : i64, scratch_operands = 0 : i64, tpu.core_type = #tpu.core_type<tc>, window_params = [{transform_indices = @transform_0, window_bounds = array<i64: 8, 784>}, {pipeline_mode = #tpu.pipeline_mode<synchronous>, transform_indices = @transform_1, window_bounds = array<i64: 784, 896>}, {pipeline_mode = #tpu.pipeline_mode<synchronous>, transform_indices = @transform_2, window_bounds = array<i64: 1, 896>}, {pipeline_mode = #tpu.pipeline_mode<synchronous>, transform_indices = @transform_3, window_bounds = array<i64: 896, 512>}, {pipeline_mode = #tpu.pipeline_mode<synchronous>, transform_indices = @transform_4, window_bounds = array<i64: 1, 512>}, {pipeline_mode = #tpu.pipeline_mode<synchronous>, transform_indices = @transform_5, window_bounds = array<i64: 512, 128>}, {pipeline_mode = #tpu.pipeline_mode<synchronous>, transform_indices = @transform_6, window_bounds = array<i64: 1, 128>}, {pipeline_mode = #tpu.pipeline_mode<synchronous>, transform_indices = @transform_7, window_bounds = array<i64: 128, 128>}, {pipeline_mode = #tpu.pipeline_mode<synchronous>, transform_indices = @transform_8, window_bounds = array<i64: 1, 128>}, {pipeline_mode = #tpu.pipeline_mode<synchronous>, transform_indices = @transform_9, window_bounds = array<i64: 128, 128>}, {pipeline_mode = #tpu.pipeline_mode<synchronous>, transform_indices = @transform_10, window_bounds = array<i64: 1, 128>}, {transform_indices = @transform_11, window_bounds = array<i64: 8, 128>}]} {
    %c0 = arith.constant 0 : index
    %c0_0 = arith.constant 0 : index
    %0 = vector.load %arg1[%c0, %c0_0] : memref<8x784xf32, #tpu.memory_space<vmem>>, vector<8x784xf32>
    %1 = arith.truncf %0 : vector<8x784xf32> to vector<8x784xbf16>
    %c0_1 = arith.constant 0 : index
    %c0_2 = arith.constant 0 : index
    %2 = vector.load %arg2[%c0_1, %c0_2] : memref<784x896xbf16, #tpu.memory_space<vmem>>, vector<784x896xbf16>
    %cst = arith.constant dense<0.000000e+00> : vector<8x896xf32>
    %3 = tpu.matmul %1, %2, %cst {dimension_numbers = #tpu.dot_dimension_numbers<[1], [0], [0], [1], [0, 0, 1, 1], [], []>} : vector<8x784xbf16>, vector<784x896xbf16>, vector<8x896xf32> -> vector<8x896xf32>
    %c0_3 = arith.constant 0 : index
    %c0_4 = arith.constant 0 : index
    %4 = vector.load %arg3[%c0_3, %c0_4] : memref<1x896xf32, #tpu.memory_space<vmem>>, vector<1x896xf32>
    %5 = vector.broadcast %4 : vector<1x896xf32> to vector<8x896xf32>
    %6 = arith.addf %3, %5 : vector<8x896xf32>
    %cst_5 = arith.constant 5.000000e-01 : f32
    %7 = vector.broadcast %cst_5 : f32 to vector<8x896xf32>
    %8 = arith.mulf %7, %6 : vector<8x896xf32>
    %9 = math.tanh %8 : vector<8x896xf32>
    %cst_6 = arith.constant 5.000000e-01 : f32
    %10 = vector.broadcast %cst_6 : f32 to vector<8x896xf32>
    %11 = arith.mulf %10, %9 : vector<8x896xf32>
    %cst_7 = arith.constant 5.000000e-01 : f32
    %12 = vector.broadcast %cst_7 : f32 to vector<8x896xf32>
    %13 = arith.addf %11, %12 : vector<8x896xf32>
    %14 = arith.truncf %13 : vector<8x896xf32> to vector<8x896xbf16>
    %c0_8 = arith.constant 0 : index
    %c0_9 = arith.constant 0 : index
    %15 = vector.load %arg4[%c0_8, %c0_9] : memref<896x512xbf16, #tpu.memory_space<vmem>>, vector<896x512xbf16>
    %cst_10 = arith.constant dense<0.000000e+00> : vector<8x512xf32>
    %16 = tpu.matmul %14, %15, %cst_10 {dimension_numbers = #tpu.dot_dimension_numbers<[1], [0], [0], [1], [0, 0, 1, 1], [], []>} : vector<8x896xbf16>, vector<896x512xbf16>, vector<8x512xf32> -> vector<8x512xf32>
    %c0_11 = arith.constant 0 : index
    %c0_12 = arith.constant 0 : index
    %17 = vector.load %arg5[%c0_11, %c0_12] : memref<1x512xf32, #tpu.memory_space<vmem>>, vector<1x512xf32>
    %18 = vector.broadcast %17 : vector<1x512xf32> to vector<8x512xf32>
    %19 = arith.addf %16, %18 : vector<8x512xf32>
    %cst_13 = arith.constant 5.000000e-01 : f32
    %20 = vector.broadcast %cst_13 : f32 to vector<8x512xf32>
    %21 = arith.mulf %20, %19 : vector<8x512xf32>
    %22 = math.tanh %21 : vector<8x512xf32>
    %cst_14 = arith.constant 5.000000e-01 : f32
    %23 = vector.broadcast %cst_14 : f32 to vector<8x512xf32>
    %24 = arith.mulf %23, %22 : vector<8x512xf32>
    %cst_15 = arith.constant 5.000000e-01 : f32
    %25 = vector.broadcast %cst_15 : f32 to vector<8x512xf32>
    %26 = arith.addf %24, %25 : vector<8x512xf32>
    %27 = arith.truncf %26 : vector<8x512xf32> to vector<8x512xbf16>
    %c0_16 = arith.constant 0 : index
    %c0_17 = arith.constant 0 : index
    %28 = vector.load %arg6[%c0_16, %c0_17] : memref<512x128xbf16, #tpu.memory_space<vmem>>, vector<512x128xbf16>
    %cst_18 = arith.constant dense<0.000000e+00> : vector<8x128xf32>
    %29 = tpu.matmul %27, %28, %cst_18 {dimension_numbers = #tpu.dot_dimension_numbers<[1], [0], [0], [1], [0, 0, 1, 1], [], []>} : vector<8x512xbf16>, vector<512x128xbf16>, vector<8x128xf32> -> vector<8x128xf32>
    %c0_19 = arith.constant 0 : index
    %c0_20 = arith.constant 0 : index
    %30 = vector.load %arg7[%c0_19, %c0_20] : memref<1x128xf32, #tpu.memory_space<vmem>>, vector<1x128xf32>
    %31 = vector.broadcast %30 : vector<1x128xf32> to vector<8x128xf32>
    %32 = arith.addf %29, %31 : vector<8x128xf32>
    %cst_21 = arith.constant 5.000000e-01 : f32
    %33 = vector.broadcast %cst_21 : f32 to vector<8x128xf32>
    %34 = arith.mulf %33, %32 : vector<8x128xf32>
    %35 = math.tanh %34 : vector<8x128xf32>
    %cst_22 = arith.constant 5.000000e-01 : f32
    %36 = vector.broadcast %cst_22 : f32 to vector<8x128xf32>
    %37 = arith.mulf %36, %35 : vector<8x128xf32>
    %cst_23 = arith.constant 5.000000e-01 : f32
    %38 = vector.broadcast %cst_23 : f32 to vector<8x128xf32>
    %39 = arith.addf %37, %38 : vector<8x128xf32>
    %40 = arith.truncf %39 : vector<8x128xf32> to vector<8x128xbf16>
    %c0_24 = arith.constant 0 : index
    %c0_25 = arith.constant 0 : index
    %41 = vector.load %arg8[%c0_24, %c0_25] : memref<128x128xbf16, #tpu.memory_space<vmem>>, vector<128x128xbf16>
    %cst_26 = arith.constant dense<0.000000e+00> : vector<8x128xf32>
    %42 = tpu.matmul %40, %41, %cst_26 {dimension_numbers = #tpu.dot_dimension_numbers<[1], [0], [0], [1], [0, 0, 1, 1], [], []>} : vector<8x128xbf16>, vector<128x128xbf16>, vector<8x128xf32> -> vector<8x128xf32>
    %c0_27 = arith.constant 0 : index
    %c0_28 = arith.constant 0 : index
    %43 = vector.load %arg9[%c0_27, %c0_28] : memref<1x128xf32, #tpu.memory_space<vmem>>, vector<1x128xf32>
    %44 = vector.broadcast %43 : vector<1x128xf32> to vector<8x128xf32>
    %45 = arith.addf %42, %44 : vector<8x128xf32>
    %cst_29 = arith.constant 5.000000e-01 : f32
    %46 = vector.broadcast %cst_29 : f32 to vector<8x128xf32>
    %47 = arith.mulf %46, %45 : vector<8x128xf32>
    %48 = math.tanh %47 : vector<8x128xf32>
    %cst_30 = arith.constant 5.000000e-01 : f32
    %49 = vector.broadcast %cst_30 : f32 to vector<8x128xf32>
    %50 = arith.mulf %49, %48 : vector<8x128xf32>
    %cst_31 = arith.constant 5.000000e-01 : f32
    %51 = vector.broadcast %cst_31 : f32 to vector<8x128xf32>
    %52 = arith.addf %50, %51 : vector<8x128xf32>
    %53 = arith.truncf %52 : vector<8x128xf32> to vector<8x128xbf16>
    %c0_32 = arith.constant 0 : index
    %c0_33 = arith.constant 0 : index
    %54 = vector.load %arg10[%c0_32, %c0_33] : memref<128x128xbf16, #tpu.memory_space<vmem>>, vector<128x128xbf16>
    %cst_34 = arith.constant dense<0.000000e+00> : vector<8x128xf32>
    %55 = tpu.matmul %53, %54, %cst_34 {dimension_numbers = #tpu.dot_dimension_numbers<[1], [0], [0], [1], [0, 0, 1, 1], [], []>} : vector<8x128xbf16>, vector<128x128xbf16>, vector<8x128xf32> -> vector<8x128xf32>
    %c0_35 = arith.constant 0 : index
    %c0_36 = arith.constant 0 : index
    %56 = vector.load %arg11[%c0_35, %c0_36] : memref<1x128xf32, #tpu.memory_space<vmem>>, vector<1x128xf32>
    %57 = vector.broadcast %56 : vector<1x128xf32> to vector<8x128xf32>
    %58 = arith.addf %55, %57 : vector<8x128xf32>
    %cst_37 = arith.constant 5.000000e-01 : f32
    %59 = vector.broadcast %cst_37 : f32 to vector<8x128xf32>
    %60 = arith.mulf %59, %58 : vector<8x128xf32>
    %61 = math.tanh %60 : vector<8x128xf32>
    %cst_38 = arith.constant 5.000000e-01 : f32
    %62 = vector.broadcast %cst_38 : f32 to vector<8x128xf32>
    %63 = arith.mulf %62, %61 : vector<8x128xf32>
    %cst_39 = arith.constant 5.000000e-01 : f32
    %64 = vector.broadcast %cst_39 : f32 to vector<8x128xf32>
    %65 = arith.addf %63, %64 : vector<8x128xf32>
    %c0_40 = arith.constant 0 : index
    %c0_41 = arith.constant 0 : index
    %66 = vector.load %arg12[%c0_40, %c0_41] : memref<8x128xf32, #tpu.memory_space<vmem>>, vector<8x128xf32>
    tpu.vector_store %arg12[%c0_40, %c0_41], %65 {strides = array<i32>} : memref<8x128xf32, #tpu.memory_space<vmem>>, vector<8x128xf32>,
    return
  }
  func.func @transform_0(%arg0: i32) -> (i32, i32) {
    %c0_i32 = arith.constant 0 : i32
    %c0_i32_0 = arith.constant 0 : i32
    return %arg0, %c0_i32 : i32, i32
  }
  func.func @transform_1(%arg0: i32) -> (i32, i32) {
    %c0_i32 = arith.constant 0 : i32
    %c0_i32_0 = arith.constant 0 : i32
    %c0_i32_1 = arith.constant 0 : i32
    return %c0_i32, %c0_i32_0 : i32, i32
  }
  func.func @transform_2(%arg0: i32) -> (i32, i32) {
    %c0_i32 = arith.constant 0 : i32
    %c0_i32_0 = arith.constant 0 : i32
    %c0_i32_1 = arith.constant 0 : i32
    return %c0_i32, %c0_i32_0 : i32, i32
  }
  func.func @transform_3(%arg0: i32) -> (i32, i32) {
    %c0_i32 = arith.constant 0 : i32
    %c0_i32_0 = arith.constant 0 : i32
    %c0_i32_1 = arith.constant 0 : i32
    return %c0_i32, %c0_i32_0 : i32, i32
  }
  func.func @transform_4(%arg0: i32) -> (i32, i32) {
    %c0_i32 = arith.constant 0 : i32
    %c0_i32_0 = arith.constant 0 : i32
    %c0_i32_1 = arith.constant 0 : i32
    return %c0_i32, %c0_i32_0 : i32, i32
  }
  func.func @transform_5(%arg0: i32) -> (i32, i32) {
    %c0_i32 = arith.constant 0 : i32
    %c0_i32_0 = arith.constant 0 : i32
    %c0_i32_1 = arith.constant 0 : i32
    return %c0_i32, %c0_i32_0 : i32, i32
  }
  func.func @transform_6(%arg0: i32) -> (i32, i32) {
    %c0_i32 = arith.constant 0 : i32
    %c0_i32_0 = arith.constant 0 : i32
    %c0_i32_1 = arith.constant 0 : i32
    return %c0_i32, %c0_i32_0 : i32, i32
  }
  func.func @transform_7(%arg0: i32) -> (i32, i32) {
    %c0_i32 = arith.constant 0 : i32
    %c0_i32_0 = arith.constant 0 : i32
    %c0_i32_1 = arith.constant 0 : i32
    return %c0_i32, %c0_i32_0 : i32, i32
  }
  func.func @transform_8(%arg0: i32) -> (i32, i32) {
    %c0_i32 = arith.constant 0 : i32
    %c0_i32_0 = arith.constant 0 : i32
    %c0_i32_1 = arith.constant 0 : i32
    return %c0_i32, %c0_i32_0 : i32, i32
  }
  func.func @transform_9(%arg0: i32) -> (i32, i32) {
    %c0_i32 = arith.constant 0 : i32
    %c0_i32_0 = arith.constant 0 : i32
    %c0_i32_1 = arith.constant 0 : i32
    return %c0_i32, %c0_i32_0 : i32, i32
  }
  func.func @transform_10(%arg0: i32) -> (i32, i32) {
    %c0_i32 = arith.constant 0 : i32
    %c0_i32_0 = arith.constant 0 : i32
    %c0_i32_1 = arith.constant 0 : i32
    return %c0_i32, %c0_i32_0 : i32, i32
  }
  func.func @transform_11(%arg0: i32) -> (i32, i32) {
    %c0_i32 = arith.constant 0 : i32
    %c0_i32_0 = arith.constant 0 : i32
    return %arg0, %c0_i32 : i32, i32
  }
}

</mosaic_0001>

<bundles_post_ra>
// kernel: digits_recog_forward.1
= control target key start
LH: loop header
LB: loop body
LE: loop exit
PB: predicated region body
PF: predicated region fallthrough
CT: control target
= control target key end

     0   :  { %16 = vsyncpa [#allocation3], 0  ;;  %s9080_s0 = inlined_call_operand.hbm [shape: f32[8,784], index: 0, kind: input, shape index: {}]   ;;  %s9081_s1 = inlined_call_operand.hbm [shape: bf16[784,896], index: 1, kind: input, shape index: {}]   ;;  %s9082_s2 = inlined_call_operand.hbm [shape: f32[1,896], index: 2, kind: input, shape index: {}]   ;;  %s9083_s3 = inlined_call_operand.hbm [shape: bf16[896,512], index: 3, kind: input, shape index: {}]   ;;  %s9084_s4 = inlined_call_operand.hbm [shape: f32[1,512], index: 4, kind: input, shape index: {}]   ;;  %s9085_s5 = inlined_call_operand.hbm [shape: bf16[512,128], index: 5, kind: input, shape index: {}]   ;;  %s9086_s6 = inlined_call_operand.hbm [shape: f32[1,128], index: 6, kind: input, shape index: {}]   ;;  %s9087_s7 = inlined_call_operand.hbm [shape: bf16[128,128], index: 7, kind: input, shape index: {}]   ;;  %s9088_s8 = inlined_call_operand.hbm [shape: f32[1,128], index: 8, kind: input, shape index: {}]   ;;  %s9089_s9 = inlined_call_operand.hbm [shape: bf16[128,128], index: 9, kind: input, shape index: {}]   ;;  %s9090_s10 = inlined_call_operand.hbm [shape: f32[1,128], index: 10, kind: input, shape index: {}]   ;;  %s9091_s11 = inlined_call_operand.hbm [shape: f32[8,128], index: 11, kind: output, shape index: {}]  }
   0x1   :  { %17 = vsyncpa [#allocation6], 0 }
   0x2   :  { %18 = vsyncpa [#allocation9], 0 }
   0x3   :  { %19 = vsyncpa [#allocation12], 0 }
   0x4   :  { %20 = vsyncpa [#allocation15], 0 }
   0x5   :  { %21 = vsyncpa [#allocation18], 0  ;;  %s38_s19 = sshll.u32 %s9081_s1, 4  ;;  %s39_s19 = int_to_ptr.hbm [resolvable:$true] %s38_s19 }
   0x6   :  { %22 = vsyncpa [#allocation4], 0  ;;  %s8746_s20 = smov [#allocation5]   ;;  %s62_s24 = sshll.u32 %s9083_s3, 4  ;;  %s63_s24 = int_to_ptr.hbm [resolvable:$true] %s62_s24 }
   0x7   :  { %s40_s21 = sshll.u32 %s8746_s20, 4  ;;  %s8747_s25 = smov 448   ;;  %s41_s21 = int_to_ptr.vmem [resolvable:$true] %s40_s21 }
   0x8   :  { %s8748_s26 = smov 28   ;;  %s8749_s27 = smov [#allocation8]  }
   0x9   :  { %46 = dma.hbm_to_vmem [thread:$0]  %s39_s19, 43904, %s41_s21, [#allocation6], %s8747_s25, %s8747_s25, %s8748_s26  }
   0xa   :  { %s64_s28 = sshll.u32 %s8749_s27, 4  ;;  %s8750_s29 = smov 256   ;;  %s65_s28 = int_to_ptr.vmem [resolvable:$true] %s64_s28 }
   0xb   :  { %s8751_s30 = smov 16   ;;  %s86_s13 = sshll.u32 %s9085_s5, 4  ;;  %s87_s13 = int_to_ptr.hbm [resolvable:$true] %s86_s13 }
   0xc   :  { %70 = dma.hbm_to_vmem [thread:$0]  %s63_s24, 28672, %s65_s28, [#allocation9], %s8750_s29, %s8750_s29, %s8751_s30  }
   0xd   :  { %s8752_s14 = smov [#allocation11]   ;;  %s110_s17 = sshll.u32 %s9087_s7, 4  ;;  %s111_s17 = int_to_ptr.hbm [resolvable:$true] %s110_s17 }
   0xe   :  { %s88_s15 = sshll.u32 %s8752_s14, 4  ;;  %s8753_s18 = smov 64   ;;  %s89_s15 = int_to_ptr.vmem [resolvable:$true] %s88_s15 }
   0xf   :  { %s8754_s19 = smov 4   ;;  %s8755_s20 = smov [#allocation14]  }
  0x10   :  { %94 = dma.hbm_to_vmem [thread:$0]  %s87_s13, 4096, %s89_s15, [#allocation12], %s8753_s18, %s8753_s18, %s8754_s19  }
  0x11   :  { %s112_s21 = sshll.u32 %s8755_s20, 4  ;;  %s134_s24 = sshll.u32 %s9089_s9, 4  ;;  %s113_s21 = int_to_ptr.vmem [resolvable:$true] %s112_s21  ;;  %s135_s24 = int_to_ptr.hbm [resolvable:$true] %s134_s24 }
  0x12   :  { %118 = dma.hbm_to_vmem [thread:$0]  %s111_s17, 1024, %s113_s21, [#allocation15], %s8753_s18, %s8753_s18, %s8754_s19  }
  0x13   :  { %s28_s26 = sshll.u32 %s9080_s0, 4  ;;  %s8756_s27 = smov [#allocation17]   ;;  %s29_s26 = int_to_ptr.hbm [resolvable:$true] %s28_s26 }
  0x14   :  { %s136_s28 = sshll.u32 %s8756_s27, 4  ;;  %s8757_s7 = smov [#allocation2]   ;;  %s137_s28 = int_to_ptr.vmem [resolvable:$true] %s136_s28 }
  0x15   :  { %142 = dma.hbm_to_vmem [thread:$0]  %s135_s24, 1024, %s137_s28, [#allocation18], %s8753_s18, %s8753_s18, %s8754_s19  }
  0x16   :  { %s30_s29 = sshll.u32 %s8757_s7, 4  ;;  %s52_s12 = sshll.u32 %s9082_s2, 4  ;;  %s31_s29 = int_to_ptr.vmem [resolvable:$true] %s30_s29  ;;  %s53_s12 = int_to_ptr.hbm [resolvable:$true] %s52_s12 }
  0x17   :  { %33 = dma.hbm_to_vmem [thread:$0]  %s29_s26, 896, %s31_s29, [#allocation3]  }
  0x18   :  { %s76_s14 = sshll.u32 %s9084_s4, 4  ;;  %s8758_s15 = smov [#allocation7]   ;;  %s77_s14 = int_to_ptr.hbm [resolvable:$true] %s76_s14 }
  0x19   :  { %s54_s0 = sshll.u32 %s8758_s15, 4  ;;  %s8759_s16 = smov [#allocation10]   ;;  %s55_s0 = int_to_ptr.vmem [resolvable:$true] %s54_s0 }
  0x1a   :  { %57 = dma.hbm_to_vmem [thread:$0]  %s53_s12, 112, %s55_s0, [#allocation6]  }
  0x1b   :  { %s78_s3 = sshll.u32 %s8759_s16, 4  ;;  %s100_s19 = sshll.u32 %s9086_s6, 4  ;;  %s79_s3 = int_to_ptr.vmem [resolvable:$true] %s78_s3  ;;  %s101_s19 = int_to_ptr.hbm [resolvable:$true] %s100_s19 }
  0x1c   :  { %81 = dma.hbm_to_vmem [thread:$0]  %s77_s14, 64, %s79_s3, [#allocation9]  }
  0x1d   :  { %s124_s21 = sshll.u32 %s9088_s8, 4  ;;  %s8760_s22 = smov [#allocation13]   ;;  %s125_s21 = int_to_ptr.hbm [resolvable:$true] %s124_s21 }
  0x1e   :  { %s102_s4 = sshll.u32 %s8760_s22, 4  ;;  %s8761_s23 = smov [#allocation16]   ;;  %s103_s4 = int_to_ptr.vmem [resolvable:$true] %s102_s4 }
  0x1f   :  { %105 = dma.hbm_to_vmem [thread:$0]  %s101_s19, 16, %s103_s4, [#allocation12]  }
  0x20   :  { %s126_s24 = sshll.u32 %s8761_s23, 4  ;;  %s148_s26 = sshll.u32 %s9090_s10, 4  ;;  %s127_s24 = int_to_ptr.vmem [resolvable:$true] %s126_s24  ;;  %s149_s26 = int_to_ptr.hbm [resolvable:$true] %s148_s26 }
  0x21   :  { %129 = dma.hbm_to_vmem [thread:$0]  %s125_s21, 16, %s127_s24, [#allocation15]  }
  0x22   :  { %s8762_s6 = smov [#allocation19]  }
  0x23   :  { %s150_s27 = sshll.u32 %s8762_s6, 4  ;;  %s151_s27 = int_to_ptr.vmem [resolvable:$true] %s150_s27 }
  0x24   :  { %153 = dma.hbm_to_vmem [thread:$0]  %s149_s26, 16, %s151_s27, [#allocation18]  }
  0x25   :  { %8732 = dma.done.wait [#allocation3], 896  }
  0x26   :  { %8733 = vsyncadd [#allocation3], 4294966400 }
  0x27   :  { %8734 = dma.done.wait [#allocation6], 44016  }
  0x28   :  { %8735 = vsyncadd [#allocation6], 4294923280 }
  0x29   :  { %8736 = dma.done.wait [#allocation9], 28736  }
  0x2a   :  { %8737 = vsyncadd [#allocation9], 4294938560 }
  0x2b   :  { %8738 = dma.done.wait [#allocation12], 4112  }
  0x2c   :  { %8739 = vsyncadd [#allocation12], 4294963184 }
  0x2d   :  { %8740 = dma.done.wait [#allocation15], 1040  }
  0x2e   :  { %8741 = vsyncadd [#allocation15], 4294966256 }
  0x2f   :  { %8742 = dma.done.wait [#allocation18], 1040  }
  0x30   :  { %8743 = vsyncadd [#allocation18], 4294966256  ;;  %v5508_v0 = vld [vmem:[#allocation5 + $0x188] sm:$0xf]  ;;  %v7829_v1 = vld [vmem:[#allocation5 + $0x1a0] sm:$0xf0] }
  0x31   :  { %v5732_v2 = vld [vmem:[#allocation5 + $0x348] sm:$0xf]  ;;  %v5509_v3 = vor.u32 %v7829_v1, %v5508_v0  ;;  %v7885_v4 = vld [vmem:[#allocation5 + $0x360] sm:$0xf0]  ;;  %v5480_v11 = vld [vmem:[#allocation5 + $0x150] sm:$0xf] }
  0x32   :  { %v5956_v5 = vld [vmem:[#allocation5 + $0x508] sm:$0xf]  ;;  %v7941_v6 = vld [vmem:[#allocation5 + $0x520] sm:$0xf0]  ;;  %v5733_v7 = vor.u32 %v7885_v4, %v5732_v2  ;;  %v7822_v13 = vld [vmem:[#allocation5 + $0x168] sm:$0xf0] }
  0x33   :  { %v5957_v8 = vor.u32 %v7941_v6, %v5956_v5  ;;  %v6180_v9 = vld [vmem:[#allocation5 + $0x6c8] sm:$0xf]  ;;  %v7997_v10 = vld [vmem:[#allocation5 + $0x6e0] sm:$0xf0]  ;;  %2389 = vmatpush.bf16.msra.mxu0 %v5509_v3  ;;  %v5704_v14 = vld [vmem:[#allocation5 + $0x310] sm:$0xf]  ;;  %v5481_v16 = vor.u32 %v7822_v13, %v5480_v11 }
  0x34   :  { %v6181_v12 = vor.u32 %v7997_v10, %v6180_v9  ;;  %v7878_v15 = vld [vmem:[#allocation5 + $0x328] sm:$0xf0]  ;;  %2402 = vmatpush.bf16.msra.mxu1 %v5733_v7  ;;  %v5928_v18 = vld [vmem:[#allocation5 + $0x4d0] sm:$0xf]  ;;  %v5452_v23 = vld [vmem:[#allocation5 + $0x118] sm:$0xf] }
  0x35   :  { %2415 = vmatpush.bf16.msra.mxu2 %v5957_v8  ;;  %v5705_v17 = vor.u32 %v7878_v15, %v5704_v14  ;;  %v7934_v19 = vld [vmem:[#allocation5 + $0x4e8] sm:$0xf0]  ;;  %v6152_v20 = vld [vmem:[#allocation5 + $0x690] sm:$0xf]  ;;  %v7815_v24 = vld [vmem:[#allocation5 + $0x130] sm:$0xf0] }
  0x36   :  { %2428 = vmatpush.bf16.msra.mxu3 %v6181_v12  ;;  %v5929_v21 = vor.u32 %v7934_v19, %v5928_v18  ;;  %v7990_v22 = vld [vmem:[#allocation5 + $0x6a8] sm:$0xf0]  ;;  %v5676_v26 = vld [vmem:[#allocation5 + $0x2d8] sm:$0xf]  ;;  %v7871_v27 = vld [vmem:[#allocation5 + $0x2f0] sm:$0xf0]  ;;  %v5453_v29 = vor.u32 %v7815_v24, %v5452_v23 }
  0x37   :  { %v6153_v25 = vor.u32 %v7990_v22, %v6152_v20  ;;  %v5900_v28 = vld [vmem:[#allocation5 + $0x498] sm:$0xf]  ;;  %2390 = vmatpush.bf16.msra.mxu0 %v5481_v16  ;;  %v7927_v30 = vld [vmem:[#allocation5 + $0x4b0] sm:$0xf0]  ;;  %v5677_v33 = vor.u32 %v7871_v27, %v5676_v26  ;;  %v5424_v35 = vld [vmem:[#allocation5 + $0xe0] sm:$0xf] }
  0x38   :  { %v6124_v31 = vld [vmem:[#allocation5 + $0x658] sm:$0xf]  ;;  %v7983_v32 = vld [vmem:[#allocation5 + $0x670] sm:$0xf0]  ;;  %2403 = vmatpush.bf16.msra.mxu1 %v5705_v17  ;;  %v5901_v34 = vor.u32 %v7927_v30, %v5900_v28  ;;  %v7808_v36 = vld [vmem:[#allocation5 + $0xf8] sm:$0xf0] }
  0x39   :  { %2416 = vmatpush.bf16.msra.mxu2 %v5929_v21  ;;  %v5648_v37 = vld [vmem:[#allocation5 + $0x2a0] sm:$0xf]  ;;  %v6125_v38 = vor.u32 %v7983_v32, %v6124_v31  ;;  %v7864_v39 = vld [vmem:[#allocation5 + $0x2b8] sm:$0xf0]  ;;  %v5425_v44 = vor.u32 %v7808_v36, %v5424_v35  ;;  %v5396_v47 = vld [vmem:[#allocation5 + $0xa8] sm:$0xf] }
  0x3a   :  { %2429 = vmatpush.bf16.msra.mxu3 %v6153_v25  ;;  %v5872_v40 = vld [vmem:[#allocation5 + $0x460] sm:$0xf]  ;;  %v7920_v41 = vld [vmem:[#allocation5 + $0x478] sm:$0xf0]  ;;  %v5649_v45 = vor.u32 %v7864_v39, %v5648_v37  ;;  %v7801_v48 = vld [vmem:[#allocation5 + $0xc0] sm:$0xf0] }
  0x3b   :  { %v6096_v42 = vld [vmem:[#allocation5 + $0x620] sm:$0xf]  ;;  %v7976_v43 = vld [vmem:[#allocation5 + $0x638] sm:$0xf0]  ;;  %2391 = vmatpush.bf16.msra.mxu0 %v5453_v29  ;;  %v5873_v46 = vor.u32 %v7920_v41, %v5872_v40  ;;  %v5620_v49 = vld [vmem:[#allocation5 + $0x268] sm:$0xf]  ;;  %v5397_v56 = vor.u32 %v7801_v48, %v5396_v47 }
  0x3c   :  { %2404 = vmatpush.bf16.msra.mxu1 %v5677_v33  ;;  %v6097_v50 = vor.u32 %v7976_v43, %v6096_v42  ;;  %v7857_v51 = vld [vmem:[#allocation5 + $0x280] sm:$0xf0]  ;;  %v5844_v52 = vld [vmem:[#allocation5 + $0x428] sm:$0xf]  ;;  %v5368_v59 = vld [vmem:[#allocation5 + $0x70] sm:$0xf] }
  0x3d   :  { %2417 = vmatpush.bf16.msra.mxu2 %v5901_v34  ;;  %v7913_v53 = vld [vmem:[#allocation5 + $0x440] sm:$0xf0]  ;;  %v6068_v54 = vld [vmem:[#allocation5 + $0x5e8] sm:$0xf]  ;;  %v5621_v57 = vor.u32 %v7857_v51, %v5620_v49  ;;  %v7794_v60 = vld [vmem:[#allocation5 + $0x88] sm:$0xf0] }
  0x3e   :  { %2430 = vmatpush.bf16.msra.mxu3 %v6125_v38  ;;  %v7969_v55 = vld [vmem:[#allocation5 + $0x600] sm:$0xf0]  ;;  %v5845_v58 = vor.u32 %v7913_v53, %v5844_v52  ;;  %v5592_v61 = vld [vmem:[#allocation5 + $0x230] sm:$0xf]  ;;  %v7850_v63 = vld [vmem:[#allocation5 + $0x248] sm:$0xf0]  ;;  %v5369_v4 = vor.u32 %v7794_v60, %v5368_v59 }
  0x3f   :  { %2392 = vmatpush.bf16.msra.mxu0 %v5425_v44  ;;  %v6069_v62 = vor.u32 %v7969_v55, %v6068_v54  ;;  %v5816_v0 = vld [vmem:[#allocation5 + $0x3f0] sm:$0xf]  ;;  %v7906_v1 = vld [vmem:[#allocation5 + $0x408] sm:$0xf0]  ;;  %v5593_v5 = vor.u32 %v7850_v63, %v5592_v61  ;;  %v5340_v7 = vld [vmem:[#allocation5 + $0x38] sm:$0xf] }
  0x40   :  { %2405 = vmatpush.bf16.msra.mxu1 %v5649_v45  ;;  %v6040_v2 = vld [vmem:[#allocation5 + $0x5b0] sm:$0xf]  ;;  %v7962_v3 = vld [vmem:[#allocation5 + $0x5c8] sm:$0xf0]  ;;  %v5817_v6 = vor.u32 %v7906_v1, %v5816_v0  ;;  %v7787_v8 = vld [vmem:[#allocation5 + $0x50] sm:$0xf0] }
  0x41   :  { %2418 = vmatpush.bf16.msra.mxu2 %v5873_v46  ;;  %v5564_v9 = vld [vmem:[#allocation5 + $0x1f8] sm:$0xf]  ;;  %v6041_v10 = vor.u32 %v7962_v3, %v6040_v2  ;;  %v7843_v11 = vld [vmem:[#allocation5 + $0x210] sm:$0xf0]  ;;  %v5341_v16 = vor.u32 %v7787_v8, %v5340_v7  ;;  %v5312_v17 = vld [vmem:[#allocation5] sm:$0xf] }
  0x42   :  { %2431 = vmatpush.bf16.msra.mxu3 %v6097_v50  ;;  %v5788_v12 = vld [vmem:[#allocation5 + $0x3b8] sm:$0xf]  ;;  %v7899_v13 = vld [vmem:[#allocation5 + $0x3d0] sm:$0xf0]  ;;  %v7780_v18 = vld [vmem:[#allocation5 + $0x18] sm:$0xf0]  ;;  %v5565_v19 = vor.u32 %v7843_v11, %v5564_v9 }
  0x43   :  { %2393 = vmatpush.bf16.msra.mxu0 %v5397_v56  ;;  %v6012_v14 = vld [vmem:[#allocation5 + $0x578] sm:$0xf]  ;;  %v7955_v15 = vld [vmem:[#allocation5 + $0x590] sm:$0xf0]  ;;  %v5789_v20 = vor.u32 %v7899_v13, %v5788_v12  ;;  %v5536_v21 = vld [vmem:[#allocation5 + $0x1c0] sm:$0xf]  ;;  %v5313_v31 = vor.u32 %v7780_v18, %v5312_v17 }
  0x44   :  { %2406 = vmatpush.bf16.msra.mxu1 %v5621_v57  ;;  %v7836_v22 = vld [vmem:[#allocation5 + $0x1d8] sm:$0xf0]  ;;  %v5760_v23 = vld [vmem:[#allocation5 + $0x380] sm:$0xf]  ;;  %v6013_v24 = vor.u32 %v7955_v15, %v6012_v14  ;;  %v6404_v28 = vld [vmem:[#allocation5 + $0x888] sm:$0xf] }
  0x45   :  { %2419 = vmatpush.bf16.msra.mxu2 %v5845_v58  ;;  %v7892_v25 = vld [vmem:[#allocation5 + $0x398] sm:$0xf0]  ;;  %v5984_v26 = vld [vmem:[#allocation5 + $0x540] sm:$0xf]  ;;  %v8053_v29 = vld [vmem:[#allocation5 + $0x8a0] sm:$0xf0]  ;;  %v5537_v35 = vor.u32 %v7836_v22, %v5536_v21 }
  0x46   :  { %2432 = vmatpush.bf16.msra.mxu3 %v6069_v62  ;;  %v7948_v27 = vld [vmem:[#allocation5 + $0x558] sm:$0xf0]  ;;  %v6628_v30 = vld [vmem:[#allocation5 + $0xa48] sm:$0xf]  ;;  %v8109_v32 = vld [vmem:[#allocation5 + $0xa60] sm:$0xf0]  ;;  %v5761_v36 = vor.u32 %v7892_v25, %v5760_v23  ;;  %v6405_v40 = vor.u32 %v8053_v29, %v6404_v28 }
  0x47   :  { %2394 = vmatpush.bf16.msra.mxu0 %v5369_v4  ;;  %v7826_v33 = vld [vmem:[#allocation5 + $0x18c] sm:$0xf]  ;;  %v5510_v34 = vld [vmem:[#allocation5 + $0x1a4] sm:$0xf0]  ;;  %v6656_v37 = vld [vmem:[#allocation5 + $0xa80] sm:$0xf]  ;;  %v5985_v39 = vor.u32 %v7948_v27, %v5984_v26  ;;  %v6629_v44 = vor.u32 %v8109_v32, %v6628_v30 }
  0x48   :  { %2407 = vmatpush.bf16.msra.mxu1 %v5593_v5  ;;  %v8116_v38 = vld [vmem:[#allocation5 + $0xa98] sm:$0xf0]  ;;  %v7882_v42 = vld [vmem:[#allocation5 + $0x34c] sm:$0xf]  ;;  %v5734_v43 = vld [vmem:[#allocation5 + $0x364] sm:$0xf0]  ;;  %v5513_v45 = vor.u32 %v7826_v33, %v5510_v34 }
  0x49   :  { %2420 = vmatpush.bf16.msra.mxu2 %v5817_v6  ;;  %v201_v41 = vld [vmem:[#allocation2 + $0x10] sm:$0xff]  ;;  %v6376_v46 = vld [vmem:[#allocation5 + $0x850] sm:$0xf]  ;;  %v8046_v47 = vld [vmem:[#allocation5 + $0x868] sm:$0xf0]  ;;  %v6657_v49 = vor.u32 %v8116_v38, %v6656_v37  ;;  %v5737_v54 = vor.u32 %v7882_v42, %v5734_v43  ;;  %vm2385_vm0 = vcmask 130048  }
  0x4a   :  { %2433 = vmatpush.bf16.msra.mxu3 %v6041_v10  ;;  %v6600_v48 = vld [vmem:[#allocation5 + $0xa10] sm:$0xf]  ;;  %v8102_v50 = vld [vmem:[#allocation5 + $0xa28] sm:$0xf0]  ;;  %v7819_v51 = vld [vmem:[#allocation5 + $0x154] sm:$0xf]  ;;  %v8857_v53 = vpack.c.bf16 %v201_v41, %v201_v41  ;;  %v6377_v55 = vor.u32 %v8046_v47, %v6376_v46 }
  0x4b   :  { %2395 = vmatpush.bf16.msra.mxu0 %v5341_v16  ;;  %v5482_v52 = vld [vmem:[#allocation5 + $0x16c] sm:$0xf0]  ;;  %v7875_v56 = vld [vmem:[#allocation5 + $0x314] sm:$0xf]  ;;  %v6348_v58 = vld [vmem:[#allocation5 + $0x818] sm:$0xf]  ;;  %v6601_v59 = vor.u32 %v8102_v50, %v6600_v48 }
  0x4c   :  { %2408 = vmatpush.bf16.msra.mxu1 %v5565_v19  ;;  %v5706_v57 = vld [vmem:[#allocation5 + $0x32c] sm:$0xf0]  ;;  %v5485_v60 = vor.u32 %v7819_v51, %v5482_v52  ;;  %v8039_v61 = vld [vmem:[#allocation5 + $0x830] sm:$0xf0]  ;;  %v6572_v62 = vld [vmem:[#allocation5 + $0x9d8] sm:$0xf] }
  0x4d   :  { %2421 = vmatpush.bf16.msra.mxu2 %v5789_v20  ;;  %v8095_v63 = vld [vmem:[#allocation5 + $0x9f0] sm:$0xf0]  ;;  %v7812_v0 = vld [vmem:[#allocation5 + $0x11c] sm:$0xf]  ;;  %v5454_v1 = vld [vmem:[#allocation5 + $0x134] sm:$0xf0]  ;;  %v5709_v5 = vor.u32 %v7875_v56, %v5706_v57  ;;  %v6349_v6 = vor.u32 %v8039_v61, %v6348_v58 }
  0x4e   :  { %2434 = vmatpush.bf16.msra.mxu3 %v6013_v24  ;;  %v199_v2 = vld [vmem:[#allocation2] sm:$0xff]  ;;  %v7868_v3 = vld [vmem:[#allocation5 + $0x2dc] sm:$0xf]  ;;  %v5678_v7 = vld [vmem:[#allocation5 + $0x2f4] sm:$0xf0]  ;;  %v6573_v10 = vor.u32 %v8095_v63, %v6572_v62  ;;  %v5457_v11 = vor.u32 %v7812_v0, %v5454_v1  ;;  %s8763_s8 = smov [#allocation20]  }
  0x4f   :  { %2396 = vmatpush.bf16.msra.mxu0 %v5313_v31  ;;  %v8860_v4 = vpack.c.bf16 %v199_v2, %v199_v2  ;;  %v6320_v8 = vld [vmem:[#allocation5 + $0x7e0] sm:$0xf]  ;;  %v8032_v9 = vld [vmem:[#allocation5 + $0x7f8] sm:$0xf0]  ;;  %v200_v13 = vld [vmem:[#allocation2 + $0x8] sm:$0xff]  ;;  %v5681_v20 = vor.u32 %v7868_v3, %v5678_v7  ;;  %s5293_s10 = sshll.u32 %s8763_s8, 4  ;;  %s5294_s10 = int_to_ptr.vmem [resolvable:$true] %s5293_s10 }
  0x50   :  { %2409 = vmatpush.bf16.msra.mxu1 %v5537_v35  ;;  %v6544_v12 = vld [vmem:[#allocation5 + $0x9a0] sm:$0xf]  ;;  %v8088_v15 = vld [vmem:[#allocation5 + $0x9b8] sm:$0xf0]  ;;  %v7805_v16 = vld [vmem:[#allocation5 + $0xe4] sm:$0xf]  ;;  %v8863_v18 = vpack.c.bf16 %v200_v13, %v200_v13  ;;  %v6321_v21 = vor.u32 %v8032_v9, %v6320_v8 }
  0x51   :  { %2422 = vmatpush.bf16.msra.mxu2 %v5761_v36  ;;  %v202_v14 = vld [vmem:[#allocation2 + $0x18] sm:$0xff]  ;;  %v6545_v24 = vor.u32 %v8088_v15, %v6544_v12  ;;  %v6292_v26 = vld [vmem:[#allocation5 + $0x7a8] sm:$0xf]  ;;  %v7798_v30 = vld [vmem:[#allocation5 + $0xac] sm:$0xf]  ;;  %s5295_s29 = sshll.u32 %s9091_s11, 4  ;;  %s5296_s29 = int_to_ptr.hbm [resolvable:$true] %s5295_s29 }
  0x52   :  { %2435 = vmatpush.bf16.msra.mxu3 %v5985_v39  ;;  %v5426_v17 = vld [vmem:[#allocation5 + $0xfc] sm:$0xf0]  ;;  %2397 = vmatmul.bf16.vlgmr.msra.gmra.mxu0 %v8860_v4  ;;  %v8865_v19 = vpack.c.bf16 %v202_v14, %v202_v14  ;;  %v7861_v22 = vld [vmem:[#allocation5 + $0x2a4] sm:$0xf]  ;;  %v6516_v28 = vld [vmem:[#allocation5 + $0x968] sm:$0xf] }
  0x53   :  { %2441 = vmatpush.bf16.msrb.mxu0 %v6405_v40  ;;  %v5650_v23 = vld [vmem:[#allocation5 + $0x2bc] sm:$0xf0]  ;;  %v5429_v25 = vor.u32 %v7805_v16, %v5426_v17  ;;  %v8025_v27 = vld [vmem:[#allocation5 + $0x7c0] sm:$0xf0]  ;;  %v5398_v31 = vld [vmem:[#allocation5 + $0xc4] sm:$0xf0]  ;;  %2410 = vmatmul.bf16.vlgmr.msra.gmra.mxu1 %v8863_v18 }
  0x54   :  { %2454 = vmatpush.bf16.msrb.mxu1 %v6629_v44  ;;  %2423 = vmatmul.bf16.vlgmr.msra.gmra.mxu2 %v8857_v53  ;;  %v8081_v29 = vld [vmem:[#allocation5 + $0x980] sm:$0xf0]  ;;  %v5653_v32 = vor.u32 %v7861_v22, %v5650_v23  ;;  %v6293_v33 = vor.u32 %v8025_v27, %v6292_v26  ;;  %v7854_v34 = vld [vmem:[#allocation5 + $0x26c] sm:$0xf]  ;;  %v5622_v35 = vld [vmem:[#allocation5 + $0x284] sm:$0xf0]  ;;  %v5401_v38 = vor.u32 %v7798_v30, %v5398_v31 }
  0x55   :  { %2474 = vmatpush.bf16.msrb.mxu2 %v6657_v49  ;;  %2436 = vmatmul.bf16.vlgmr.msra.gmra.mxu3 %v8865_v19  ;;  %v6264_v36 = vld [vmem:[#allocation5 + $0x770] sm:$0xf]  ;;  %v6517_v37 = vor.u32 %v8081_v29, %v6516_v28  ;;  %v8018_v39 = vld [vmem:[#allocation5 + $0x788] sm:$0xf0]  ;;  %v205_v41 = vld [vmem:[#allocation2 + $0x30] sm:$0xff]  ;;  %v5625_v46 = vor.u32 %v7854_v34, %v5622_v35 }
  0x56   :  { %2480 = vmatpush.bf16.msrb.mxu3 %v5513_v45  ;;  %v6488_v40 = vld [vmem:[#allocation5 + $0x930] sm:$0xf]  ;;  %v8074_v42 = vld [vmem:[#allocation5 + $0x948] sm:$0xf0]  ;;  %v7791_v43 = vld [vmem:[#allocation5 + $0x74] sm:$0xf]  ;;  %v8869_v45 = vpack.c.bf16 %v205_v41, %v205_v41  ;;  %v6265_v47 = vor.u32 %v8018_v39, %v6264_v36 }
  0x57   :  { %2442 = vmatpush.bf16.msrb.mxu0 %v6377_v55  ;;  %v5370_v44 = vld [vmem:[#allocation5 + $0x8c] sm:$0xf0]  ;;  %v7847_v48 = vld [vmem:[#allocation5 + $0x234] sm:$0xf]  ;;  %v6489_v50 = vor.u32 %v8074_v42, %v6488_v40  ;;  %v6236_v52 = vld [vmem:[#allocation5 + $0x738] sm:$0xf] }
  0x58   :  { %2455 = vmatpush.bf16.msrb.mxu1 %v6601_v59  ;;  %v5594_v49 = vld [vmem:[#allocation5 + $0x24c] sm:$0xf0]  ;;  %v5373_v51 = vor.u32 %v7791_v43, %v5370_v44  ;;  %v6460_v55 = vld [vmem:[#allocation5 + $0x8f8] sm:$0xf]  ;;  %v8067_v56 = vld [vmem:[#allocation5 + $0x910] sm:$0xf0] }
  0x59   :  { %2493 = vmatpush.bf16.msra.mxu2 %v5737_v54  ;;  %v8011_v54 = vld [vmem:[#allocation5 + $0x750] sm:$0xf0]  ;;  %v7784_v57 = vld [vmem:[#allocation5 + $0x3c] sm:$0xf]  ;;  %v5342_v58 = vld [vmem:[#allocation5 + $0x54] sm:$0xf0]  ;;  %v5597_v59 = vor.u32 %v7847_v48, %v5594_v49  ;;  %v6461_v0 = vor.u32 %v8067_v56, %v6460_v55 }
  0x5a   :  { %2481 = vmatpush.bf16.msrb.mxu3 %v5485_v60  ;;  %v6237_v60 = vor.u32 %v8011_v54, %v6236_v52  ;;  %v7840_v61 = vld [vmem:[#allocation5 + $0x1fc] sm:$0xf]  ;;  %v5566_v62 = vld [vmem:[#allocation5 + $0x214] sm:$0xf0]  ;;  %v6208_v63 = vld [vmem:[#allocation5 + $0x700] sm:$0xf]  ;;  %v5345_v1 = vor.u32 %v7784_v57, %v5342_v58 }
  0x5b   :  { %2443 = vmatpush.bf16.msrb.mxu0 %v6349_v6  ;;  %v8004_v2 = vld [vmem:[#allocation5 + $0x718] sm:$0xf0]  ;;  %v6432_v3 = vld [vmem:[#allocation5 + $0x8c0] sm:$0xf]  ;;  %v7777_v6 = vld [vmem:[#allocation5 + $0x4] sm:$0xf]  ;;  %v5569_v12 = vor.u32 %v7840_v61, %v5566_v62 }
  0x5c   :  { %2456 = vmatpush.bf16.msrb.mxu1 %v6573_v10  ;;  %v5314_v7 = vld [vmem:[#allocation5 + $0x1c] sm:$0xf0]  ;;  %v7938_v8 = vld [vmem:[#allocation5 + $0x50c] sm:$0xf]  ;;  %v5958_v9 = vld [vmem:[#allocation5 + $0x524] sm:$0xf0]  ;;  %v6209_v13 = vor.u32 %v8004_v2, %v6208_v63 }
  0x5d   :  { %2494 = vmatpush.bf16.msra.mxu2 %v5709_v5  ;;  %v8060_v5 = vld [vmem:[#allocation5 + $0x8d8] sm:$0xf0]  ;;  %v7994_v10 = vld [vmem:[#allocation5 + $0x6cc] sm:$0xf]  ;;  %v6406_v15 = vld [vmem:[#allocation5 + $0x8a4] sm:$0xf0] }
  0x5e   :  { %2482 = vmatpush.bf16.msrb.mxu3 %v5457_v11  ;;  %v6182_v11 = vld [vmem:[#allocation5 + $0x6e4] sm:$0xf0]  ;;  %v8050_v14 = vld [vmem:[#allocation5 + $0x88c] sm:$0xf]  ;;  %v6433_v17 = vor.u32 %v8060_v5, %v6432_v3  ;;  %v5538_v22 = vld [vmem:[#allocation5 + $0x1dc] sm:$0xf0] }
  0x5f   :  { %2444 = vmatpush.bf16.msrb.mxu0 %v6321_v21  ;;  %v203_v16 = vld [vmem:[#allocation2 + $0x20] sm:$0xff]  ;;  %v7833_v21 = vld [vmem:[#allocation5 + $0x1c4] sm:$0xf]  ;;  %v204_v23 = vld [vmem:[#allocation2 + $0x28] sm:$0xff]  ;;  %v6409_v29 = vor.u32 %v8050_v14, %v6406_v15 }
  0x60   :  { %2457 = vmatpush.bf16.msrb.mxu1 %v6545_v24  ;;  %v5961_v24 = vor.u32 %v7938_v8, %v5958_v9  ;;  %v8106_v26 = vld [vmem:[#allocation5 + $0xa4c] sm:$0xf]  ;;  %v6630_v27 = vld [vmem:[#allocation5 + $0xa64] sm:$0xf0]  ;;  %v7931_v28 = vld [vmem:[#allocation5 + $0x4d4] sm:$0xf]  ;;  %v5541_v34 = vor.u32 %v7833_v21, %v5538_v22 }
  0x61   :  { %2495 = vmatpush.bf16.msra.mxu2 %v5681_v20  ;;  %v5317_v20 = vor.u32 %v7777_v6, %v5314_v7  ;;  %v5930_v30 = vld [vmem:[#allocation5 + $0x4ec] sm:$0xf0]  ;;  %v7987_v31 = vld [vmem:[#allocation5 + $0x694] sm:$0xf]  ;;  %v7924_v43 = vld [vmem:[#allocation5 + $0x49c] sm:$0xf] }
  0x62   :  { %2483 = vmatpush.bf16.msrb.mxu3 %v5429_v25  ;;  %v6185_v25 = vor.u32 %v7994_v10, %v6182_v11  ;;  %v8043_v35 = vld [vmem:[#allocation5 + $0x854] sm:$0xf]  ;;  %v6378_v36 = vld [vmem:[#allocation5 + $0x86c] sm:$0xf0]  ;;  %v5933_v39 = vor.u32 %v7931_v28, %v5930_v30  ;;  %v6126_v48 = vld [vmem:[#allocation5 + $0x674] sm:$0xf0] }
  0x63   :  { %2445 = vmatpush.bf16.msrb.mxu0 %v6293_v33  ;;  %v8873_v33 = vpack.c.bf16 %v203_v16, %v203_v16  ;;  %v8099_v41 = vld [vmem:[#allocation5 + $0xa14] sm:$0xf]  ;;  %v6602_v42 = vld [vmem:[#allocation5 + $0xa2c] sm:$0xf0]  ;;  %v6381_v44 = vor.u32 %v8043_v35, %v6378_v36  ;;  %v8036_v49 = vld [vmem:[#allocation5 + $0x81c] sm:$0xf] }
  0x64   :  { %2458 = vmatpush.bf16.msrb.mxu1 %v6517_v37  ;;  %6682 = vmatmul.msk.bf16.vlgmr.msrb.gmra.mxu2 %vm2385_vm0, %v8869_v45  ;;  %v8875_v37 = vpack.c.bf16 %v204_v23, %v204_v23  ;;  %v8092_v55 = vld [vmem:[#allocation5 + $0x9dc] sm:$0xf]  ;;  %v6574_v56 = vld [vmem:[#allocation5 + $0x9f4] sm:$0xf0]  ;;  %v7917_v57 = vld [vmem:[#allocation5 + $0x464] sm:$0xf] }
  0x65   :  { %2496 = vmatpush.bf16.msra.mxu2 %v5653_v32  ;;  %v6154_v32 = vld [vmem:[#allocation5 + $0x6ac] sm:$0xf0]  ;;  %v6098_v61 = vld [vmem:[#allocation5 + $0x63c] sm:$0xf0]  ;;  %v8029_v62 = vld [vmem:[#allocation5 + $0x7e4] sm:$0xf] }
  0x66   :  { %2484 = vmatpush.bf16.msrb.mxu3 %v5401_v38  ;;  %v6633_v38 = vor.u32 %v8106_v26, %v6630_v27  ;;  %v6157_v40 = vor.u32 %v7987_v31, %v6154_v32  ;;  %v6322_v63 = vld [vmem:[#allocation5 + $0x7fc] sm:$0xf0]  ;;  %v8085_v3 = vld [vmem:[#allocation5 + $0x9a4] sm:$0xf]  ;;  %v7910_v6 = vld [vmem:[#allocation5 + $0x42c] sm:$0xf] }
  0x67   :  { %2446 = vmatpush.bf16.msrb.mxu0 %v6265_v47  ;;  %v7980_v47 = vld [vmem:[#allocation5 + $0x65c] sm:$0xf]  ;;  %v6546_v5 = vld [vmem:[#allocation5 + $0x9bc] sm:$0xf0]  ;;  %v6325_v7 = vor.u32 %v8029_v62, %v6322_v63  ;;  %v5846_v8 = vld [vmem:[#allocation5 + $0x444] sm:$0xf0] }
  0x68   :  { %2459 = vmatpush.bf16.msrb.mxu1 %v6489_v50  ;;  %v6350_v50 = vld [vmem:[#allocation5 + $0x834] sm:$0xf0]  ;;  %v6129_v54 = vor.u32 %v7980_v47, %v6126_v48  ;;  %v7966_v9 = vld [vmem:[#allocation5 + $0x5ec] sm:$0xf]  ;;  %v6070_v10 = vld [vmem:[#allocation5 + $0x604] sm:$0xf0]  ;;  %v5849_v14 = vor.u32 %v7910_v6, %v5846_v8 }
  0x69   :  { %2497 = vmatpush.bf16.msra.mxu2 %v5625_v46  ;;  %v5902_v46 = vld [vmem:[#allocation5 + $0x4b4] sm:$0xf0]  ;;  %v6353_v58 = vor.u32 %v8036_v49, %v6350_v50  ;;  %v8022_v11 = vld [vmem:[#allocation5 + $0x7ac] sm:$0xf]  ;;  %v6073_v15 = vor.u32 %v7966_v9, %v6070_v10  ;;  %v5818_v22 = vld [vmem:[#allocation5 + $0x40c] sm:$0xf0] }
  0x6a   :  { %2485 = vmatpush.bf16.msrb.mxu3 %v5373_v51  ;;  %v6605_v51 = vor.u32 %v8099_v41, %v6602_v42  ;;  %v5905_v52 = vor.u32 %v7924_v43, %v5902_v46  ;;  %v8078_v16 = vld [vmem:[#allocation5 + $0x96c] sm:$0xf]  ;;  %v7959_v23 = vld [vmem:[#allocation5 + $0x5b4] sm:$0xf]  ;;  %v6266_v26 = vld [vmem:[#allocation5 + $0x78c] sm:$0xf0] }
  0x6b   :  { %2447 = vmatpush.bf16.msrb.mxu0 %v6237_v60  ;;  %v7973_v60 = vld [vmem:[#allocation5 + $0x624] sm:$0xf]  ;;  %v8071_v30 = vld [vmem:[#allocation5 + $0x934] sm:$0xf]  ;;  %v6490_v31 = vld [vmem:[#allocation5 + $0x94c] sm:$0xf0] }
  0x6c   :  { %2460 = vmatpush.bf16.msrb.mxu1 %v6461_v0  ;;  %v6577_v0 = vor.u32 %v8092_v55, %v6574_v56  ;;  %v6101_v2 = vor.u32 %v7973_v60, %v6098_v61  ;;  %v7896_v32 = vld [vmem:[#allocation5 + $0x3bc] sm:$0xf]  ;;  %v5790_v35 = vld [vmem:[#allocation5 + $0x3d4] sm:$0xf0]  ;;  %v6493_v41 = vor.u32 %v8071_v30, %v6490_v31  ;;  %v7889_v47 = vld [vmem:[#allocation5 + $0x384] sm:$0xf] }
  0x6d   :  { %2498 = vmatpush.bf16.msra.mxu2 %v5597_v59  ;;  %v5874_v59 = vld [vmem:[#allocation5 + $0x47c] sm:$0xf0]  ;;  %v7952_v36 = vld [vmem:[#allocation5 + $0x57c] sm:$0xf]  ;;  %v6462_v43 = vld [vmem:[#allocation5 + $0x914] sm:$0xf0] }
  0x6e   :  { %2486 = vmatpush.bf16.msrb.mxu3 %v5345_v1  ;;  %v5877_v1 = vor.u32 %v7917_v57, %v5874_v59  ;;  %v8064_v42 = vld [vmem:[#allocation5 + $0x8fc] sm:$0xf]  ;;  %v5762_v48 = vld [vmem:[#allocation5 + $0x39c] sm:$0xf0]  ;;  %v7945_v49 = vld [vmem:[#allocation5 + $0x544] sm:$0xf] }
  0x6f   :  { %2448 = vmatpush.bf16.msrb.mxu0 %v6209_v13  ;;  %v6549_v13 = vor.u32 %v8085_v3, %v6546_v5  ;;  %v5740_v55 = vld [vmem:[#allocation5 + $0x350] sm:$0xf]  ;;  %v7942_v57 = vld [vmem:[#allocation5 + $0x528] sm:$0xf0]  ;;  %v8113_v60 = vld [vmem:[#allocation5 + $0xa84] sm:$0xf]  ;;  %v5765_v62 = vor.u32 %v7889_v47, %v5762_v48 }
  0x70   :  { %2461 = vmatpush.bf16.msrb.mxu1 %v6433_v17  ;;  %v6518_v17 = vld [vmem:[#allocation5 + $0x984] sm:$0xf0]  ;;  %v5964_v56 = vld [vmem:[#allocation5 + $0x510] sm:$0xf]  ;;  %v7886_v59 = vld [vmem:[#allocation5 + $0x368] sm:$0xf0] }
  0x71   :  { %2499 = vmatpush.bf16.msra.mxu2 %v5569_v12  ;;  %v6294_v12 = vld [vmem:[#allocation5 + $0x7c4] sm:$0xf0]  ;;  %v6521_v27 = vor.u32 %v8078_v16, %v6518_v17  ;;  %v6658_v61 = vld [vmem:[#allocation5 + $0xa9c] sm:$0xf0]  ;;  %v5965_v5 = vor.u32 %v7942_v57, %v5964_v56  ;;  %v7830_v6 = vld [vmem:[#allocation5 + $0x1a8] sm:$0xf0] }
  0x72   :  { %2487 = vmatpush.bf16.msrb.mxu3 %v5317_v20  ;;  %2449 = vmatmul.bf16.vlgmr.msrb.gmra.mxu0 %v8873_v33  ;;  %v7903_v20 = vld [vmem:[#allocation5 + $0x3f4] sm:$0xf]  ;;  %v6297_v21 = vor.u32 %v8022_v11, %v6294_v12  ;;  %v6661_v8 = vor.u32 %v8113_v60, %v6658_v61  ;;  %v6188_v9 = vld [vmem:[#allocation5 + $0x6d0] sm:$0xf]  ;;  %v7998_v10 = vld [vmem:[#allocation5 + $0x6e8] sm:$0xf0] }
  0x73   :  { %2506 = vmatpush.bf16.msra.mxu0 %v5961_v24  ;;  %2462 = vmatmul.bf16.vlgmr.msrb.gmra.mxu1 %v8875_v37  ;;  %v6042_v24 = vld [vmem:[#allocation5 + $0x5cc] sm:$0xf0]  ;;  %v5821_v28 = vor.u32 %v7903_v20, %v5818_v22  ;;  %v5712_v11 = vld [vmem:[#allocation5 + $0x318] sm:$0xf]  ;;  %v7879_v12 = vld [vmem:[#allocation5 + $0x330] sm:$0xf0]  ;;  %v6189_v17 = vor.u32 %v7998_v10, %v6188_v9 }
  0x74   :  { %2519 = vmatpush.bf16.msra.mxu1 %v6185_v25  ;;  %v8015_v25 = vld [vmem:[#allocation5 + $0x774] sm:$0xf]  ;;  %v5488_v20 = vld [vmem:[#allocation5 + $0x158] sm:$0xf]  ;;  %v5432_v47 = vld [vmem:[#allocation5 + $0xe8] sm:$0xf] }
  0x75   :  { %2500 = vmatpush.bf16.msra.mxu2 %v5541_v34  ;;  %2488 = vmatmul.bf16.vlgmr.msrb.gmra.mxu3 %v8860_v4  ;;  %v6269_v34 = vor.u32 %v8015_v25, %v6266_v26  ;;  %v6160_v22 = vld [vmem:[#allocation5 + $0x698] sm:$0xf]  ;;  %v7991_v25 = vld [vmem:[#allocation5 + $0x6b0] sm:$0xf0]  ;;  %v5684_v26 = vld [vmem:[#allocation5 + $0x2e0] sm:$0xf] }
  0x76   :  { %2532 = vmatpush.bf16.msra.mxu3 %v6409_v29  ;;  %v6045_v29 = vor.u32 %v7959_v23, %v6042_v24  ;;  %v5713_v23 = vor.u32 %v7879_v12, %v5712_v11  ;;  %v6161_v31 = vor.u32 %v7991_v25, %v6160_v22  ;;  %v7809_v48 = vld [vmem:[#allocation5 + $0x100] sm:$0xf0]  ;;  %v5852_v56 = vld [vmem:[#allocation5 + $0x430] sm:$0xf]  ;;  %v7914_v57 = vld [vmem:[#allocation5 + $0x448] sm:$0xf0] }
  0x77   :  { %2507 = vmatpush.bf16.msra.mxu0 %v5933_v39  ;;  %v8008_v39 = vld [vmem:[#allocation5 + $0x73c] sm:$0xf]  ;;  %v5404_v60 = vld [vmem:[#allocation5 + $0xb0] sm:$0xf]  ;;  %v7802_v61 = vld [vmem:[#allocation5 + $0xc8] sm:$0xf0] }
  0x78   :  { %2520 = vmatpush.bf16.msra.mxu1 %v6157_v40  ;;  %2501 = vmatmul.bf16.vlgmr.msra.gmra.mxu2 %v8863_v18  ;;  %v6238_v40 = vld [vmem:[#allocation5 + $0x754] sm:$0xf0]  ;;  %v7795_v10 = vld [vmem:[#allocation5 + $0x90] sm:$0xf0]  ;;  %v6020_v25 = vld [vmem:[#allocation5 + $0x580] sm:$0xf] }
  0x79   :  { %2545 = vmatpush.bf16.msrb.mxu2 %v6633_v38  ;;  %v6014_v38 = vld [vmem:[#allocation5 + $0x594] sm:$0xf0]  ;;  %v6241_v50 = vor.u32 %v8008_v39, %v6238_v40  ;;  %v7984_v39 = vld [vmem:[#allocation5 + $0x678] sm:$0xf0]  ;;  %v5656_v40 = vld [vmem:[#allocation5 + $0x2a8] sm:$0xf] }
  0x7a   :  { %2533 = vmatpush.bf16.msra.mxu3 %v6381_v44  ;;  %v5793_v44 = vor.u32 %v7896_v32, %v5790_v35  ;;  %v6017_v46 = vor.u32 %v7952_v36, %v6014_v38  ;;  %v5460_v32 = vld [vmem:[#allocation5 + $0x120] sm:$0xf]  ;;  %v5376_v9 = vld [vmem:[#allocation5 + $0x78] sm:$0xf] }
  0x7b   :  { %2508 = vmatpush.bf16.msra.mxu0 %v5905_v52  ;;  %v8001_v52 = vld [vmem:[#allocation5 + $0x704] sm:$0xf]  ;;  %v6132_v38 = vld [vmem:[#allocation5 + $0x660] sm:$0xf] }
  0x7c   :  { %2521 = vmatpush.bf16.msra.mxu1 %v6129_v54  ;;  %v6210_v54 = vld [vmem:[#allocation5 + $0x71c] sm:$0xf0] }
  0x7d   :  { %2546 = vmatpush.bf16.msrb.mxu2 %v6605_v51  ;;  %v5986_v51 = vld [vmem:[#allocation5 + $0x55c] sm:$0xf0]  ;;  %v6213_v3 = vor.u32 %v8001_v52, %v6210_v54  ;;  %v7977_v52 = vld [vmem:[#allocation5 + $0x640] sm:$0xf0]  ;;  %v5628_v54 = vld [vmem:[#allocation5 + $0x270] sm:$0xf] }
  0x7e   :  { %2534 = vmatpush.bf16.msra.mxu3 %v6353_v58  ;;  %v6465_v58 = vor.u32 %v8064_v42, %v6462_v43  ;;  %v5989_v63 = vor.u32 %v7945_v49, %v5986_v51  ;;  %v5880_v42 = vld [vmem:[#allocation5 + $0x468] sm:$0xf]  ;;  %v7921_v43 = vld [vmem:[#allocation5 + $0x480] sm:$0xf0] }
  0x7f   :  { %2509 = vmatpush.bf16.msra.mxu0 %v5877_v1  ;;  %v6434_v1 = vld [vmem:[#allocation5 + $0x8dc] sm:$0xf0]  ;;  %v6104_v51 = vld [vmem:[#allocation5 + $0x628] sm:$0xf] }
  0x80   :  { %2522 = vmatpush.bf16.msra.mxu1 %v6101_v2  ;;  %v5516_v2 = vld [vmem:[#allocation5 + $0x190] sm:$0xf] }
  0x81   :  { %2547 = vmatpush.bf16.msrb.mxu2 %v6577_v0  ;;  %v8057_v0 = vld [vmem:[#allocation5 + $0x8c4] sm:$0xf]  ;;  %v5517_v16 = vor.u32 %v7830_v6, %v5516_v2  ;;  %v5600_v2 = vld [vmem:[#allocation5 + $0x238] sm:$0xf]  ;;  %v7907_v6 = vld [vmem:[#allocation5 + $0x410] sm:$0xf0] }
  0x82   :  { %2535 = vmatpush.bf16.msra.mxu3 %v6325_v7  ;;  %v5741_v7 = vor.u32 %v7886_v59, %v5740_v55  ;;  %v7858_v55 = vld [vmem:[#allocation5 + $0x288] sm:$0xf0]  ;;  %v6105_v59 = vor.u32 %v7977_v52, %v6104_v51  ;;  %v7827_v52 = vld [vmem:[#allocation5 + $0x194] sm:$0xf] }
  0x83   :  { %2510 = vmatpush.bf16.msra.mxu0 %v5849_v14  ;;  %v7935_v14 = vld [vmem:[#allocation5 + $0x4f0] sm:$0xf0]  ;;  %v8054_v51 = vld [vmem:[#allocation5 + $0x8a8] sm:$0xf0] }
  0x84   :  { %2523 = vmatpush.bf16.msra.mxu1 %v6073_v15  ;;  %v6437_v15 = vor.u32 %v8057_v0, %v6434_v1  ;;  %v6076_v0 = vld [vmem:[#allocation5 + $0x5f0] sm:$0xf]  ;;  %v7970_v1 = vld [vmem:[#allocation5 + $0x608] sm:$0xf0] }
  0x85   :  { %2548 = vmatpush.bf16.msrb.mxu2 %v6549_v13  ;;  %v5936_v13 = vld [vmem:[#allocation5 + $0x4d8] sm:$0xf] }
  0x86   :  { %2536 = vmatpush.bf16.msra.mxu3 %v6297_v21  ;;  %v7823_v21 = vld [vmem:[#allocation5 + $0x170] sm:$0xf0]  ;;  %v5937_v24 = vor.u32 %v7935_v14, %v5936_v13  ;;  %v6048_v13 = vld [vmem:[#allocation5 + $0x5b8] sm:$0xf] }
  0x87   :  { %2511 = vmatpush.bf16.msra.mxu0 %v5821_v28  ;;  %v5908_v28 = vld [vmem:[#allocation5 + $0x4a0] sm:$0xf]  ;;  %v5489_v30 = vor.u32 %v7823_v21, %v5488_v20  ;;  %v7963_v14 = vld [vmem:[#allocation5 + $0x5d0] sm:$0xf0]  ;;  %v7900_v20 = vld [vmem:[#allocation5 + $0x3d8] sm:$0xf0]  ;;  %v5377_v21 = vor.u32 %v7795_v10, %v5376_v9 }
  0x88   :  { %2524 = vmatpush.bf16.msra.mxu1 %v6045_v29  ;;  %v7928_v29 = vld [vmem:[#allocation5 + $0x4b8] sm:$0xf0]  ;;  %v6049_v22 = vor.u32 %v7963_v14, %v6048_v13  ;;  %v6356_v13 = vld [vmem:[#allocation5 + $0x820] sm:$0xf] }
  0x89   :  { %2549 = vmatpush.bf16.msrb.mxu2 %v6521_v27  ;;  %v7872_v27 = vld [vmem:[#allocation5 + $0x2f8] sm:$0xf0]  ;;  %v5909_v36 = vor.u32 %v7928_v29, %v5908_v28  ;;  %v5544_v29 = vld [vmem:[#allocation5 + $0x1c8] sm:$0xf] }
  0x8a   :  { %2537 = vmatpush.bf16.msra.mxu3 %v6269_v34  ;;  %v7816_v34 = vld [vmem:[#allocation5 + $0x138] sm:$0xf0]  ;;  %v5685_v35 = vor.u32 %v7872_v27, %v5684_v26 }
  0x8b   :  { %2512 = vmatpush.bf16.msra.mxu0 %v5793_v44  ;;  %v5461_v44 = vor.u32 %v7816_v34, %v5460_v32  ;;  %v7956_v28 = vld [vmem:[#allocation5 + $0x598] sm:$0xf0]  ;;  %v7893_v32 = vld [vmem:[#allocation5 + $0x3a0] sm:$0xf0]  ;;  %v6636_v34 = vld [vmem:[#allocation5 + $0xa50] sm:$0xf] }
  0x8c   :  { %2525 = vmatpush.bf16.msra.mxu1 %v6017_v46  ;;  %v6133_v46 = vor.u32 %v7984_v39, %v6132_v38  ;;  %v8117_v38 = vld [vmem:[#allocation5 + $0xaa0] sm:$0xf0]  ;;  %v8096_v9 = vld [vmem:[#allocation5 + $0x9f8] sm:$0xf0] }
  0x8d   :  { %2550 = vmatpush.bf16.msrb.mxu2 %v6493_v41  ;;  %v7865_v41 = vld [vmem:[#allocation5 + $0x2c0] sm:$0xf0]  ;;  %v8040_v14 = vld [vmem:[#allocation5 + $0x838] sm:$0xf0] }
  0x8e   :  { %2538 = vmatpush.bf16.msra.mxu3 %v6241_v50  ;;  %v5657_v49 = vor.u32 %v7865_v41, %v5656_v40  ;;  %v5881_v50 = vor.u32 %v7921_v43, %v5880_v42  ;;  %v6021_v40 = vor.u32 %v7956_v28, %v6020_v25  ;;  %v5320_v41 = vld [vmem:[#allocation5 + $0x8] sm:$0xf]  ;;  %v8033_v28 = vld [vmem:[#allocation5 + $0x800] sm:$0xf0] }
  0x8f   :  { %2513 = vmatpush.bf16.msra.mxu0 %v5765_v62  ;;  %v5629_v62 = vor.u32 %v7858_v55, %v5628_v54  ;;  %v5518_v54 = vld [vmem:[#allocation5 + $0x1ac] sm:$0xf0]  ;;  %v7883_v55 = vld [vmem:[#allocation5 + $0x354] sm:$0xf] }
  0x90   :  { %2526 = vmatpush.bf16.msra.mxu1 %v5989_v63  ;;  %v5853_v63 = vor.u32 %v7914_v57, %v5852_v56  ;;  %v5742_v56 = vld [vmem:[#allocation5 + $0x36c] sm:$0xf0] }
  0x91   :  { %2551 = vmatpush.bf16.msrb.mxu2 %v6465_v58  ;;  %v5433_v58 = vor.u32 %v7809_v48, %v5432_v47  ;;  %v7949_v47 = vld [vmem:[#allocation5 + $0x560] sm:$0xf0] }
  0x92   :  { %2539 = vmatpush.bf16.msra.mxu3 %v6213_v3  ;;  %2514 = vmatmul.bf16.vlgmr.msra.gmra.mxu0 %v8857_v53  ;;  %v7851_v3 = vld [vmem:[#allocation5 + $0x250] sm:$0xf0] }
  0x93   :  { %2597 = vmatpush.bf16.msrb.mxu0 %v5965_v5  ;;  %2527 = vmatmul.bf16.vlgmr.msra.gmra.mxu1 %v8865_v19  ;;  %v5824_v5 = vld [vmem:[#allocation5 + $0x3f8] sm:$0xf]  ;;  %v5601_v11 = vor.u32 %v7851_v3, %v5600_v2  ;;  %v7820_v2 = vld [vmem:[#allocation5 + $0x15c] sm:$0xf] }
  0x94   :  { %2565 = vmatpush.bf16.msrb.mxu1 %v6661_v8  ;;  %v6077_v8 = vor.u32 %v7970_v1, %v6076_v0  ;;  %v5825_v12 = vor.u32 %v7907_v6, %v5824_v5  ;;  %v6384_v0 = vld [vmem:[#allocation5 + $0x858] sm:$0xf]  ;;  %v8047_v1 = vld [vmem:[#allocation5 + $0x870] sm:$0xf0]  ;;  %v7876_v6 = vld [vmem:[#allocation5 + $0x31c] sm:$0xf] }
  0x95   :  { %2540 = vmatmul.bf16.vlgmr.msra.gmra.mxu3 %v8873_v33  ;;  %2552 = vmatpush.bf16.msrb.mxu2 %v6437_v15  ;;  %v5572_v15 = vld [vmem:[#allocation5 + $0x200] sm:$0xf]  ;;  %v5490_v5 = vld [vmem:[#allocation5 + $0x174] sm:$0xf0]  ;;  %v6385_v10 = vor.u32 %v8047_v1, %v6384_v0 }
  0x96   :  { %2584 = vmatpush.bf16.msrb.mxu3 %v5741_v7  ;;  %v5405_v7 = vor.u32 %v7802_v61, %v5404_v60  ;;  %v8103_v60 = vld [vmem:[#allocation5 + $0xa30] sm:$0xf0] }
  0x97   :  { %2598 = vmatpush.bf16.msrb.mxu0 %v5937_v24  ;;  %v7788_v24 = vld [vmem:[#allocation5 + $0x58] sm:$0xf0] }
  0x98   :  { %2571 = vmatpush.bf16.msra.mxu1 %v5517_v16  ;;  %2553 = vmatmul.bf16.vlgmr.msrb.gmra.mxu2 %v8875_v37  ;;  %v7844_v16 = vld [vmem:[#allocation5 + $0x218] sm:$0xf0] }
  0x99   :  { %2610 = vmatpush.bf16.msra.mxu2 %v6189_v17  ;;  %v5796_v17 = vld [vmem:[#allocation5 + $0x3c0] sm:$0xf]  ;;  %v5573_v26 = vor.u32 %v7844_v16, %v5572_v15  ;;  %v7813_v15 = vld [vmem:[#allocation5 + $0x124] sm:$0xf] }
  0x9a   :  { %2585 = vmatpush.bf16.msrb.mxu3 %v5713_v23  ;;  %v5348_v23 = vld [vmem:[#allocation5 + $0x40] sm:$0xf]  ;;  %v5797_v27 = vor.u32 %v7900_v20, %v5796_v17  ;;  %v7869_v20 = vld [vmem:[#allocation5 + $0x2e4] sm:$0xf] }
  0x9b   :  { %2599 = vmatpush.bf16.msrb.mxu0 %v5909_v36  ;;  %v6664_v36 = vld [vmem:[#allocation5 + $0xa88] sm:$0xf]  ;;  %v5349_v39 = vor.u32 %v7788_v24, %v5348_v23  ;;  %v5462_v17 = vld [vmem:[#allocation5 + $0x13c] sm:$0xf0]  ;;  %v8089_v23 = vld [vmem:[#allocation5 + $0x9c0] sm:$0xf0]  ;;  %v6357_v24 = vor.u32 %v8040_v14, %v6356_v13 }
  0x9c   :  { %2572 = vmatpush.bf16.msra.mxu1 %v5489_v30  ;;  %v7837_v30 = vld [vmem:[#allocation5 + $0x1e0] sm:$0xf0]  ;;  %v5465_v25 = vor.u32 %v7813_v15, %v5462_v17  ;;  %v7995_v14 = vld [vmem:[#allocation5 + $0x6d4] sm:$0xf]  ;;  %v6190_v15 = vld [vmem:[#allocation5 + $0x6ec] sm:$0xf0] }
  0x9d   :  { %2611 = vmatpush.bf16.msra.mxu2 %v6161_v31  ;;  %v5768_v31 = vld [vmem:[#allocation5 + $0x388] sm:$0xf]  ;;  %v5545_v42 = vor.u32 %v7837_v30, %v5544_v29  ;;  %v7806_v29 = vld [vmem:[#allocation5 + $0xec] sm:$0xf] }
  0x9e   :  { %2586 = vmatpush.bf16.msrb.mxu3 %v5685_v35  ;;  %v8110_v35 = vld [vmem:[#allocation5 + $0xa68] sm:$0xf0]  ;;  %v5769_v43 = vor.u32 %v7893_v32, %v5768_v31  ;;  %v5434_v31 = vld [vmem:[#allocation5 + $0x104] sm:$0xf0] }
  0x9f   :  { %2600 = vmatpush.bf16.msrb.mxu0 %v5881_v50  ;;  %v6637_v48 = vor.u32 %v8110_v35, %v6636_v34  ;;  %v6412_v50 = vld [vmem:[#allocation5 + $0x890] sm:$0xf]  ;;  %v7862_v32 = vld [vmem:[#allocation5 + $0x2ac] sm:$0xf]  ;;  %v5658_v34 = vld [vmem:[#allocation5 + $0x2c4] sm:$0xf0] }
  0xa0   :  { %2573 = vmatpush.bf16.msra.mxu1 %v5461_v44  ;;  %v7781_v44 = vld [vmem:[#allocation5 + $0x20] sm:$0xf0]  ;;  %v6413_v61 = vor.u32 %v8054_v51, %v6412_v50  ;;  %v6524_v35 = vld [vmem:[#allocation5 + $0x970] sm:$0xf]  ;;  %v8075_v50 = vld [vmem:[#allocation5 + $0x950] sm:$0xf0] }
  0xa1   :  { %2612 = vmatpush.bf16.msra.mxu2 %v6133_v46  ;;  %v5992_v46 = vld [vmem:[#allocation5 + $0x548] sm:$0xf]  ;;  %v5321_v57 = vor.u32 %v7781_v44, %v5320_v41  ;;  %v6300_v41 = vld [vmem:[#allocation5 + $0x7b0] sm:$0xf] }
  0xa2   :  { %2587 = vmatpush.bf16.msrb.mxu3 %v5657_v49  ;;  %v6665_v49 = vor.u32 %v8117_v38, %v6664_v36  ;;  %v8082_v36 = vld [vmem:[#allocation5 + $0x988] sm:$0xf0] }
  0xa3   :  { %2601 = vmatpush.bf16.msrb.mxu0 %v5853_v63  ;;  %6683 = vmatmul.msk.bf16.vlgmr.msrb.gmra.mxu1 %vm2385_vm0, %v8869_v45  ;;  %v5745_v63 = vor.u32 %v7883_v55, %v5742_v56  ;;  %v6525_v44 = vor.u32 %v8082_v36, %v6524_v35  ;;  %v6272_v55 = vld [vmem:[#allocation5 + $0x778] sm:$0xf]  ;;  %v8019_v56 = vld [vmem:[#allocation5 + $0x790] sm:$0xf0]  ;;  %v6638_v35 = vld [vmem:[#allocation5 + $0xa6c] sm:$0xf0] }
  0xa4   :  { %2574 = vmatpush.bf16.msra.mxu1 %v5433_v58  ;;  %v5993_v58 = vor.u32 %v7949_v47, %v5992_v46  ;;  %v5406_v46 = vld [vmem:[#allocation5 + $0xcc] sm:$0xf0]  ;;  %v7855_v47 = vld [vmem:[#allocation5 + $0x274] sm:$0xf]  ;;  %v6273_v0 = vor.u32 %v8019_v56, %v6272_v55 }
  0xa5   :  { %2613 = vmatpush.bf16.msra.mxu2 %v6105_v59  ;;  %v6608_v59 = vld [vmem:[#allocation5 + $0xa18] sm:$0xf] }
  0xa6   :  { %2588 = vmatpush.bf16.msrb.mxu3 %v5629_v62  ;;  %v5521_v62 = vor.u32 %v7827_v52, %v5518_v54  ;;  %v6609_v3 = vor.u32 %v8103_v60, %v6608_v59  ;;  %v5378_v59 = vld [vmem:[#allocation5 + $0x94] sm:$0xf0]  ;;  %v7848_v60 = vld [vmem:[#allocation5 + $0x23c] sm:$0xf] }
  0xa7   :  { %2602 = vmatpush.bf16.msrb.mxu0 %v5825_v12 }
  0xa8   :  { %2575 = vmatpush.bf16.msra.mxu1 %v5405_v7  ;;  %v5714_v7 = vld [vmem:[#allocation5 + $0x334] sm:$0xf0] }
  0xa9   :  { %2614 = vmatpush.bf16.msra.mxu2 %v6077_v8  ;;  %v6580_v8 = vld [vmem:[#allocation5 + $0x9e0] sm:$0xf]  ;;  %v5717_v12 = vor.u32 %v7876_v6, %v5714_v7  ;;  %v7785_v6 = vld [vmem:[#allocation5 + $0x44] sm:$0xf] }
  0xaa   :  { %2589 = vmatpush.bf16.msrb.mxu3 %v5601_v11  ;;  %v5493_v11 = vor.u32 %v7820_v2, %v5490_v5  ;;  %v6581_v16 = vor.u32 %v8096_v9, %v6580_v8  ;;  %v8012_v5 = vld [vmem:[#allocation5 + $0x758] sm:$0xf0]  ;;  %v5350_v8 = vld [vmem:[#allocation5 + $0x5c] sm:$0xf0]  ;;  %v7841_v9 = vld [vmem:[#allocation5 + $0x204] sm:$0xf] }
  0xab   :  { %2603 = vmatpush.bf16.msrb.mxu0 %v5797_v27  ;;  %v6328_v27 = vld [vmem:[#allocation5 + $0x7e8] sm:$0xf] }
  0xac   :  { %2576 = vmatpush.bf16.msra.mxu1 %v5377_v21  ;;  %v5686_v21 = vld [vmem:[#allocation5 + $0x2fc] sm:$0xf0]  ;;  %v6329_v38 = vor.u32 %v8033_v28, %v6328_v27  ;;  %v6193_v27 = vor.u32 %v7995_v14, %v6190_v15  ;;  %v7939_v28 = vld [vmem:[#allocation5 + $0x514] sm:$0xf]  ;;  %v6554_v14 = vld [vmem:[#allocation5 + $0x9c4] sm:$0xf0] }
  0xad   :  { %2615 = vmatpush.bf16.msra.mxu2 %v6049_v22  ;;  %v6552_v22 = vld [vmem:[#allocation5 + $0x9a8] sm:$0xf] }
  0xae   :  { %2590 = vmatpush.bf16.msrb.mxu3 %v5573_v26  ;;  %v5689_v26 = vor.u32 %v7869_v20, %v5686_v21  ;;  %v6553_v30 = vor.u32 %v8089_v23, %v6552_v22  ;;  %v6216_v20 = vld [vmem:[#allocation5 + $0x708] sm:$0xf]  ;;  %v8005_v21 = vld [vmem:[#allocation5 + $0x720] sm:$0xf0]  ;;  %v7778_v22 = vld [vmem:[#allocation5 + $0xc] sm:$0xf] }
  0xaf   :  { %2604 = vmatpush.bf16.msrb.mxu0 %v5769_v43  ;;  %v7799_v43 = vld [vmem:[#allocation5 + $0xb4] sm:$0xf] }
  0xb0   :  { %2577 = vmatpush.bf16.msra.mxu1 %v5349_v39  ;;  %v5437_v39 = vor.u32 %v7806_v29, %v5434_v31  ;;  %v5409_v52 = vor.u32 %v7799_v43, %v5406_v46  ;;  %v5966_v29 = vld [vmem:[#allocation5 + $0x52c] sm:$0xf0]  ;;  %v6217_v31 = vor.u32 %v8005_v21, %v6216_v20  ;;  %v5938_v46 = vld [vmem:[#allocation5 + $0x4f4] sm:$0xf0] }
  0xb1   :  { %2616 = vmatpush.bf16.msra.mxu2 %v6021_v40  ;;  %v5661_v40 = vor.u32 %v7862_v32, %v5658_v34  ;;  %v6414_v32 = vld [vmem:[#allocation5 + $0x8ac] sm:$0xf0]  ;;  %v8107_v34 = vld [vmem:[#allocation5 + $0xa54] sm:$0xf] }
  0xb2   :  { %2591 = vmatpush.bf16.msrb.mxu3 %v5545_v42  ;;  %2605 = vmatmul.bf16.vlgmr.msrb.gmra.mxu0 %v8857_v53  ;;  %v8026_v42 = vld [vmem:[#allocation5 + $0x7c8] sm:$0xf0]  ;;  %v6641_v43 = vor.u32 %v8107_v34, %v6638_v35  ;;  %v6050_v34 = vld [vmem:[#allocation5 + $0x5d4] sm:$0xf0] }
  0xb3   :  { %2656 = vmatpush.bf16.msra.mxu0 %v6665_v49  ;;  %v6496_v49 = vld [vmem:[#allocation5 + $0x938] sm:$0xf]  ;;  %v6301_v51 = vor.u32 %v8026_v42, %v6300_v41  ;;  %v5969_v41 = vor.u32 %v7939_v28, %v5966_v29  ;;  %v6302_v28 = vld [vmem:[#allocation5 + $0x7cc] sm:$0xf0]  ;;  %v8079_v29 = vld [vmem:[#allocation5 + $0x974] sm:$0xf] }
  0xb4   :  { %2578 = vmatpush.bf16.msra.mxu1 %v5321_v57  ;;  %v7792_v57 = vld [vmem:[#allocation5 + $0x7c] sm:$0xf] }
  0xb5   :  { %2617 = vmatpush.bf16.msra.mxu2 %v5993_v58  ;;  %2592 = vmatmul.bf16.vlgmr.msrb.gmra.mxu3 %v8863_v18  ;;  %v6497_v58 = vor.u32 %v8075_v50, %v6496_v49  ;;  %v5381_v1 = vor.u32 %v7792_v57, %v5378_v59  ;;  %v6386_v49 = vld [vmem:[#allocation5 + $0x874] sm:$0xf0]  ;;  %v8100_v50 = vld [vmem:[#allocation5 + $0xa1c] sm:$0xf]  ;;  %v5910_v59 = vld [vmem:[#allocation5 + $0x4bc] sm:$0xf0] }
  0xb6   :  { %2636 = vmatpush.bf16.msra.mxu3 %v6637_v48  ;;  %v5630_v48 = vld [vmem:[#allocation5 + $0x28c] sm:$0xf0] }
  0xb7   :  { %2675 = vmatpush.bf16.msrb.mxu0 %v5745_v63  ;;  %2579 = vmatmul.bf16.vlgmr.msra.gmra.mxu1 %v8860_v4  ;;  %v5633_v54 = vor.u32 %v7855_v47, %v5630_v48  ;;  %v8068_v63 = vld [vmem:[#allocation5 + $0x918] sm:$0xf0] }
  0xb8   :  { %2623 = vmatpush.bf16.msrb.mxu1 %v6413_v61  ;;  %2618 = vmatmul.bf16.vlgmr.msra.gmra.mxu2 %v8865_v19  ;;  %v5602_v61 = vld [vmem:[#allocation5 + $0x254] sm:$0xf0]  ;;  %v8044_v47 = vld [vmem:[#allocation5 + $0x85c] sm:$0xf] }
  0xb9   :  { %2662 = vmatpush.bf16.msrb.mxu2 %v5521_v62  ;;  %v6468_v62 = vld [vmem:[#allocation5 + $0x900] sm:$0xf]  ;;  %v5605_v2 = vor.u32 %v7848_v60, %v5602_v61  ;;  %v6389_v56 = vor.u32 %v8044_v47, %v6386_v49  ;;  %v8037_v60 = vld [vmem:[#allocation5 + $0x824] sm:$0xf]  ;;  %v8072_v47 = vld [vmem:[#allocation5 + $0x93c] sm:$0xf] }
  0xba   :  { %2637 = vmatpush.bf16.msra.mxu3 %v6609_v3  ;;  %v6244_v3 = vld [vmem:[#allocation5 + $0x740] sm:$0xf]  ;;  %v6469_v7 = vor.u32 %v8068_v63, %v6468_v62  ;;  %v8093_v63 = vld [vmem:[#allocation5 + $0x9e4] sm:$0xf] }
  0xbb   :  { %2676 = vmatpush.bf16.msrb.mxu0 %v5717_v12  ;;  %v8061_v12 = vld [vmem:[#allocation5 + $0x8e0] sm:$0xf0]  ;;  %v6245_v13 = vor.u32 %v8012_v5, %v6244_v3  ;;  %v6358_v62 = vld [vmem:[#allocation5 + $0x83c] sm:$0xf0]  ;;  %v8897_v3 = vld [vmem:[#allocation7] sm:$0xff] }
  0xbc   :  { %2624 = vmatpush.bf16.msrb.mxu1 %v6385_v10  ;;  %v5574_v10 = vld [vmem:[#allocation5 + $0x21c] sm:$0xf0]  ;;  %v607_v15 = vperm.slane %v8897_v3, 0 }
  0xbd   :  { %2663 = vmatpush.bf16.msrb.mxu2 %v5493_v11  ;;  %v6440_v11 = vld [vmem:[#allocation5 + $0x8c8] sm:$0xf]  ;;  %v5577_v17 = vor.u32 %v7841_v9, %v5574_v10  ;;  %v8030_v10 = vld [vmem:[#allocation5 + $0x7ec] sm:$0xf] }
  0xbe   :  { %2638 = vmatpush.bf16.msra.mxu3 %v6581_v16  ;;  %v5353_v16 = vor.u32 %v7785_v6, %v5350_v8  ;;  %v6441_v23 = vor.u32 %v8061_v12, %v6440_v11  ;;  %v7918_v6 = vld [vmem:[#allocation5 + $0x46c] sm:$0xf]  ;;  %v5882_v9 = vld [vmem:[#allocation5 + $0x484] sm:$0xf0] }
  0xbf   :  { %2677 = vmatpush.bf16.msrb.mxu0 %v5689_v26  ;;  %v5546_v26 = vld [vmem:[#allocation5 + $0x1e4] sm:$0xf0]  ;;  %v5885_v20 = vor.u32 %v7918_v6, %v5882_v9 }
  0xc0   :  { %2625 = vmatpush.bf16.msrb.mxu1 %v6357_v24  ;;  %v5322_v24 = vld [vmem:[#allocation5 + $0x24] sm:$0xf0] }
  0xc1   :  { %2664 = vmatpush.bf16.msrb.mxu2 %v5465_v25  ;;  %v7834_v25 = vld [vmem:[#allocation5 + $0x1cc] sm:$0xf]  ;;  %v5325_v36 = vor.u32 %v7778_v22, %v5322_v24  ;;  %v6330_v11 = vld [vmem:[#allocation5 + $0x804] sm:$0xf0]  ;;  %v5854_v24 = vld [vmem:[#allocation5 + $0x44c] sm:$0xf0] }
  0xc2   :  { %2639 = vmatpush.bf16.msra.mxu3 %v6553_v30  ;;  %6684 = vmatmul.msk.bf16.vlgmr.msra.gmra.mxu0 %vm2385_vm0, %v8869_v45  ;;  %v8051_v30 = vld [vmem:[#allocation5 + $0x894] sm:$0xf]  ;;  %v6333_v21 = vor.u32 %v8030_v10, %v6330_v11 }
  0xc3   :  { %2678 = vmatpush.bf16.msrb.mxu0 %v5661_v40  ;;  %v5549_v40 = vor.u32 %v7834_v25, %v5546_v26  ;;  %v6417_v42 = vor.u32 %v8051_v30, %v6414_v32  ;;  %v8023_v25 = vld [vmem:[#allocation5 + $0x7b4] sm:$0xf]  ;;  %v6526_v30 = vld [vmem:[#allocation5 + $0x98c] sm:$0xf0]  ;;  %v7960_v32 = vld [vmem:[#allocation5 + $0x5bc] sm:$0xf] }
  0xc4   :  { %2626 = vmatpush.bf16.msrb.mxu1 %v6329_v38  ;;  %v7988_v38 = vld [vmem:[#allocation5 + $0x69c] sm:$0xf] }
  0xc5   :  { %2665 = vmatpush.bf16.msrb.mxu2 %v5437_v39  ;;  %v6162_v39 = vld [vmem:[#allocation5 + $0x6b4] sm:$0xf0] }
  0xc6   :  { %2640 = vmatpush.bf16.msra.mxu3 %v6525_v44  ;;  %v7932_v44 = vld [vmem:[#allocation5 + $0x4dc] sm:$0xf]  ;;  %v6165_v48 = vor.u32 %v7988_v38, %v6162_v39  ;;  %v6305_v38 = vor.u32 %v8023_v25, %v6302_v28  ;;  %v6529_v39 = vor.u32 %v8079_v29, %v6526_v30  ;;  %v7943_v25 = vld [vmem:[#allocation5 + $0x530] sm:$0xf0]  ;;  %v5496_v29 = vld [vmem:[#allocation5 + $0x160] sm:$0xf] }
  0xc7   :  { %2679 = vmatpush.bf16.msrb.mxu0 %v5633_v54  ;;  %v6134_v54 = vld [vmem:[#allocation5 + $0x67c] sm:$0xf0]  ;;  %v5941_v55 = vor.u32 %v7932_v44, %v5938_v46  ;;  %v6053_v44 = vor.u32 %v7960_v32, %v6050_v34  ;;  %v6274_v46 = vld [vmem:[#allocation5 + $0x794] sm:$0xf0]  ;;  %v7999_v28 = vld [vmem:[#allocation5 + $0x6f0] sm:$0xf0] }
  0xc8   :  { %2627 = vmatpush.bf16.msrb.mxu1 %v6301_v51  ;;  %v6610_v51 = vld [vmem:[#allocation5 + $0xa34] sm:$0xf0]  ;;  %v7824_v30 = vld [vmem:[#allocation5 + $0x178] sm:$0xf0]  ;;  %v8114_v34 = vld [vmem:[#allocation5 + $0xa8c] sm:$0xf] }
  0xc9   :  { %2666 = vmatpush.bf16.msrb.mxu2 %v5409_v52  ;;  %v7981_v52 = vld [vmem:[#allocation5 + $0x664] sm:$0xf]  ;;  %v6613_v57 = vor.u32 %v8100_v50, %v6610_v51  ;;  %v6022_v51 = vld [vmem:[#allocation5 + $0x59c] sm:$0xf0] }
  0xca   :  { %2641 = vmatpush.bf16.msra.mxu3 %v6497_v58  ;;  %v7925_v58 = vld [vmem:[#allocation5 + $0x4a4] sm:$0xf]  ;;  %v6137_v61 = vor.u32 %v7981_v52, %v6134_v54 }
  0xcb   :  { %2680 = vmatpush.bf16.msrb.mxu0 %v5605_v2  ;;  %v6106_v2 = vld [vmem:[#allocation5 + $0x644] sm:$0xf0]  ;;  %v5913_v5 = vor.u32 %v7925_v58, %v5910_v59  ;;  %v7953_v50 = vld [vmem:[#allocation5 + $0x584] sm:$0xf]  ;;  %v5798_v58 = vld [vmem:[#allocation5 + $0x3dc] sm:$0xf0] }
  0xcc   :  { %2628 = vmatpush.bf16.msrb.mxu1 %v6273_v0  ;;  %v6582_v0 = vld [vmem:[#allocation5 + $0x9fc] sm:$0xf0]  ;;  %v8009_v59 = vld [vmem:[#allocation5 + $0x744] sm:$0xf] }
  0xcd   :  { %2667 = vmatpush.bf16.msrb.mxu2 %v5381_v1  ;;  %v7974_v1 = vld [vmem:[#allocation5 + $0x62c] sm:$0xf]  ;;  %v6585_v8 = vor.u32 %v8093_v63, %v6582_v0  ;;  %v8065_v63 = vld [vmem:[#allocation5 + $0x904] sm:$0xf]  ;;  %v6470_v0 = vld [vmem:[#allocation5 + $0x91c] sm:$0xf0] }
  0xce   :  { %2642 = vmatpush.bf16.msra.mxu3 %v6469_v7  ;;  %v6361_v7 = vor.u32 %v8037_v60, %v6358_v62  ;;  %v6109_v12 = vor.u32 %v7974_v1, %v6106_v2  ;;  %v6246_v62 = vld [vmem:[#allocation5 + $0x75c] sm:$0xf0]  ;;  %v7946_v1 = vld [vmem:[#allocation5 + $0x54c] sm:$0xf]  ;;  %v5994_v2 = vld [vmem:[#allocation5 + $0x564] sm:$0xf0] }
  0xcf   :  { %2681 = vmatpush.bf16.msrb.mxu0 %v5577_v17  ;;  %v6078_v17 = vld [vmem:[#allocation5 + $0x60c] sm:$0xf0]  ;;  %v2398_v26 = vpop.f32.mrf.mxu0  ;;  %v6249_v11 = vor.u32 %v8009_v59, %v6246_v62  ;;  %v5916_v59 = vld [vmem:[#allocation5 + $0x4a8] sm:$0xf]  ;;  %v7985_v62 = vld [vmem:[#allocation5 + $0x680] sm:$0xf0] }
  0xd0   :  { %2629 = vmatpush.bf16.msrb.mxu1 %v6245_v13  ;;  %v8086_v13 = vld [vmem:[#allocation5 + $0x9ac] sm:$0xf] }
  0xd1   :  { %2668 = vmatpush.bf16.msrb.mxu2 %v5353_v16  ;;  %v7967_v16 = vld [vmem:[#allocation5 + $0x5f4] sm:$0xf]  ;;  %v6557_v22 = vor.u32 %v8086_v13, %v6554_v14  ;;  %v7890_v13 = vld [vmem:[#allocation5 + $0x38c] sm:$0xf]  ;;  %v5770_v14 = vld [vmem:[#allocation5 + $0x3a4] sm:$0xf0] }
  0xd2   :  { %2643 = vmatpush.bf16.msra.mxu3 %v6441_v23  ;;  %v7911_v23 = vld [vmem:[#allocation5 + $0x434] sm:$0xf] }
  0xd3   :  { %2682 = vmatpush.bf16.msrb.mxu0 %v5549_v40  ;;  %v5857_v35 = vor.u32 %v7911_v23, %v5854_v24  ;;  %v7904_v40 = vld [vmem:[#allocation5 + $0x3fc] sm:$0xf]  ;;  %v5972_v24 = vld [vmem:[#allocation5 + $0x518] sm:$0xf] }
  0xd4   :  { %2630 = vmatpush.bf16.msrb.mxu1 %v6217_v31  ;;  %v2399_v31 = vadd.f32 %v2398_v26, %v607_v15  ;;  %v8002_v15 = vld [vmem:[#allocation5 + $0x70c] sm:$0xf]  ;;  %v6196_v26 = vld [vmem:[#allocation5 + $0x6d8] sm:$0xf] }
  0xd5   :  { %2644 = vmatmul.bf16.vlgmr.msra.gmra.mxu3 %v8875_v37  ;;  %2669 = vmatpush.bf16.msrb.mxu2 %v5325_v36 }
  0xd6   :  { %2701 = vmatpush.bf16.msrb.mxu3 %v6193_v27  ;;  %2683 = vmatmul.bf16.vlgmr.msrb.gmra.mxu0 %v8863_v18  ;;  %v6081_v27 = vor.u32 %v7967_v16, %v6078_v17  ;;  %v5997_v17 = vor.u32 %v7946_v1, %v5994_v2 }
  0xd7   :  { %2727 = vmatpush.bf16.msra.mxu0 %v6641_v43  ;;  %2631 = vmatmul.bf16.vlgmr.msrb.gmra.mxu1 %v8873_v33  ;;  %v2424_v36 = vpop.f32.mrf.mxu2  ;;  %v2411_v43 = vpop.f32.mrf.mxu1 }
  0xd8   :  { %2688 = vmatpush.bf16.msra.mxu1 %v5969_v41  ;;  %2670 = vmatmul.bf16.vlgmr.msrb.gmra.mxu2 %v8860_v4  ;;  %v5826_v41 = vld [vmem:[#allocation5 + $0x414] sm:$0xf0]  ;;  %v2412_v49 = vadd.f32 %v2411_v43, %v2399_v31  ;;  %v2400_v60 = vpop.f32.mrf.mxu0  ;;  %v7936_v43 = vld [vmem:[#allocation5 + $0x4f8] sm:$0xf0] }
  0xd9   :  { %2714 = vmatpush.bf16.msra.mxu2 %v6417_v42  ;;  %v8016_v42 = vld [vmem:[#allocation5 + $0x77c] sm:$0xf]  ;;  %v5829_v52 = vor.u32 %v7904_v40, %v5826_v41  ;;  %v6197_v40 = vor.u32 %v7999_v28, %v6196_v26  ;;  %v5497_v41 = vor.u32 %v7824_v30, %v5496_v29  ;;  %v7929_v60 = vld [vmem:[#allocation5 + $0x4c0] sm:$0xf0]  ;;  %v7866_v26 = vld [vmem:[#allocation5 + $0x2c8] sm:$0xf0] }
  0xda   :  { %2702 = vmatpush.bf16.msrb.mxu3 %v6165_v48  ;;  %v6498_v48 = vld [vmem:[#allocation5 + $0x954] sm:$0xf0]  ;;  %v2425_v54 = vadd.f32 %v2424_v36, %v2412_v49  ;;  %v6666_v36 = vld [vmem:[#allocation5 + $0xaa4] sm:$0xf0]  ;;  %v7817_v49 = vld [vmem:[#allocation5 + $0x140] sm:$0xf0]  ;;  %v5917_v2 = vor.u32 %v7929_v60, %v5916_v59 }
  0xdb   :  { %2728 = vmatpush.bf16.msra.mxu0 %v6613_v57  ;;  %v7897_v57 = vld [vmem:[#allocation5 + $0x3c4] sm:$0xf]  ;;  %v7915_v30 = vld [vmem:[#allocation5 + $0x450] sm:$0xf0]  ;;  %v5608_v60 = vld [vmem:[#allocation5 + $0x240] sm:$0xf] }
  0xdc   :  { %2689 = vmatpush.bf16.msra.mxu1 %v5941_v55  ;;  %v6277_v55 = vor.u32 %v8016_v42, %v6274_v46  ;;  %v5801_v6 = vor.u32 %v7897_v57, %v5798_v58  ;;  %v5944_v42 = vld [vmem:[#allocation5 + $0x4e0] sm:$0xf] }
  0xdd   :  { %2715 = vmatpush.bf16.msra.mxu2 %v6389_v56  ;;  %v6501_v56 = vor.u32 %v8072_v47, %v6498_v48  ;;  %v7992_v47 = vld [vmem:[#allocation5 + $0x6b8] sm:$0xf0]  ;;  %v5468_v48 = vld [vmem:[#allocation5 + $0x128] sm:$0xf] }
  0xde   :  { %2703 = vmatpush.bf16.msrb.mxu3 %v6137_v61  ;;  %v6025_v61 = vor.u32 %v7953_v50, %v6022_v51  ;;  %v6669_v51 = vor.u32 %v8114_v34, %v6666_v36  ;;  %v5469_v58 = vor.u32 %v7817_v49, %v5468_v48  ;;  %v7971_v34 = vld [vmem:[#allocation5 + $0x610] sm:$0xf0]  ;;  %v7796_v36 = vld [vmem:[#allocation5 + $0x98] sm:$0xf0]  ;;  %v6056_v49 = vld [vmem:[#allocation5 + $0x5c0] sm:$0xf] }
  0xdf   :  { %2729 = vmatpush.bf16.msra.mxu0 %v6585_v8  ;;  %v7831_v8 = vld [vmem:[#allocation5 + $0x1b0] sm:$0xf0]  ;;  %v2426_v10 = vpop.f32.mrf.mxu2  ;;  %v2413_v16 = vpop.f32.mrf.mxu1  ;;  %v7908_v48 = vld [vmem:[#allocation5 + $0x418] sm:$0xf0] }
  0xe0   :  { %2690 = vmatpush.bf16.msra.mxu1 %v5913_v5  ;;  %v2437_v5 = vpop.f32.mrf.mxu3  ;;  %v7978_v16 = vld [vmem:[#allocation5 + $0x648] sm:$0xf0] }
  0xe1   :  { %2716 = vmatpush.bf16.msra.mxu2 %v6361_v7  ;;  %v5524_v7 = vld [vmem:[#allocation5 + $0x198] sm:$0xf]  ;;  %v8900_v9 = vadd.f32 %v2437_v5, %v2425_v54  ;;  %v5945_v54 = vor.u32 %v7936_v43, %v5944_v42  ;;  %v5692_v5 = vld [vmem:[#allocation5 + $0x2e8] sm:$0xf] }
  0xe2   :  { %2704 = vmatpush.bf16.msrb.mxu3 %v6109_v12  ;;  %v6473_v12 = vor.u32 %v8065_v63, %v6470_v0  ;;  %v5525_v23 = vor.u32 %v7831_v8, %v5524_v7  ;;  %v5440_v63 = vld [vmem:[#allocation5 + $0xf0] sm:$0xf]  ;;  %v7810_v0 = vld [vmem:[#allocation5 + $0x108] sm:$0xf0] }
  0xe3   :  { %2730 = vmatpush.bf16.msra.mxu0 %v6557_v22  ;;  %v6442_v22 = vld [vmem:[#allocation5 + $0x8e4] sm:$0xf0]  ;;  %v5441_v10 = vor.u32 %v7810_v0, %v5440_v63 }
  0xe4   :  { %2691 = vmatpush.bf16.msra.mxu1 %v5885_v20  ;;  %v6218_v20 = vld [vmem:[#allocation5 + $0x724] sm:$0xf0] }
  0xe5   :  { %2717 = vmatpush.bf16.msra.mxu2 %v6333_v21  ;;  %v8058_v21 = vld [vmem:[#allocation5 + $0x8cc] sm:$0xf]  ;;  %v6221_v31 = vor.u32 %v8002_v15, %v6218_v20  ;;  %v7803_v20 = vld [vmem:[#allocation5 + $0xd0] sm:$0xf0]  ;;  %v5804_v0 = vld [vmem:[#allocation5 + $0x3c8] sm:$0xf] }
  0xe6   :  { %2705 = vmatpush.bf16.msrb.mxu3 %v6081_v27  ;;  %v5773_v27 = vor.u32 %v7890_v13, %v5770_v14  ;;  %v6445_v32 = vor.u32 %v8058_v21, %v6442_v22  ;;  %v7922_v13 = vld [vmem:[#allocation5 + $0x488] sm:$0xf0]  ;;  %v6112_v14 = vld [vmem:[#allocation5 + $0x630] sm:$0xf] }
  0xe7   :  { %2731 = vmatpush.bf16.msra.mxu0 %v6529_v39  ;;  %v7887_v39 = vld [vmem:[#allocation5 + $0x370] sm:$0xf0]  ;;  %v2476_v50 = vpop.f32.mrf.mxu2  ;;  %v6113_v28 = vor.u32 %v7978_v16, %v6112_v14  ;;  %v7845_v14 = vld [vmem:[#allocation5 + $0x220] sm:$0xf0] }
  0xe8   :  { %2692 = vmatpush.bf16.msra.mxu1 %v5857_v35  ;;  %v5973_v35 = vor.u32 %v7943_v25, %v5972_v24  ;;  %v2439_v46 = vpop.f32.mrf.mxu3  ;;  %v5664_v25 = vld [vmem:[#allocation5 + $0x2b0] sm:$0xf] }
  0xe9   :  { %2718 = vmatpush.bf16.msra.mxu2 %v6305_v38  ;;  %v5748_v38 = vld [vmem:[#allocation5 + $0x358] sm:$0xf] }
  0xea   :  { %2706 = vmatpush.bf16.msrb.mxu3 %v6053_v44  ;;  %v6168_v44 = vld [vmem:[#allocation5 + $0x6a0] sm:$0xf] }
  0xeb   :  { %2732 = vmatpush.bf16.msra.mxu0 %v6501_v56  ;;  %v7880_v56 = vld [vmem:[#allocation5 + $0x338] sm:$0xf0]  ;;  %v6169_v57 = vor.u32 %v7992_v47, %v6168_v44  ;;  %v5832_v47 = vld [vmem:[#allocation5 + $0x400] sm:$0xf] }
  0xec   :  { %2693 = vmatpush.bf16.msra.mxu1 %v5829_v52  ;;  %v5749_v52 = vor.u32 %v7887_v39, %v5748_v38  ;;  %v5665_v38 = vor.u32 %v7866_v26, %v5664_v25  ;;  %v5833_v59 = vor.u32 %v7908_v48, %v5832_v47  ;;  %v7828_v25 = vld [vmem:[#allocation5 + $0x19c] sm:$0xf]  ;;  %v6672_v26 = vld [vmem:[#allocation5 + $0xa90] sm:$0xf]  ;;  %v7821_v47 = vld [vmem:[#allocation5 + $0x164] sm:$0xf] }
  0xed   :  { %2719 = vmatpush.bf16.msra.mxu2 %v6277_v55  ;;  %v5720_v55 = vld [vmem:[#allocation5 + $0x320] sm:$0xf] }
  0xee   :  { %2707 = vmatpush.bf16.msrb.mxu3 %v6025_v61  ;;  %v6140_v61 = vld [vmem:[#allocation5 + $0x668] sm:$0xf]  ;;  %v5721_v1 = vor.u32 %v7880_v56, %v5720_v55  ;;  %v7789_v55 = vld [vmem:[#allocation5 + $0x60] sm:$0xf0]  ;;  %v5498_v48 = vld [vmem:[#allocation5 + $0x17c] sm:$0xf0] }
  0xef   :  { %2733 = vmatpush.bf16.msra.mxu0 %v6473_v12  ;;  %v2450_v7 = vpop.f32.mrf.mxu0  ;;  %v6141_v8 = vor.u32 %v7985_v62, %v6140_v61  ;;  %v5888_v12 = vld [vmem:[#allocation5 + $0x470] sm:$0xf]  ;;  %v2478_v21 = vpop.f32.mrf.mxu2  ;;  %v7852_v61 = vld [vmem:[#allocation5 + $0x258] sm:$0xf0] }
  0xf0   :  { %2694 = vmatpush.bf16.msra.mxu1 %v5801_v6  ;;  %v7873_v6 = vld [vmem:[#allocation5 + $0x300] sm:$0xf0]  ;;  %v2463_v15 = vpop.f32.mrf.mxu1  ;;  %v5889_v24 = vor.u32 %v7922_v13, %v5888_v12  ;;  %v5580_v13 = vld [vmem:[#allocation5 + $0x208] sm:$0xf]  ;;  %v7894_v21 = vld [vmem:[#allocation5 + $0x3a8] sm:$0xf0] }
  0xf1   :  { %2720 = vmatpush.bf16.msra.mxu2 %v6249_v11  ;;  %v2451_v11 = vadd.f32 %v2450_v7, %v8900_v9  ;;  %v7782_v7 = vld [vmem:[#allocation5 + $0x28] sm:$0xf0] }
  0xf2   :  { %2708 = vmatpush.bf16.msrb.mxu3 %v5997_v17  ;;  %v5412_v17 = vld [vmem:[#allocation5 + $0xb8] sm:$0xf] }
  0xf3   :  { %2734 = vmatpush.bf16.msra.mxu0 %v6445_v32  ;;  %v2464_v22 = vadd.f32 %v2463_v15, %v2451_v11  ;;  %v5413_v9 = vor.u32 %v7803_v20, %v5412_v17  ;;  %v608_v32 = vperm.slane %v8897_v3, 1  ;;  %v5609_v11 = vor.u32 %v7852_v61, %v5608_v60  ;;  %v5776_v15 = vld [vmem:[#allocation5 + $0x390] sm:$0xf]  ;;  %v6616_v60 = vld [vmem:[#allocation5 + $0xa20] sm:$0xf] }
  0xf4   :  { %2695 = vmatpush.bf16.msra.mxu1 %v5773_v27  ;;  %v5860_v27 = vld [vmem:[#allocation5 + $0x438] sm:$0xf]  ;;  %v8104_v61 = vld [vmem:[#allocation5 + $0xa38] sm:$0xf0] }
  0xf5   :  { %2721 = vmatpush.bf16.msra.mxu2 %v6221_v31  ;;  %2709 = vmatmul.bf16.vlgmr.msrb.gmra.mxu3 %v8865_v19  ;;  %v8907_v29 = vadd.f32 %v2476_v50, %v2464_v22  ;;  %v6084_v31 = vld [vmem:[#allocation5 + $0x5f8] sm:$0xf]  ;;  %v5861_v39 = vor.u32 %v7915_v30, %v5860_v27  ;;  %v6000_v22 = vld [vmem:[#allocation5 + $0x550] sm:$0xf]  ;;  %v8118_v27 = vld [vmem:[#allocation5 + $0xaa8] sm:$0xf0] }
  0xf6   :  { %2753 = vmatpush.bf16.msra.mxu3 %v5525_v23  ;;  %2735 = vmatmul.bf16.vlgmr.msra.gmra.mxu0 %v8875_v37  ;;  %v5693_v23 = vor.u32 %v7873_v6, %v5692_v5  ;;  %v6085_v44 = vor.u32 %v7971_v34, %v6084_v31  ;;  %v7957_v5 = vld [vmem:[#allocation5 + $0x5a0] sm:$0xf0]  ;;  %v5328_v6 = vld [vmem:[#allocation5 + $0x10] sm:$0xf]  ;;  %v6392_v30 = vld [vmem:[#allocation5 + $0x860] sm:$0xf]  ;;  %v5777_v34 = vor.u32 %v7894_v21, %v5776_v15 }
  0xf7   :  { %2792 = vmatpush.bf16.msrb.mxu0 %v6197_v40  ;;  %2696 = vmatmul.bf16.vlgmr.msra.gmra.mxu1 %v8857_v53  ;;  %v5636_v40 = vld [vmem:[#allocation5 + $0x278] sm:$0xf]  ;;  %v2452_v43 = vpop.f32.mrf.mxu0  ;;  %v5329_v20 = vor.u32 %v7782_v7, %v5328_v6  ;;  %v8048_v31 = vld [vmem:[#allocation5 + $0x878] sm:$0xf0]  ;;  %v7870_v6 = vld [vmem:[#allocation5 + $0x2ec] sm:$0xf] }
  0xf8   :  { %2722 = vmatmul.bf16.vlgmr.msra.gmra.mxu2 %v8873_v33  ;;  %2747 = vmatpush.bf16.msrb.mxu1 %v6669_v51  ;;  %v2489_v42 = vpop.f32.mrf.mxu3  ;;  %v2465_v50 = vpop.f32.mrf.mxu1  ;;  %v6393_v43 = vor.u32 %v8048_v31, %v6392_v30  ;;  %v5694_v7 = vld [vmem:[#allocation5 + $0x304] sm:$0xf0]  ;;  %v7807_v15 = vld [vmem:[#allocation5 + $0xf4] sm:$0xf]  ;;  %v8090_v30 = vld [vmem:[#allocation5 + $0x9c8] sm:$0xf0] }
  0xf9   :  { %2779 = vmatpush.bf16.msrb.mxu2 %v5973_v35  ;;  %v5384_v35 = vld [vmem:[#allocation5 + $0x80] sm:$0xf]  ;;  %v2490_v51 = vadd.f32 %v2489_v42, %v608_v32  ;;  %v5581_v32 = vor.u32 %v7845_v14, %v5580_v13  ;;  %v8041_v50 = vld [vmem:[#allocation5 + $0x840] sm:$0xf0]  ;;  %v6588_v13 = vld [vmem:[#allocation5 + $0x9e8] sm:$0xf] }
  0xfa   :  { %2754 = vmatpush.bf16.msra.mxu3 %v5497_v41  ;;  %v7859_v41 = vld [vmem:[#allocation5 + $0x290] sm:$0xf0]  ;;  %v5385_v46 = vor.u32 %v7796_v36, %v5384_v35  ;;  %v5552_v35 = vld [vmem:[#allocation5 + $0x1d0] sm:$0xf]  ;;  %v8097_v14 = vld [vmem:[#allocation5 + $0xa00] sm:$0xf0] }
  0xfb   :  { %2793 = vmatpush.bf16.msrb.mxu0 %v6169_v57  ;;  %v2502_v56 = vpop.f32.mrf.mxu2  ;;  %v8027_v21 = vld [vmem:[#allocation5 + $0x7d0] sm:$0xf0]  ;;  %v7800_v31 = vld [vmem:[#allocation5 + $0xbc] sm:$0xf] }
  0xfc   :  { %2766 = vmatpush.bf16.msra.mxu1 %v5749_v52  ;;  %v7964_v52 = vld [vmem:[#allocation5 + $0x5d8] sm:$0xf0]  ;;  %v8910_v57 = vadd.f32 %v2502_v56, %v2490_v51  ;;  %v5722_v56 = vld [vmem:[#allocation5 + $0x33c] sm:$0xf0] }
  0xfd   :  { %2780 = vmatpush.bf16.msrb.mxu2 %v5945_v54  ;;  %v5356_v54 = vld [vmem:[#allocation5 + $0x48] sm:$0xf]  ;;  %v6057_v62 = vor.u32 %v7964_v52, %v6056_v49 }
  0xfe   :  { %2755 = vmatpush.bf16.msra.mxu3 %v5469_v58  ;;  %v5637_v58 = vor.u32 %v7859_v41, %v5636_v40  ;;  %v5357_v63 = vor.u32 %v7789_v55, %v5356_v54  ;;  %v7884_v40 = vld [vmem:[#allocation5 + $0x35c] sm:$0xf]  ;;  %v5750_v41 = vld [vmem:[#allocation5 + $0x374] sm:$0xf0]  ;;  %v6364_v49 = vld [vmem:[#allocation5 + $0x828] sm:$0xf] }
  0xff   :  { %2794 = vmatpush.bf16.msrb.mxu0 %v6141_v8  ;;  %v6420_v8 = vld [vmem:[#allocation5 + $0x898] sm:$0xf]  ;;  %v5753_v52 = vor.u32 %v7884_v40, %v5750_v41  ;;  %v7877_v55 = vld [vmem:[#allocation5 + $0x324] sm:$0xf] }
 0x100   :  { %2767 = vmatpush.bf16.msra.mxu1 %v5721_v1  ;;  %v7901_v1 = vld [vmem:[#allocation5 + $0x3e0] sm:$0xf0]  ;;  %v2491_v16 = vpop.f32.mrf.mxu3  ;;  %v5638_v40 = vld [vmem:[#allocation5 + $0x294] sm:$0xf0] }
 0x101   :  { %2781 = vmatpush.bf16.msrb.mxu2 %v5917_v2  ;;  %v6028_v2 = vld [vmem:[#allocation5 + $0x588] sm:$0xf]  ;;  %v5805_v12 = vor.u32 %v7901_v1, %v5804_v0  ;;  %v6336_v0 = vld [vmem:[#allocation5 + $0x7f0] sm:$0xf]  ;;  %v8034_v1 = vld [vmem:[#allocation5 + $0x808] sm:$0xf0] }
 0x102   :  { %2756 = vmatpush.bf16.msra.mxu3 %v5441_v10  ;;  %v8055_v10 = vld [vmem:[#allocation5 + $0x8b0] sm:$0xf0]  ;;  %v6029_v17 = vor.u32 %v7957_v5, %v6028_v2  ;;  %v5725_v2 = vor.u32 %v7877_v55, %v5722_v56  ;;  %v6617_v5 = vor.u32 %v8104_v61, %v6616_v60  ;;  %v5610_v60 = vld [vmem:[#allocation5 + $0x25c] sm:$0xf0] }
 0x103   :  { %2795 = vmatpush.bf16.msrb.mxu0 %v6113_v28  ;;  %v2504_v28 = vpop.f32.mrf.mxu2 }
 0x104   :  { %2768 = vmatpush.bf16.msra.mxu1 %v5693_v23  ;;  %v7950_v23 = vld [vmem:[#allocation5 + $0x568] sm:$0xf0] }
 0x105   :  { %2782 = vmatpush.bf16.msrb.mxu2 %v5889_v24  ;;  %v6421_v24 = vor.u32 %v8055_v10, %v6420_v8  ;;  %v6001_v36 = vor.u32 %v7950_v23, %v6000_v22  ;;  %v5697_v22 = vor.u32 %v7870_v6, %v5694_v7  ;;  %v8006_v6 = vld [vmem:[#allocation5 + $0x728] sm:$0xf0] }
 0x106   :  { %2757 = vmatpush.bf16.msra.mxu3 %v5413_v9  ;;  %v5526_v9 = vld [vmem:[#allocation5 + $0x1b4] sm:$0xf0] }
 0x107   :  { %2796 = vmatpush.bf16.msrb.mxu0 %v6085_v44  ;;  %6685 = vmatmul.msk.bf16.vlgmr.msrb.gmra.mxu1 %vm2385_vm0, %v8869_v45  ;;  %v5529_v42 = vor.u32 %v7828_v25, %v5526_v9  ;;  %v6644_v44 = vld [vmem:[#allocation5 + $0xa58] sm:$0xf]  ;;  %v7863_v25 = vld [vmem:[#allocation5 + $0x2b4] sm:$0xf]  ;;  %v6560_v9 = vld [vmem:[#allocation5 + $0x9b0] sm:$0xf] }
 0x108   :  { %2769 = vmatpush.bf16.msra.mxu1 %v5665_v38  ;;  %v7838_v38 = vld [vmem:[#allocation5 + $0x1e8] sm:$0xf0] }
 0x109   :  { %2783 = vmatpush.bf16.msrb.mxu2 %v5861_v39  ;;  %v6673_v39 = vor.u32 %v8118_v27, %v6672_v26  ;;  %v5553_v51 = vor.u32 %v7838_v38, %v5552_v35  ;;  %v5666_v26 = vld [vmem:[#allocation5 + $0x2cc] sm:$0xf0]  ;;  %v6561_v38 = vor.u32 %v8090_v30, %v6560_v9  ;;  %v7933_v9 = vld [vmem:[#allocation5 + $0x4e4] sm:$0xf]  ;;  %v5946_v30 = vld [vmem:[#allocation5 + $0x4fc] sm:$0xf0] }
 0x10a   :  { %2758 = vmatpush.bf16.msra.mxu3 %v5385_v46  ;;  %v8111_v46 = vld [vmem:[#allocation5 + $0xa70] sm:$0xf0]  ;;  %v5669_v35 = vor.u32 %v7863_v25, %v5666_v26  ;;  %v5330_v25 = vld [vmem:[#allocation5 + $0x2c] sm:$0xf0]  ;;  %v8052_v26 = vld [vmem:[#allocation5 + $0x89c] sm:$0xf] }
 0x10b   :  { %2797 = vmatpush.bf16.msrb.mxu0 %v6057_v62  ;;  %v6645_v54 = vor.u32 %v8111_v46, %v6644_v44  ;;  %v7814_v62 = vld [vmem:[#allocation5 + $0x12c] sm:$0xf]  ;;  %v6532_v46 = vld [vmem:[#allocation5 + $0x978] sm:$0xf] }
 0x10c   :  { %2770 = vmatpush.bf16.msra.mxu1 %v5637_v58  ;;  %v5501_v58 = vor.u32 %v7821_v47, %v5498_v48  ;;  %v8083_v47 = vld [vmem:[#allocation5 + $0x990] sm:$0xf0]  ;;  %v7793_v48 = vld [vmem:[#allocation5 + $0x84] sm:$0xf] }
 0x10d   :  { %2784 = vmatpush.bf16.msrb.mxu2 %v5833_v59  ;;  %v6365_v59 = vor.u32 %v8041_v50, %v6364_v49  ;;  %v5386_v50 = vld [vmem:[#allocation5 + $0x9c] sm:$0xf0] }
 0x10e   :  { %2759 = vmatpush.bf16.msra.mxu3 %v5357_v63  ;;  %v5470_v63 = vld [vmem:[#allocation5 + $0x144] sm:$0xf0]  ;;  %v5389_v61 = vor.u32 %v7793_v48, %v5386_v50  ;;  %v6394_v48 = vld [vmem:[#allocation5 + $0x87c] sm:$0xf0] }
 0x10f   :  { %2798 = vmatpush.bf16.msrb.mxu0 %v6029_v17  ;;  %v2515_v8 = vpop.f32.mrf.mxu0  ;;  %v5442_v17 = vld [vmem:[#allocation5 + $0x10c] sm:$0xf0]  ;;  %v5918_v50 = vld [vmem:[#allocation5 + $0x4c4] sm:$0xf0] }
 0x110   :  { %2771 = vmatpush.bf16.msra.mxu1 %v5609_v11  ;;  %v2528_v10 = vpop.f32.mrf.mxu1  ;;  %v5473_v11 = vor.u32 %v7814_v62, %v5470_v63  ;;  %v2516_v16 = vadd.f32 %v2515_v8, %v8910_v57  ;;  %v5445_v27 = vor.u32 %v7807_v15, %v5442_v17  ;;  %v5414_v57 = vld [vmem:[#allocation5 + $0xd4] sm:$0xf0]  ;;  %v6504_v63 = vld [vmem:[#allocation5 + $0x940] sm:$0xf]  ;;  %v7940_v8 = vld [vmem:[#allocation5 + $0x51c] sm:$0xf] }
 0x111   :  { %2785 = vmatpush.bf16.msrb.mxu2 %v5805_v12  ;;  %v6337_v12 = vor.u32 %v8034_v1, %v6336_v0  ;;  %v8076_v0 = vld [vmem:[#allocation5 + $0x958] sm:$0xf0]  ;;  %v7786_v1 = vld [vmem:[#allocation5 + $0x4c] sm:$0xf] }
 0x112   :  { %2760 = vmatpush.bf16.msra.mxu3 %v5329_v20  ;;  %v6308_v20 = vld [vmem:[#allocation5 + $0x7b8] sm:$0xf]  ;;  %v2529_v23 = vadd.f32 %v2528_v10, %v2516_v16 }
 0x113   :  { %2799 = vmatpush.bf16.msrb.mxu0 %v6001_v36  ;;  %v6309_v28 = vor.u32 %v8027_v21, %v6308_v20  ;;  %v5974_v10 = vld [vmem:[#allocation5 + $0x534] sm:$0xf0]  ;;  %v6476_v20 = vld [vmem:[#allocation5 + $0x908] sm:$0xf]  ;;  %v8069_v21 = vld [vmem:[#allocation5 + $0x920] sm:$0xf0] }
 0x114   :  { %2772 = vmatpush.bf16.msra.mxu1 %v5581_v32  ;;  %v6280_v32 = vld [vmem:[#allocation5 + $0x780] sm:$0xf] }
 0x115   :  { %2786 = vmatpush.bf16.msrb.mxu2 %v5777_v34  ;;  %2761 = vmatmul.bf16.vlgmr.msra.gmra.mxu3 %v8860_v4  ;;  %v8020_v34 = vld [vmem:[#allocation5 + $0x798] sm:$0xf0] }
 0x116   :  { %2805 = vmatpush.bf16.msrb.mxu3 %v6421_v24  ;;  %2800 = vmatmul.bf16.vlgmr.msrb.gmra.mxu0 %v8865_v19  ;;  %v6589_v24 = vor.u32 %v8097_v14, %v6588_v13  ;;  %v6281_v44 = vor.u32 %v8020_v34, %v6280_v32  ;;  %v5582_v13 = vld [vmem:[#allocation5 + $0x224] sm:$0xf0]  ;;  %v6448_v32 = vld [vmem:[#allocation5 + $0x8d0] sm:$0xf]  ;;  %v7835_v34 = vld [vmem:[#allocation5 + $0x1d4] sm:$0xf] }
 0x117   :  { %2844 = vmatpush.bf16.msra.mxu0 %v5529_v42  ;;  %v2517_v49 = vpop.f32.mrf.mxu0 }
 0x118   :  { %2787 = vmatmul.bf16.vlgmr.msrb.gmra.mxu2 %v8857_v53  ;;  %2773 = vmatpush.bf16.msra.mxu1 %v5553_v51  ;;  %v2541_v36 = vpop.f32.mrf.mxu3  ;;  %v2530_v42 = vpop.f32.mrf.mxu1  ;;  %v6252_v51 = vld [vmem:[#allocation5 + $0x748] sm:$0xf]  ;;  %v7926_v49 = vld [vmem:[#allocation5 + $0x4ac] sm:$0xf] }
 0x119   :  { %2838 = vmatpush.bf16.msra.mxu2 %v6673_v39  ;;  %v7856_v39 = vld [vmem:[#allocation5 + $0x27c] sm:$0xf]  ;;  %v2542_v41 = vadd.f32 %v2541_v36, %v2529_v23  ;;  %v5977_v23 = vor.u32 %v7940_v8, %v5974_v10  ;;  %v5949_v42 = vor.u32 %v7933_v9, %v5946_v30  ;;  %v6590_v8 = vld [vmem:[#allocation5 + $0xa04] sm:$0xf0]  ;;  %v6114_v9 = vld [vmem:[#allocation5 + $0x64c] sm:$0xf0] }
 0x11a   :  { %2806 = vmatpush.bf16.msrb.mxu3 %v6393_v43  ;;  %v5417_v43 = vor.u32 %v7800_v31, %v5414_v57  ;;  %v5641_v55 = vor.u32 %v7856_v39, %v5638_v40  ;;  %v6477_v57 = vor.u32 %v8069_v21, %v6476_v20  ;;  %v8108_v39 = vld [vmem:[#allocation5 + $0xa5c] sm:$0xf]  ;;  %v6646_v40 = vld [vmem:[#allocation5 + $0xa74] sm:$0xf0] }
 0x11b   :  { %2845 = vmatpush.bf16.msra.mxu0 %v5501_v58  ;;  %2774 = vmatmul.bf16.vlgmr.msra.gmra.mxu1 %v8863_v18  ;;  %v6533_v58 = vor.u32 %v8083_v47, %v6532_v46  ;;  %v8045_v46 = vld [vmem:[#allocation5 + $0x864] sm:$0xf]  ;;  %v8024_v30 = vld [vmem:[#allocation5 + $0x7bc] sm:$0xf] }
 0x11c   :  { %2818 = vmatpush.bf16.msrb.mxu1 %v6645_v54  ;;  %v2554_v54 = vpop.f32.mrf.mxu2 }
 0x11d   :  { %2857 = vmatpush.bf16.msrb.mxu2 %v5753_v52  ;;  %v8013_v52 = vld [vmem:[#allocation5 + $0x760] sm:$0xf0]  ;;  %v2555_v56 = vadd.f32 %v2554_v54, %v2542_v41 }
 0x11e   :  { %2807 = vmatpush.bf16.msrb.mxu3 %v6365_v59  ;;  %v7849_v59 = vld [vmem:[#allocation5 + $0x244] sm:$0xf]  ;;  %v6253_v62 = vor.u32 %v8013_v52, %v6252_v51  ;;  %v6649_v52 = vor.u32 %v8108_v39, %v6646_v40  ;;  %v8080_v39 = vld [vmem:[#allocation5 + $0x97c] sm:$0xf]  ;;  %v6534_v40 = vld [vmem:[#allocation5 + $0x994] sm:$0xf0] }
 0x11f   :  { %2846 = vmatpush.bf16.msra.mxu0 %v5473_v11  ;;  %v5613_v7 = vor.u32 %v7849_v59, %v5610_v60  ;;  %v6505_v11 = vor.u32 %v8076_v0, %v6504_v63  ;;  %v6397_v59 = vor.u32 %v8045_v46, %v6394_v48  ;;  %v5921_v60 = vor.u32 %v7926_v49, %v5918_v50  ;;  %v8038_v63 = vld [vmem:[#allocation5 + $0x82c] sm:$0xf]  ;;  %v6366_v0 = vld [vmem:[#allocation5 + $0x844] sm:$0xf0]  ;;  %v8017_v46 = vld [vmem:[#allocation5 + $0x784] sm:$0xf] }
 0x120   :  { %2819 = vmatpush.bf16.msrb.mxu1 %v6617_v5  ;;  %v6224_v5 = vld [vmem:[#allocation5 + $0x710] sm:$0xf]  ;;  %v2543_v14 = vpop.f32.mrf.mxu3  ;;  %v2567_v15 = vpop.f32.mrf.mxu1  ;;  %v6369_v10 = vor.u32 %v8038_v63, %v6366_v0  ;;  %v6282_v48 = vld [vmem:[#allocation5 + $0x79c] sm:$0xf0]  ;;  %v5806_v49 = vld [vmem:[#allocation5 + $0x3e4] sm:$0xf0]  ;;  %v6537_v50 = vor.u32 %v8080_v39, %v6534_v40 }
 0x121   :  { %2858 = vmatpush.bf16.msrb.mxu2 %v5725_v2  ;;  %v5358_v2 = vld [vmem:[#allocation5 + $0x64] sm:$0xf0]  ;;  %v6225_v17 = vor.u32 %v8006_v6, %v6224_v5  ;;  %v8031_v14 = vld [vmem:[#allocation5 + $0x7f4] sm:$0xf]  ;;  %v8010_v63 = vld [vmem:[#allocation5 + $0x74c] sm:$0xf] }
 0x122   :  { %2808 = vmatpush.bf16.msrb.mxu3 %v6337_v12  ;;  %v7842_v12 = vld [vmem:[#allocation5 + $0x20c] sm:$0xf]  ;;  %v5361_v16 = vor.u32 %v7786_v1, %v5358_v2  ;;  %v7919_v1 = vld [vmem:[#allocation5 + $0x474] sm:$0xf]  ;;  %v5890_v2 = vld [vmem:[#allocation5 + $0x48c] sm:$0xf0] }
 0x123   :  { %2847 = vmatpush.bf16.msra.mxu0 %v5445_v27  ;;  %v5585_v27 = vor.u32 %v7842_v12, %v5582_v13  ;;  %v7982_v12 = vld [vmem:[#allocation5 + $0x66c] sm:$0xf]  ;;  %v6142_v13 = vld [vmem:[#allocation5 + $0x684] sm:$0xf0] }
 0x124   :  { %2820 = vmatpush.bf16.msrb.mxu1 %v6589_v24  ;;  %v7779_v24 = vld [vmem:[#allocation5 + $0x14] sm:$0xf]  ;;  %v2556_v31 = vpop.f32.mrf.mxu2 }
 0x125   :  { %2859 = vmatpush.bf16.msrb.mxu2 %v5697_v22  ;;  %v8921_v22 = vadd.f32 %v2567_v15, %v2555_v56  ;;  %v5333_v36 = vor.u32 %v7779_v24, %v5330_v25  ;;  %v6618_v56 = vld [vmem:[#allocation5 + $0xa3c] sm:$0xf0]  ;;  %v6338_v15 = vld [vmem:[#allocation5 + $0x80c] sm:$0xf0]  ;;  %v7975_v24 = vld [vmem:[#allocation5 + $0x634] sm:$0xf] }
 0x126   :  { %2809 = vmatpush.bf16.msrb.mxu3 %v6309_v28  ;;  %v6422_v28 = vld [vmem:[#allocation5 + $0x8b4] sm:$0xf0]  ;;  %v8087_v25 = vld [vmem:[#allocation5 + $0x9b4] sm:$0xf]  ;;  %v609_v31 = vperm.slane %v8897_v3, 2 }
 0x127   :  { %2848 = vmatpush.bf16.msra.mxu0 %v5417_v43  ;;  %v6425_v41 = vor.u32 %v8052_v26, %v6422_v28  ;;  %v7996_v43 = vld [vmem:[#allocation5 + $0x6dc] sm:$0xf]  ;;  %v6562_v26 = vld [vmem:[#allocation5 + $0x9cc] sm:$0xf0]  ;;  %v7898_v3 = vld [vmem:[#allocation5 + $0x3cc] sm:$0xf] }
 0x128   :  { %2821 = vmatpush.bf16.msrb.mxu1 %v6561_v38  ;;  %6686 = vmatmul.msk.bf16.vlgmr.msra.gmra.mxu2 %vm2385_vm0, %v8869_v45  ;;  %v8062_v38 = vld [vmem:[#allocation5 + $0x8e8] sm:$0xf0] }
 0x129   :  { %2860 = vmatpush.bf16.msrb.mxu2 %v5669_v35  ;;  %v5554_v35 = vld [vmem:[#allocation5 + $0x1ec] sm:$0xf0]  ;;  %v6449_v51 = vor.u32 %v8062_v38, %v6448_v32  ;;  %v6310_v32 = vld [vmem:[#allocation5 + $0x7d4] sm:$0xf0]  ;;  %v6117_v38 = vor.u32 %v7975_v24, %v6114_v9 }
 0x12a   :  { %2810 = vmatpush.bf16.msrb.mxu3 %v6281_v44  ;;  %v6198_v44 = vld [vmem:[#allocation5 + $0x6f4] sm:$0xf0]  ;;  %v5557_v47 = vor.u32 %v7835_v34, %v5554_v35  ;;  %v7905_v34 = vld [vmem:[#allocation5 + $0x404] sm:$0xf]  ;;  %v5834_v35 = vld [vmem:[#allocation5 + $0x41c] sm:$0xf0] }
 0x12b   :  { %2849 = vmatpush.bf16.msra.mxu0 %v5389_v61  ;;  %v6201_v54 = vor.u32 %v7996_v43, %v6198_v44  ;;  %v7989_v61 = vld [vmem:[#allocation5 + $0x6a4] sm:$0xf]  ;;  %v7968_v43 = vld [vmem:[#allocation5 + $0x5fc] sm:$0xf]  ;;  %v6086_v44 = vld [vmem:[#allocation5 + $0x614] sm:$0xf0] }
 0x12c   :  { %2822 = vmatpush.bf16.msrb.mxu1 %v6533_v58  ;;  %v2569_v58 = vpop.f32.mrf.mxu1 }
 0x12d   :  { %2861 = vmatpush.bf16.msrb.mxu2 %v5641_v55  ;;  %v8101_v55 = vld [vmem:[#allocation5 + $0xa24] sm:$0xf] }
 0x12e   :  { %2811 = vmatpush.bf16.msrb.mxu3 %v6253_v62  ;;  %v6170_v62 = vld [vmem:[#allocation5 + $0x6bc] sm:$0xf0]  ;;  %v6621_v5 = vor.u32 %v8101_v55, %v6618_v56 }
 0x12f   :  { %2850 = vmatpush.bf16.msra.mxu0 %v5361_v16  ;;  %v6173_v6 = vor.u32 %v7989_v61, %v6170_v62  ;;  %v7912_v16 = vld [vmem:[#allocation5 + $0x43c] sm:$0xf]  ;;  %v2606_v21 = vpop.f32.mrf.mxu0  ;;  %v6506_v55 = vld [vmem:[#allocation5 + $0x95c] sm:$0xf0]  ;;  %v7961_v61 = vld [vmem:[#allocation5 + $0x5c4] sm:$0xf] }
 0x130   :  { %2823 = vmatpush.bf16.msrb.mxu1 %v6505_v11  ;;  %v5893_v11 = vor.u32 %v7919_v1, %v5890_v2  ;;  %v6058_v62 = vld [vmem:[#allocation5 + $0x5dc] sm:$0xf0]  ;;  %v6254_v2 = vld [vmem:[#allocation5 + $0x764] sm:$0xf0] }
 0x131   :  { %2862 = vmatpush.bf16.msrb.mxu2 %v5613_v7  ;;  %v8094_v7 = vld [vmem:[#allocation5 + $0x9ec] sm:$0xf] }
 0x132   :  { %2812 = vmatpush.bf16.msrb.mxu3 %v6225_v17  ;;  %v5862_v17 = vld [vmem:[#allocation5 + $0x454] sm:$0xf0]  ;;  %v6593_v20 = vor.u32 %v8094_v7, %v6590_v8  ;;  %v8115_v8 = vld [vmem:[#allocation5 + $0xa94] sm:$0xf] }
 0x133   :  { %2851 = vmatpush.bf16.msra.mxu0 %v5333_v36  ;;  %v5865_v28 = vor.u32 %v7912_v16, %v5862_v17  ;;  %v6565_v36 = vor.u32 %v8087_v25, %v6562_v26  ;;  %v7954_v17 = vld [vmem:[#allocation5 + $0x58c] sm:$0xf]  ;;  %v6226_v25 = vld [vmem:[#allocation5 + $0x72c] sm:$0xf0] }
 0x134   :  { %2824 = vmatpush.bf16.msrb.mxu1 %v6477_v57  ;;  %v2580_v57 = vpop.f32.mrf.mxu1 }
 0x135   :  { %2863 = vmatpush.bf16.msrb.mxu2 %v5585_v27  ;;  %2813 = vmatmul.bf16.vlgmr.msrb.gmra.mxu3 %v8873_v33  ;;  %v6341_v27 = vor.u32 %v8031_v14, %v6338_v15  ;;  %v6478_v14 = vld [vmem:[#allocation5 + $0x924] sm:$0xf0]  ;;  %v6257_v15 = vor.u32 %v8010_v63, %v6254_v2  ;;  %v5700_v63 = vld [vmem:[#allocation5 + $0x2f0] sm:$0xf]  ;;  %v7930_v2 = vld [vmem:[#allocation5 + $0x4c8] sm:$0xf0] }
 0x136   :  { %2870 = vmatpush.bf16.msra.mxu3 %v5977_v23  ;;  %2852 = vmatmul.bf16.vlgmr.msra.gmra.mxu0 %v8860_v4  ;;  %v6145_v23 = vor.u32 %v7982_v12, %v6142_v13  ;;  %v6061_v12 = vor.u32 %v7961_v61, %v6058_v62  ;;  %v8066_v13 = vld [vmem:[#allocation5 + $0x90c] sm:$0xf]  ;;  %v7825_v62 = vld [vmem:[#allocation5 + $0x180] sm:$0xf0] }
 0x137   :  { %2896 = vmatpush.bf16.msrb.mxu0 %v6425_v41  ;;  %v6313_v41 = vor.u32 %v8024_v30, %v6310_v32  ;;  %v6481_v9 = vor.u32 %v8066_v13, %v6478_v14  ;;  %v7944_v30 = vld [vmem:[#allocation5 + $0x538] sm:$0xf0]  ;;  %v7818_v14 = vld [vmem:[#allocation5 + $0x148] sm:$0xf0] }
 0x138   :  { %2825 = vmatpush.bf16.msrb.mxu1 %v6449_v51  ;;  %v2608_v51 = vpop.f32.mrf.mxu0  ;;  %v2593_v56 = vpop.f32.mrf.mxu3 }
 0x139   :  { %2864 = vmatpush.bf16.msrb.mxu2 %v5557_v47  ;;  %v2581_v47 = vadd.f32 %v2580_v57, %v609_v31  ;;  %v7947_v31 = vld [vmem:[#allocation5 + $0x554] sm:$0xf]  ;;  %v7937_v51 = vld [vmem:[#allocation5 + $0x500] sm:$0xf0] }
 0x13a   :  { %2871 = vmatpush.bf16.msra.mxu3 %v5949_v42  ;;  %v5837_v42 = vor.u32 %v7905_v34, %v5834_v35  ;;  %v6002_v34 = vld [vmem:[#allocation5 + $0x56c] sm:$0xf0]  ;;  %v8059_v35 = vld [vmem:[#allocation5 + $0x8d4] sm:$0xf] }
 0x13b   :  { %2897 = vmatpush.bf16.msrb.mxu0 %v6397_v59  ;;  %2826 = vmatmul.bf16.vlgmr.msrb.gmra.mxu1 %v8875_v37  ;;  %v2619_v58 = vpop.f32.mrf.mxu2  ;;  %v6285_v59 = vor.u32 %v8017_v46, %v6282_v48  ;;  %v2594_v0 = vadd.f32 %v2593_v56, %v2581_v47  ;;  %v7832_v47 = vld [vmem:[#allocation5 + $0x1b8] sm:$0xf0]  ;;  %v5728_v48 = vld [vmem:[#allocation5 + $0x328] sm:$0xf] }
 0x13c   :  { %2883 = vmatpush.bf16.msra.mxu1 %v6201_v54  ;;  %2865 = vmatmul.bf16.vlgmr.msrb.gmra.mxu2 %v8863_v18  ;;  %v8073_v54 = vld [vmem:[#allocation5 + $0x944] sm:$0xf]  ;;  %v2582_v1 = vpop.f32.mrf.mxu1 }
 0x13d   :  { %2909 = vmatpush.bf16.msra.mxu2 %v6649_v52  ;;  %v6089_v52 = vor.u32 %v7968_v43, %v6086_v44  ;;  %v6509_v7 = vor.u32 %v8073_v54, %v6506_v55  ;;  %v6204_v43 = vld [vmem:[#allocation5 + $0x6e0] sm:$0xf]  ;;  %v8000_v44 = vld [vmem:[#allocation5 + $0x6f8] sm:$0xf0]  ;;  %v5924_v1 = vld [vmem:[#allocation5 + $0x4b0] sm:$0xf] }
 0x13e   :  { %2872 = vmatpush.bf16.msra.mxu3 %v5921_v60  ;;  %v5809_v60 = vor.u32 %v7898_v3, %v5806_v49  ;;  %v7881_v3 = vld [vmem:[#allocation5 + $0x340] sm:$0xf0]  ;;  %v6205_v54 = vor.u32 %v8000_v44, %v6204_v43  ;;  %v5925_v13 = vor.u32 %v7930_v2, %v5924_v1  ;;  %v5420_v43 = vld [vmem:[#allocation5 + $0xc0] sm:$0xf]  ;;  %v7846_v1 = vld [vmem:[#allocation5 + $0x228] sm:$0xf0] }
 0x13f   :  { %2898 = vmatpush.bf16.msrb.mxu0 %v6369_v10  ;;  %v6674_v10 = vld [vmem:[#allocation5 + $0xaac] sm:$0xf0]  ;;  %v5729_v56 = vor.u32 %v7881_v3, %v5728_v48  ;;  %v6092_v44 = vld [vmem:[#allocation5 + $0x600] sm:$0xf]  ;;  %v7804_v3 = vld [vmem:[#allocation5 + $0xd8] sm:$0xf0] }
 0x140   :  { %2884 = vmatpush.bf16.msra.mxu1 %v6173_v6  ;;  %v5778_v6 = vld [vmem:[#allocation5 + $0x3ac] sm:$0xf0]  ;;  %v6677_v26 = vor.u32 %v8115_v8, %v6674_v10  ;;  %v8930_v57 = vpop.f32.mrf.mxu0 }
 0x141   :  { %2910 = vmatpush.bf16.msra.mxu2 %v6621_v5  ;;  %v7891_v5 = vld [vmem:[#allocation5 + $0x394] sm:$0xf]  ;;  %v5476_v10 = vld [vmem:[#allocation5 + $0x130] sm:$0xf] }
 0x142   :  { %2873 = vmatpush.bf16.msra.mxu3 %v5893_v11  ;;  %v2607_v11 = vadd.f32 %v2606_v21, %v2594_v0  ;;  %v5781_v16 = vor.u32 %v7891_v5, %v5778_v6  ;;  %v5980_v21 = vld [vmem:[#allocation5 + $0x520] sm:$0xf]  ;;  %v7874_v0 = vld [vmem:[#allocation5 + $0x308] sm:$0xf0] }
 0x143   :  { %2899 = vmatpush.bf16.msrb.mxu0 %v6341_v27  ;;  %v5756_v27 = vld [vmem:[#allocation5 + $0x360] sm:$0xf]  ;;  %v2621_v39 = vpop.f32.mrf.mxu2  ;;  %v5981_v46 = vor.u32 %v7944_v30, %v5980_v21  ;;  %v5701_v8 = vor.u32 %v7874_v0, %v5700_v63  ;;  %v7811_v30 = vld [vmem:[#allocation5 + $0x110] sm:$0xf0]  ;;  %v7797_v63 = vld [vmem:[#allocation5 + $0xa0] sm:$0xf0] }
 0x144   :  { %2885 = vmatpush.bf16.msra.mxu1 %v6145_v23  ;;  %v8003_v23 = vld [vmem:[#allocation5 + $0x714] sm:$0xf]  ;;  %v8928_v24 = vadd.f32 %v2619_v58, %v2607_v11  ;;  %v5504_v58 = vld [vmem:[#allocation5 + $0x168] sm:$0xf]  ;;  %v6148_v11 = vld [vmem:[#allocation5 + $0x670] sm:$0xf] }
 0x145   :  { %2911 = vmatpush.bf16.msra.mxu2 %v6593_v20  ;;  %v6030_v20 = vld [vmem:[#allocation5 + $0x5a4] sm:$0xf0]  ;;  %v6229_v40 = vor.u32 %v8003_v23, %v6226_v25  ;;  %v5477_v25 = vor.u32 %v7818_v14, %v5476_v10  ;;  %v5588_v0 = vld [vmem:[#allocation5 + $0x210] sm:$0xf] }
 0x146   :  { %2874 = vmatpush.bf16.msra.mxu3 %v5865_v28  ;;  %v7888_v28 = vld [vmem:[#allocation5 + $0x378] sm:$0xf0]  ;;  %v6033_v32 = vor.u32 %v7954_v17, %v6030_v20  ;;  %v5896_v17 = vld [vmem:[#allocation5 + $0x478] sm:$0xf]  ;;  %v7923_v20 = vld [vmem:[#allocation5 + $0x490] sm:$0xf0] }
 0x147   :  { %2900 = vmatpush.bf16.msrb.mxu0 %v6313_v41  ;;  %v5757_v41 = vor.u32 %v7888_v28, %v5756_v27  ;;  %v5448_v27 = vld [vmem:[#allocation5 + $0xf8] sm:$0xf]  ;;  %v5897_v21 = vor.u32 %v7923_v20, %v5896_v17  ;;  %v6036_v14 = vld [vmem:[#allocation5 + $0x590] sm:$0xf]  ;;  %v7839_v20 = vld [vmem:[#allocation5 + $0x1f0] sm:$0xf0] }
 0x148   :  { %2886 = vmatpush.bf16.msra.mxu1 %v6117_v38  ;;  %v2595_v38 = vpop.f32.mrf.mxu3  ;;  %v2660_v5 = vpop.f32.mrf.mxu0  ;;  %v6120_v28 = vld [vmem:[#allocation5 + $0x638] sm:$0xf] }
 0x149   :  { %2912 = vmatpush.bf16.msra.mxu2 %v6565_v36  ;;  %v6450_v36 = vld [vmem:[#allocation5 + $0x8ec] sm:$0xf0]  ;;  %v5560_v17 = vld [vmem:[#allocation5 + $0x1d8] sm:$0xf] }
 0x14a   :  { %2875 = vmatpush.bf16.msra.mxu3 %v5837_v42  ;;  %v5532_v42 = vld [vmem:[#allocation5 + $0x1a0] sm:$0xf]  ;;  %v6453_v49 = vor.u32 %v8059_v35, %v6450_v36  ;;  %v7916_v36 = vld [vmem:[#allocation5 + $0x458] sm:$0xf0]  ;;  %v5812_v5 = vld [vmem:[#allocation5 + $0x3d0] sm:$0xf] }
 0x14b   :  { %2901 = vmatpush.bf16.msrb.mxu0 %v6285_v59  ;;  %v5533_v55 = vor.u32 %v7832_v47, %v5532_v42  ;;  %v6176_v59 = vld [vmem:[#allocation5 + $0x6a8] sm:$0xf]  ;;  %v5868_v35 = vld [vmem:[#allocation5 + $0x440] sm:$0xf] }
 0x14c   :  { %2887 = vmatpush.bf16.msra.mxu1 %v6089_v52  ;;  %v6005_v52 = vor.u32 %v7947_v31, %v6002_v34  ;;  %v5644_v31 = vld [vmem:[#allocation5 + $0x280] sm:$0xf]  ;;  %v5869_v48 = vor.u32 %v7916_v36, %v5868_v35  ;;  %v6008_v35 = vld [vmem:[#allocation5 + $0x558] sm:$0xf]  ;;  %v7951_v36 = vld [vmem:[#allocation5 + $0x570] sm:$0xf0] }
 0x14d   :  { %2913 = vmatpush.bf16.msra.mxu2 %v6537_v50  ;;  %v5952_v50 = vld [vmem:[#allocation5 + $0x4e8] sm:$0xf] }
 0x14e   :  { %2876 = vmatpush.bf16.msra.mxu3 %v5809_v60  ;;  %v7993_v60 = vld [vmem:[#allocation5 + $0x6c0] sm:$0xf0]  ;;  %v5953_v61 = vor.u32 %v7937_v51, %v5952_v50 }
 0x14f   :  { %2902 = vmatpush.bf16.msrb.mxu0 %v6257_v15  ;;  %v6177_v6 = vor.u32 %v7993_v60, %v6176_v59  ;;  %v5672_v15 = vld [vmem:[#allocation5 + $0x2b8] sm:$0xf]  ;;  %v7853_v50 = vld [vmem:[#allocation5 + $0x260] sm:$0xf0]  ;;  %v5392_v59 = vld [vmem:[#allocation5 + $0x88] sm:$0xf] }
 0x150   :  { %2888 = vmatpush.bf16.msra.mxu1 %v6061_v12  ;;  %v7986_v12 = vld [vmem:[#allocation5 + $0x688] sm:$0xf0]  ;;  %v6064_v60 = vld [vmem:[#allocation5 + $0x5c8] sm:$0xf] }
 0x151   :  { %2914 = vmatpush.bf16.msra.mxu2 %v6509_v7  ;;  %v5505_v7 = vor.u32 %v7825_v62, %v5504_v58  ;;  %v6149_v23 = vor.u32 %v7986_v12, %v6148_v11  ;;  %v5393_v11 = vor.u32 %v7797_v63, %v5392_v59  ;;  %v5589_v12 = vor.u32 %v7846_v1, %v5588_v0  ;;  %v8049_v59 = vld [vmem:[#allocation5 + $0x880] sm:$0xf0]  ;;  %v8146_v63 = vld [vmem:[#allocation8 + $0xcc] sm:$0xf0]  ;;  %v6915_v0 = vld [vmem:[#allocation8 + $0x1c0] sm:$0xf] }
 0x152   :  { %2877 = vmatpush.bf16.msra.mxu3 %v5781_v16  ;;  %v7867_v16 = vld [vmem:[#allocation5 + $0x2d0] sm:$0xf0]  ;;  %v8178_v1 = vld [vmem:[#allocation8 + $0x1cc] sm:$0xf0] }
 0x153   :  { %2903 = vmatpush.bf16.msrb.mxu0 %v6229_v40  ;;  %v8937_v40 = vpop.f32.mrf.mxu0 }
 0x154   :  { %2889 = vmatpush.bf16.msra.mxu1 %v6033_v32  ;;  %v7860_v32 = vld [vmem:[#allocation5 + $0x298] sm:$0xf0]  ;;  %v2632_v34 = vpop.f32.mrf.mxu1 }
 0x155   :  { %2915 = vmatpush.bf16.msra.mxu2 %v6481_v9  ;;  %2878 = vmatmul.bf16.vlgmr.msra.gmra.mxu3 %v8857_v53  ;;  %v7979_v9 = vld [vmem:[#allocation5 + $0x650] sm:$0xf0]  ;;  %v2633_v38 = vadd.f32 %v2632_v34, %v8928_v24  ;;  %v5645_v42 = vor.u32 %v7860_v32, %v5644_v31  ;;  %v7909_v24 = vld [vmem:[#allocation5 + $0x420] sm:$0xf0]  ;;  %v5561_v32 = vor.u32 %v7839_v20, %v5560_v17  ;;  %v5336_v34 = vld [vmem:[#allocation5 + $0x18] sm:$0xf] }
 0x156   :  { %2929 = vmatpush.bf16.msrb.mxu3 %v6677_v26  ;;  %2904 = vmatmul.bf16.vlgmr.msrb.gmra.mxu0 %v8873_v33  ;;  %v5673_v26 = vor.u32 %v7867_v16, %v5672_v15  ;;  %v6121_v39 = vor.u32 %v7979_v9, %v6120_v28  ;;  %v7958_v15 = vld [vmem:[#allocation5 + $0x5a8] sm:$0xf0]  ;;  %v8112_v28 = vld [vmem:[#allocation5 + $0xa78] sm:$0xf0]  ;;  %v8091_v17 = vld [vmem:[#allocation5 + $0x9d0] sm:$0xf0] }
 0x157   :  { %2961 = vmatpush.bf16.msra.mxu0 %v5981_v46  ;;  %v7972_v46 = vld [vmem:[#allocation5 + $0x618] sm:$0xf0]  ;;  %v6037_v9 = vor.u32 %v7958_v15, %v6036_v14  ;;  %v8142_v14 = vld [vmem:[#allocation8 + $0xac] sm:$0xf0]  ;;  %v6899_v15 = vld [vmem:[#allocation8 + $0x1a0] sm:$0xf] }
 0x158   :  { %2890 = vmatpush.bf16.msra.mxu1 %v6005_v52  ;;  %v2645_v47 = vpop.f32.mrf.mxu3  ;;  %v5840_v52 = vld [vmem:[#allocation5 + $0x408] sm:$0xf]  ;;  %v8951_v20 = vld [vmem:[#allocation7] sm:$0xff] }
 0x159   :  { %2916 = vmatpush.bf16.msra.mxu2 %v6453_v49  ;;  %v5616_v49 = vld [vmem:[#allocation5 + $0x248] sm:$0xf]  ;;  %v2646_v51 = vadd.f32 %v2645_v47, %v2633_v38  ;;  %v5841_v62 = vor.u32 %v7909_v24, %v5840_v52  ;;  %v6803_v47 = vld [vmem:[#allocation8 + $0xe0] sm:$0xf]  ;;  %v8105_v52 = vld [vmem:[#allocation5 + $0xa40] sm:$0xf0] }
 0x15a   :  { %2948 = vmatpush.bf16.msra.mxu3 %v5757_v41  ;;  %v5449_v41 = vor.u32 %v7811_v30, %v5448_v27  ;;  %v5617_v58 = vor.u32 %v7853_v50, %v5616_v49  ;;  %v6652_v27 = vld [vmem:[#allocation5 + $0xa60] sm:$0xf]  ;;  %v8119_v30 = vld [vmem:[#allocation5 + $0xab0] sm:$0xf0]  ;;  %v6009_v49 = vor.u32 %v7951_v36, %v6008_v35  ;;  %v8182_v50 = vld [vmem:[#allocation8 + $0x1ec] sm:$0xf0] }
 0x15b   :  { %2962 = vmatpush.bf16.msra.mxu0 %v5953_v61  ;;  %2891 = vmatmul.bf16.vlgmr.msra.gmra.mxu1 %v8865_v19  ;;  %v7965_v61 = vld [vmem:[#allocation5 + $0x5e0] sm:$0xf0]  ;;  %v8944_v2 = vpop.f32.mrf.mxu2  ;;  %v2686_v10 = vpop.f32.mrf.mxu0 }
 0x15c   :  { %2935 = vmatpush.bf16.msrb.mxu1 %v5533_v55  ;;  %2917 = vmatmul.bf16.vlgmr.msra.gmra.mxu2 %v8875_v37  ;;  %v8942_v55 = vadd.f32 %v8930_v57, %v2646_v51  ;;  %v5364_v57 = vld [vmem:[#allocation5 + $0x50] sm:$0xf]  ;;  %v6624_v51 = vld [vmem:[#allocation5 + $0xa28] sm:$0xf]  ;;  %v8042_v10 = vld [vmem:[#allocation5 + $0x848] sm:$0xf0] }
 0x15d   :  { %2974 = vmatpush.bf16.msrb.mxu2 %v6205_v54  ;;  %v6093_v54 = vor.u32 %v7972_v46, %v6092_v44 }
 0x15e   :  { %2949 = vmatpush.bf16.msra.mxu3 %v5729_v56  ;;  %v5421_v56 = vor.u32 %v7804_v3, %v5420_v43  ;;  %v8056_v43 = vld [vmem:[#allocation5 + $0x8b8] sm:$0xf0]  ;;  %v6931_v3 = vld [vmem:[#allocation8 + $0x1e0] sm:$0xf] }
 0x15f   :  { %2963 = vmatpush.bf16.msra.mxu0 %v5925_v13  ;;  %v7790_v13 = vld [vmem:[#allocation5 + $0x68] sm:$0xf0] }
 0x160   :  { %2936 = vmatpush.bf16.msrb.mxu1 %v5505_v7  ;;  %v2634_v7 = vpop.f32.mrf.mxu1  ;;  %v5365_v31 = vor.u32 %v7790_v13, %v5364_v57  ;;  %v6372_v57 = vld [vmem:[#allocation5 + $0x830] sm:$0xf]  ;;  %v6771_v13 = vld [vmem:[#allocation8 + $0xa0] sm:$0xf] }
 0x161   :  { %2975 = vmatpush.bf16.msrb.mxu2 %v6177_v6  ;;  %v7902_v6 = vld [vmem:[#allocation5 + $0x3e8] sm:$0xf0] }
 0x162   :  { %2950 = vmatpush.bf16.msra.mxu3 %v5701_v8  ;;  %v6065_v8 = vor.u32 %v7965_v61, %v6064_v60  ;;  %v5813_v16 = vor.u32 %v7902_v6, %v5812_v5  ;;  %v6932_v60 = vor.u32 %v8182_v50, %v6931_v3  ;;  %v6625_v61 = vor.u32 %v8105_v52, %v6624_v51  ;;  %v6596_v5 = vld [vmem:[#allocation5 + $0x9f0] sm:$0xf]  ;;  %v8098_v6 = vld [vmem:[#allocation5 + $0xa08] sm:$0xf0]  ;;  %v6867_v3 = vld [vmem:[#allocation8 + $0x160] sm:$0xf] }
 0x163   :  { %2964 = vmatpush.bf16.msra.mxu0 %v5897_v21  ;;  %v6680_v21 = vld [vmem:[#allocation5 + $0xa98] sm:$0xf]  ;;  %v2673_v44 = vpop.f32.mrf.mxu2  ;;  %v8077_v50 = vld [vmem:[#allocation5 + $0x960] sm:$0xf0] }
 0x164   :  { %2937 = vmatpush.bf16.msrb.mxu1 %v5477_v25  ;;  %v2647_v25 = vpop.f32.mrf.mxu3  ;;  %v6681_v46 = vor.u32 %v8119_v30, %v6680_v21  ;;  %v6755_v21 = vld [vmem:[#allocation8 + $0x80] sm:$0xf]  ;;  %v8138_v30 = vld [vmem:[#allocation8 + $0x8c] sm:$0xf0] }
 0x165   :  { %2976 = vmatpush.bf16.msrb.mxu2 %v6149_v23  ;;  %6687 = vmatmul.msk.bf16.vlgmr.msrb.gmra.mxu3 %vm2385_vm0, %v8869_v45  ;;  %v5784_v23 = vld [vmem:[#allocation5 + $0x398] sm:$0xf]  ;;  %v6373_v25 = vor.u32 %v8042_v10, %v6372_v57  ;;  %v6260_v10 = vld [vmem:[#allocation5 + $0x750] sm:$0xf] }
 0x166   :  { %2951 = vmatpush.bf16.msra.mxu3 %v5673_v26  ;;  %v7895_v26 = vld [vmem:[#allocation5 + $0x3b0] sm:$0xf0] }
 0x167   :  { %2965 = vmatpush.bf16.msra.mxu0 %v5869_v48  ;;  %v5785_v38 = vor.u32 %v7895_v26, %v5784_v23  ;;  %v8150_v48 = vld [vmem:[#allocation8 + $0xec] sm:$0xf0]  ;;  %v610_v23 = vperm.slane %v8951_v20, 3  ;;  %v6772_v26 = vor.u32 %v8142_v14, %v6771_v13 }
 0x168   :  { %2938 = vmatpush.bf16.msrb.mxu1 %v5449_v41  ;;  %v7783_v41 = vld [vmem:[#allocation5 + $0x30] sm:$0xf0] }
 0x169   :  { %2977 = vmatpush.bf16.msrb.mxu2 %v6121_v39  ;;  %v6653_v39 = vor.u32 %v8112_v28, %v6652_v27  ;;  %v5337_v24 = vor.u32 %v7783_v41, %v5336_v34  ;;  %v6344_v27 = vld [vmem:[#allocation5 + $0x7f8] sm:$0xf]  ;;  %v8035_v28 = vld [vmem:[#allocation5 + $0x810] sm:$0xf0]  ;;  %v3027_v34 = vmul.f32 0.5, %v8921_v22  ;;  %v2672_v36 = vadd.f32 %v8944_v2, %v610_v23 }
 0x16a   :  { %2952 = vmatpush.bf16.msra.mxu3 %v5645_v42  ;;  %v6428_v42 = vld [vmem:[#allocation5 + $0x8a0] sm:$0xf]  ;;  %v8166_v22 = vld [vmem:[#allocation8 + $0x16c] sm:$0xf0]  ;;  %v8063_v23 = vld [vmem:[#allocation5 + $0x8f0] sm:$0xf0] }
 0x16b   :  { %2966 = vmatpush.bf16.msra.mxu0 %v5841_v62  ;;  %v6787_v62 = vld [vmem:[#allocation8 + $0xc0] sm:$0xf]  ;;  %v2685_v51 = vadd.f32 %v8937_v40, %v2672_v36 }
 0x16c   :  { %2939 = vmatpush.bf16.msrb.mxu1 %v5421_v56  ;;  %v6804_v56 = vor.u32 %v8150_v48, %v6803_v47  ;;  %v6739_v47 = vld [vmem:[#allocation8 + $0x60] sm:$0xf]  ;;  %v8134_v48 = vld [vmem:[#allocation8 + $0x6c] sm:$0xf0] }
 0x16d   :  { %2978 = vmatpush.bf16.msrb.mxu2 %v6093_v54  ;;  %v6429_v54 = vor.u32 %v8056_v43, %v6428_v42  ;;  %v6316_v42 = vld [vmem:[#allocation5 + $0x7c0] sm:$0xf]  ;;  %v8028_v43 = vld [vmem:[#allocation5 + $0x7d8] sm:$0xf0] }
 0x16e   :  { %2953 = vmatpush.bf16.msra.mxu3 %v5617_v58  ;;  %v6400_v58 = vld [vmem:[#allocation5 + $0x868] sm:$0xf]  ;;  %v6317_v52 = vor.u32 %v8028_v43, %v6316_v42  ;;  %v8154_v42 = vld [vmem:[#allocation8 + $0x10c] sm:$0xf0]  ;;  %v7059_v43 = vld [vmem:[#allocation8 + $0x2e0] sm:$0xf] }
 0x16f   :  { %2967 = vmatpush.bf16.msra.mxu0 %v5813_v16  ;;  %v6401_v7 = vor.u32 %v8049_v59, %v6400_v58  ;;  %v6568_v16 = vld [vmem:[#allocation5 + $0x9b8] sm:$0xf]  ;;  %v6868_v59 = vor.u32 %v8166_v22, %v6867_v3 }
 0x170   :  { %2940 = vmatpush.bf16.msrb.mxu1 %v5393_v11  ;;  %v6916_v11 = vor.u32 %v8178_v1, %v6915_v0  ;;  %v8162_v0 = vld [vmem:[#allocation8 + $0x14c] sm:$0xf0] }
 0x171   :  { %2979 = vmatpush.bf16.msrb.mxu2 %v6065_v8  ;;  %v6788_v8 = vor.u32 %v8146_v63, %v6787_v62  ;;  %v8130_v62 = vld [vmem:[#allocation8 + $0x4c] sm:$0xf0]  ;;  %v6851_v63 = vld [vmem:[#allocation8 + $0x140] sm:$0xf] }
 0x172   :  { %2954 = vmatpush.bf16.msra.mxu3 %v5589_v12  ;;  %v6597_v12 = vor.u32 %v8098_v6, %v6596_v5  ;;  %v6484_v1 = vld [vmem:[#allocation5 + $0x910] sm:$0xf]  ;;  %v8070_v5 = vld [vmem:[#allocation5 + $0x928] sm:$0xf0]  ;;  %v6852_v14 = vor.u32 %v8162_v0, %v6851_v63  ;;  %v7299_v0 = vld [vmem:[#allocation8 + $0x4c0] sm:$0xf] }
 0x173   :  { %2968 = vmatpush.bf16.msra.mxu0 %v5785_v38  ;;  %v6345_v38 = vor.u32 %v8035_v28, %v6344_v27  ;;  %v8956_v41 = vpop.f32.mrf.mxu0  ;;  %v8246_v27 = vld [vmem:[#allocation8 + $0x3ec] sm:$0xf0] }
 0x174   :  { %2941 = vmatpush.bf16.msrb.mxu1 %v5365_v31  ;;  %v6883_v31 = vld [vmem:[#allocation8 + $0x180] sm:$0xf]  ;;  %v2697_v35 = vpop.f32.mrf.mxu1  ;;  %v8238_v63 = vld [vmem:[#allocation8 + $0x3ac] sm:$0xf0] }
 0x175   :  { %2980 = vmatpush.bf16.msrb.mxu2 %v6037_v9  ;;  %v6569_v9 = vor.u32 %v8091_v17, %v6568_v16  ;;  %v8126_v16 = vld [vmem:[#allocation8 + $0x2c] sm:$0xf0]  ;;  %v6835_v17 = vld [vmem:[#allocation8 + $0x120] sm:$0xf] }
 0x176   :  { %2955 = vmatpush.bf16.msra.mxu3 %v5561_v32  ;;  %2969 = vmatmul.bf16.vlgmr.msra.gmra.mxu0 %v8857_v53  ;;  %v3026_v53 = vmul.f32 0.5, %v8907_v29  ;;  %v6540_v32 = vld [vmem:[#allocation5 + $0x980] sm:$0xf]  ;;  %v8084_v29 = vld [vmem:[#allocation5 + $0x998] sm:$0xf0] }
 0x177   :  { %3020 = vmatpush.bf16.msrb.mxu0 %v6681_v46  ;;  %v6541_v46 = vor.u32 %v8084_v29, %v6540_v32  ;;  %v8007_v29 = vld [vmem:[#allocation5 + $0x730] sm:$0xf0] }
 0x178   :  { %2942 = vmatpush.bf16.msrb.mxu1 %v5337_v24  ;;  %8413 = vtanh.f32 %v3026_v53  ;;  %v2710_v2 = vpop.f32.mrf.mxu3  ;;  %v6740_v24 = vor.u32 %v8134_v48, %v6739_v47  ;;  %v8158_v53 = vld [vmem:[#allocation8 + $0x12c] sm:$0xf0]  ;;  %v7171_v47 = vld [vmem:[#allocation8 + $0x3c0] sm:$0xf] }
 0x179   :  { %2981 = vmatpush.bf16.msrb.mxu2 %v6009_v49  ;;  %2956 = vmatmul.bf16.vlgmr.msra.gmra.mxu3 %v8863_v18  ;;  %v8174_v18 = vld [vmem:[#allocation8 + $0x1ac] sm:$0xf0]  ;;  %v6512_v49 = vld [vmem:[#allocation5 + $0x948] sm:$0xf]  ;;  %8415 = vtanh.f32 %v3027_v34  ;;  %v6691_v34 = vld [vmem:[#allocation8] sm:$0xf] }
 0x17a   :  { %3000 = vmatpush.bf16.msrb.mxu3 %v6653_v39  ;;  %v6756_v39 = vor.u32 %v8138_v30, %v6755_v21  ;;  %v8242_v48 = vld [vmem:[#allocation8 + $0x3cc] sm:$0xf0] }
 0x17b   :  { %4428 = vmatpush.bf16.msra.mxu0 %v6932_v60  ;;  %2943 = vmatmul.bf16.vlgmr.msrb.gmra.mxu1 %v8860_v4  ;;  %v6900_v4 = vor.u32 %v8174_v18, %v6899_v15  ;;  %v2723_v58 = vpop.f32.mrf.mxu2  ;;  %v6513_v60 = vor.u32 %v8077_v50, %v6512_v49  ;;  %v6485_v15 = vor.u32 %v8070_v5, %v6484_v1  ;;  %v6707_v18 = vld [vmem:[#allocation8 + $0x20] sm:$0xf]  ;;  %v8278_v50 = vld [vmem:[#allocation8 + $0x4ec] sm:$0xf0] }
 0x17c   :  { %2987 = vmatpush.bf16.msra.mxu1 %v6429_v54  ;;  %2982 = vmatmul.bf16.vlgmr.msrb.gmra.mxu2 %v8865_v19  ;;  %v8170_v19 = vld [vmem:[#allocation8 + $0x18c] sm:$0xf0]  ;;  %v6288_v54 = vld [vmem:[#allocation5 + $0x788] sm:$0xf]  ;;  %v2699_v40 = vpop.f32.mrf.mxu1  ;;  %v6708_v30 = vor.u32 %v8126_v16, %v6707_v18  ;;  %v7315_v49 = vld [vmem:[#allocation8 + $0x4e0] sm:$0xf] }
 0x17d   :  { %4415 = vmatpush.bf16.msra.mxu2 %v6804_v56  ;;  %v6884_v44 = vor.u32 %v8170_v19, %v6883_v31  ;;  %v8021_v56 = vld [vmem:[#allocation5 + $0x7a0] sm:$0xf0]  ;;  %v6232_v31 = vld [vmem:[#allocation5 + $0x718] sm:$0xf]  ;;  %v6836_v19 = vor.u32 %v8158_v53, %v6835_v17  ;;  %v8274_v1 = vld [vmem:[#allocation8 + $0x4cc] sm:$0xf0] }
 0x17e   :  { %3001 = vmatpush.bf16.msrb.mxu3 %v6625_v61  ;;  %v6723_v61 = vld [vmem:[#allocation8 + $0x40] sm:$0xf]  ;;  %v8414_v6 = vpop.eup %8413  ;;  %v6233_v22 = vor.u32 %v8007_v29, %v6232_v31 }
 0x17f   :  { %4429 = vmatpush.bf16.msra.mxu0 %v6916_v11  ;;  %v6724_v57 = vor.u32 %v8130_v62, %v6723_v61  ;;  %v8014_v11 = vld [vmem:[#allocation5 + $0x768] sm:$0xf0]  ;;  %v8416_v13 = vpop.eup %8415  ;;  %v7316_v61 = vor.u32 %v8278_v50, %v7315_v49  ;;  %v7155_v62 = vld [vmem:[#allocation8 + $0x3a0] sm:$0xf] }
 0x180   :  { %2988 = vmatpush.bf16.msra.mxu1 %v6401_v7  ;;  %v2698_v7 = vadd.f32 %v2697_v35, %v2685_v51  ;;  %v2712_v28 = vpop.f32.mrf.mxu3  ;;  %v6261_v21 = vor.u32 %v8014_v11, %v6260_v10  ;;  %v8122_v35 = vld [vmem:[#allocation8 + $0xc] sm:$0xf0]  ;;  %v7300_v10 = vor.u32 %v8274_v1, %v7299_v0  ;;  %v7011_v17 = vld [vmem:[#allocation8 + $0x280] sm:$0xf] }
 0x181   :  { %4416 = vmatpush.bf16.msra.mxu2 %v6788_v8  ;;  %v6289_v8 = vor.u32 %v8021_v56, %v6288_v54  ;;  %v7172_v56 = vor.u32 %v8242_v48, %v7171_v47  ;;  %v8234_v11 = vld [vmem:[#allocation8 + $0x38c] sm:$0xf0]  ;;  %v7251_v29 = vld [vmem:[#allocation8 + $0x460] sm:$0xf] }
 0x182   :  { %3002 = vmatpush.bf16.msrb.mxu3 %v6597_v12  ;;  %v2738_v12 = vpop.f32.mrf.mxu0  ;;  %v7235_v49 = vld [vmem:[#allocation8 + $0x440] sm:$0xf] }
 0x183   :  { %4430 = vmatpush.bf16.msra.mxu0 %v6900_v4  ;;  %v3041_v4 = vmul.f32 0.5, %v8416_v13  ;;  %v2725_v36 = vpop.f32.mrf.mxu2  ;;  %v7283_v13 = vld [vmem:[#allocation8 + $0x4a0] sm:$0xf] }
 0x184   :  { %2989 = vmatpush.bf16.msra.mxu1 %v6373_v25  ;;  %v3040_v25 = vmul.f32 0.5, %v8414_v6  ;;  %v7443_v36 = vld [vmem:[#allocation8 + $0x5e0] sm:$0xf] }
 0x185   :  { %4417 = vmatpush.bf16.msra.mxu2 %v6772_v26  ;;  %v7187_v26 = vld [vmem:[#allocation8 + $0x3e0] sm:$0xf]  ;;  %v3048_v51 = vadd.f32 0.5, %v3041_v4 }
 0x186   :  { %3003 = vmatpush.bf16.msrb.mxu3 %v6569_v9  ;;  %6688 = vmatmul.msk.bf16.vlgmr.msrb.gmra.mxu0 %vm2385_vm0, %v8869_v45  ;;  %v6456_v45 = vld [vmem:[#allocation5 + $0x8d8] sm:$0xf]  ;;  %v2711_v9 = vadd.f32 %v2710_v2, %v2698_v7  ;;  %v3047_v2 = vadd.f32 0.5, %v3040_v25  ;;  %v7267_v25 = vld [vmem:[#allocation8 + $0x480] sm:$0xf] }
 0x187   :  { %4431 = vmatpush.bf16.msra.mxu0 %v6884_v44  ;;  %v6457_v32 = vor.u32 %v8063_v23, %v6456_v45  ;;  %v2749_v44 = vpop.f32.mrf.mxu1  ;;  %v8965_v40 = vpack.c.bf16 %v3048_v51, %v3048_v51  ;;  %v7123_v45 = vld [vmem:[#allocation8 + $0x360] sm:$0xf]  ;;  %v8230_v23 = vld [vmem:[#allocation8 + $0x36c] sm:$0xf0] }
 0x188   :  { %2990 = vmatpush.bf16.msra.mxu1 %v6345_v38  ;;  %v7188_v38 = vor.u32 %v8246_v27, %v7187_v26  ;;  %v2724_v3 = vadd.f32 %v2723_v58, %v2711_v9  ;;  %v8963_v5 = vpack.c.bf16 %v3047_v2, %v3047_v2  ;;  %v8266_v26 = vld [vmem:[#allocation8 + $0x48c] sm:$0xf0]  ;;  %v3028_v27 = vmul.f32 0.5, %v8942_v55  ;;  %v6995_v9 = vld [vmem:[#allocation8 + $0x260] sm:$0xf] }
 0x189   :  { %4418 = vmatpush.bf16.msra.mxu2 %v6756_v39  ;;  %v6819_v39 = vld [vmem:[#allocation8 + $0x100] sm:$0xf]  ;;  %v7124_v4 = vor.u32 %v8230_v23, %v7123_v45  ;;  %v7268_v31 = vor.u32 %v8266_v26, %v7267_v25  ;;  %v8258_v2 = vld [vmem:[#allocation8 + $0x44c] sm:$0xf0]  ;;  %v6789_v26 = vld [vmem:[#allocation8 + $0xd0] sm:$0xf0] }
 0x18a   :  { %3004 = vmatpush.bf16.msrb.mxu3 %v6541_v46  ;;  %v8214_v46 = vld [vmem:[#allocation8 + $0x2ec] sm:$0xf0]  ;;  %v2737_v58 = vadd.f32 %v8956_v41, %v2724_v3  ;;  %v7091_v3 = vld [vmem:[#allocation8 + $0x320] sm:$0xf]  ;;  %v7236_v1 = vor.u32 %v8258_v2, %v7235_v49 }
 0x18b   :  { %4432 = vmatpush.bf16.msra.mxu0 %v6868_v59  ;;  %v7060_v54 = vor.u32 %v8214_v46, %v7059_v43  ;;  %v7043_v59 = vld [vmem:[#allocation8 + $0x2c0] sm:$0xf]  ;;  %v8206_v41 = vld [vmem:[#allocation8 + $0x2ac] sm:$0xf0] }
 0x18c   :  { %2991 = vmatpush.bf16.msra.mxu1 %v6317_v52  ;;  %v6692_v52 = vor.u32 %v8122_v35, %v6691_v34  ;;  %v2750_v6 = vadd.f32 %v2749_v44, %v2737_v58  ;;  %v8262_v34 = vld [vmem:[#allocation8 + $0x46c] sm:$0xf0]  ;;  %v6979_v43 = vld [vmem:[#allocation8 + $0x240] sm:$0xf] }
 0x18d   :  { %4419 = vmatpush.bf16.msra.mxu2 %v6740_v24  ;;  %v6820_v24 = vor.u32 %v8154_v42, %v6819_v39  ;;  %v8194_v44 = vld [vmem:[#allocation8 + $0x24c] sm:$0xf0]  ;;  %v7252_v48 = vor.u32 %v8262_v34, %v7251_v29  ;;  %v7427_v51 = vld [vmem:[#allocation8 + $0x5c0] sm:$0xf] }
 0x18e   :  { %3005 = vmatpush.bf16.msrb.mxu3 %v6513_v60  ;;  %v8210_v60 = vld [vmem:[#allocation8 + $0x2cc] sm:$0xf0] }
 0x18f   :  { %4433 = vmatpush.bf16.msra.mxu0 %v6852_v14  ;;  %v7044_v7 = vor.u32 %v8210_v60, %v7043_v59  ;;  %v2751_v12 = vpop.f32.mrf.mxu1  ;;  %v8270_v14 = vld [vmem:[#allocation8 + $0x4ac] sm:$0xf0]  ;;  %v6980_v59 = vor.u32 %v8194_v44, %v6979_v43  ;;  %v6773_v43 = vld [vmem:[#allocation8 + $0xb0] sm:$0xf0]  ;;  %v7379_v44 = vld [vmem:[#allocation8 + $0x560] sm:$0xf] }
 0x190   :  { %2992 = vmatpush.bf16.msra.mxu1 %v6289_v8  ;;  %v7156_v8 = vor.u32 %v8238_v63, %v7155_v62  ;;  %v7284_v53 = vor.u32 %v8270_v14, %v7283_v13  ;;  %v8218_v62 = vld [vmem:[#allocation8 + $0x30c] sm:$0xf0]  ;;  %v8148_v63 = vld [vmem:[#allocation8 + $0xe4] sm:$0xf] }
 0x191   :  { %4420 = vmatpush.bf16.msra.mxu2 %v6724_v57  ;;  %v7027_v57 = vld [vmem:[#allocation8 + $0x2a0] sm:$0xf] }
 0x192   :  { %3006 = vmatpush.bf16.msrb.mxu3 %v6485_v15  ;;  %v3029_v15 = vmul.f32 0.5, %v2750_v6  ;;  %v7028_v18 = vor.u32 %v8206_v41, %v7027_v57  ;;  %v6805_v6 = vld [vmem:[#allocation8 + $0xf0] sm:$0xf0]  ;;  %v8254_v57 = vld [vmem:[#allocation8 + $0x42c] sm:$0xf0] }
 0x193   :  { %4434 = vmatpush.bf16.msra.mxu0 %v6836_v19  ;;  %v7107_v19 = vld [vmem:[#allocation8 + $0x340] sm:$0xf]  ;;  %v6808_v23 = vor.u32 %v8148_v63, %v6805_v6 }
 0x194   :  { %2993 = vmatpush.bf16.msra.mxu1 %v6261_v21  ;;  %8417 = vtanh.f32 %v3029_v15  ;;  %v8198_v21 = vld [vmem:[#allocation8 + $0x26c] sm:$0xf0]  ;;  %v6947_v15 = vld [vmem:[#allocation8 + $0x200] sm:$0xf] }
 0x195   :  { %4421 = vmatpush.bf16.msra.mxu2 %v6708_v30  ;;  %v8971_v30 = vpop.f32.mrf.mxu0  ;;  %8419 = vtanh.f32 %v3028_v27  ;;  %v6996_v39 = vor.u32 %v8198_v21, %v6995_v9  ;;  %v7203_v27 = vld [vmem:[#allocation8 + $0x400] sm:$0xf]  ;;  %v8298_v9 = vld [vmem:[#allocation8 + $0x58c] sm:$0xf0] }
 0x196   :  { %3007 = vmatpush.bf16.msrb.mxu3 %v6457_v32  ;;  %v8226_v32 = vld [vmem:[#allocation8 + $0x34c] sm:$0xf0]  ;;  %v7347_v6 = vld [vmem:[#allocation8 + $0x520] sm:$0xf] }
 0x197   :  { %4435 = vmatpush.bf16.msra.mxu0 %v6820_v24  ;;  %v7108_v42 = vor.u32 %v8226_v32, %v7107_v19  ;;  %v6963_v24 = vld [vmem:[#allocation8 + $0x220] sm:$0xf]  ;;  %v6933_v19 = vld [vmem:[#allocation8 + $0x1f0] sm:$0xf0] }
 0x198   :  { %2994 = vmatpush.bf16.msra.mxu1 %v6233_v22  ;;  %v8973_v35 = vpop.f32.mrf.mxu1  ;;  %v2762_v46 = vpop.f32.mrf.mxu3  ;;  %v8222_v22 = vld [vmem:[#allocation8 + $0x32c] sm:$0xf0] }
 0x199   :  { %3008 = vmatmul.bf16.vlgmr.msrb.gmra.mxu3 %v8875_v37  ;;  %4422 = vmatpush.bf16.msra.mxu2 %v6692_v52  ;;  %v7139_v37 = vld [vmem:[#allocation8 + $0x380] sm:$0xf]  ;;  %v8306_v52 = vld [vmem:[#allocation8 + $0x5cc] sm:$0xf0]  ;;  %v7092_v60 = vor.u32 %v8222_v22, %v7091_v3  ;;  %v8176_v3 = vld [vmem:[#allocation8 + $0x1c4] sm:$0xf] }
 0x19a   :  { %4454 = vmatpush.bf16.msra.mxu3 %v7188_v38  ;;  %4436 = vmatmul.bf16.vlgmr.msra.gmra.mxu0 %v8965_v40  ;;  %v7140_v16 = vor.u32 %v8234_v11, %v7139_v37  ;;  %v8310_v38 = vld [vmem:[#allocation8 + $0x5ec] sm:$0xf0]  ;;  %v8418_v50 = vpop.eup %8417  ;;  %v611_v11 = vperm.slane %v8951_v20, 4  ;;  %v6917_v22 = vld [vmem:[#allocation8 + $0x1d0] sm:$0xf0] }
 0x19b   :  { %2995 = vmatmul.bf16.vlgmr.msra.gmra.mxu1 %v8873_v33  ;;  %v8202_v33 = vld [vmem:[#allocation8 + $0x28c] sm:$0xf0]  ;;  %v7444_v55 = vor.u32 %v8310_v38, %v7443_v36  ;;  %v8975_v47 = vpop.f32.mrf.mxu2  ;;  %v3043_v0 = vmul.f32 0.5, %v8418_v50 }
 0x19c   :  { %4441 = vmatpush.bf16.msrb.mxu1 %v7060_v54  ;;  %4423 = vmatmul.bf16.vlgmr.msra.gmra.mxu2 %v8963_v5  ;;  %v7012_v28 = vor.u32 %v8202_v33, %v7011_v17  ;;  %v8190_v54 = vld [vmem:[#allocation8 + $0x22c] sm:$0xf0]  ;;  %v2763_v21 = vadd.f32 %v2762_v46, %v611_v11  ;;  %v8128_v11 = vld [vmem:[#allocation8 + $0x44] sm:$0xf] }
 0x19d   :  { %4467 = vmatpush.bf16.msrb.mxu2 %v7316_v61  ;;  %4480 = vmatpush.bf16.msrb.mxu0 %v7444_v55  ;;  %v7075_v61 = vld [vmem:[#allocation8 + $0x300] sm:$0xf]  ;;  %v2803_v58 = vpop.f32.mrf.mxu0  ;;  %v8302_v37 = vld [vmem:[#allocation8 + $0x5ac] sm:$0xf0]  ;;  %v6964_v13 = vor.u32 %v8190_v54, %v6963_v24  ;;  %v3050_v45 = vadd.f32 0.5, %v3043_v0  ;;  %v6920_v24 = vor.u32 %v8176_v3, %v6917_v22 }
 0x19e   :  { %4455 = vmatpush.bf16.msra.mxu3 %v7172_v56  ;;  %v7428_v56 = vor.u32 %v8306_v52, %v7427_v51  ;;  %v7076_v14 = vor.u32 %v8218_v62, %v7075_v61  ;;  %v2776_v46 = vadd.f32 %v8973_v35, %v2763_v21  ;;  %v8136_v52 = vld [vmem:[#allocation8 + $0x84] sm:$0xf]  ;;  %v6757_v54 = vld [vmem:[#allocation8 + $0x90] sm:$0xf0] }
 0x19f   :  { %v8978_v36 = vpack.c.bf16 %v3050_v45, %v3050_v45  ;;  %v6901_v61 = vld [vmem:[#allocation8 + $0x1b0] sm:$0xf0]  ;;  %v6760_v63 = vor.u32 %v8136_v52, %v6757_v54  ;;  %v8132_v58 = vld [vmem:[#allocation8 + $0x64] sm:$0xf] }
 0x1a0   :  { %4442 = vmatpush.bf16.msrb.mxu1 %v7044_v7  ;;  %v7219_v7 = vld [vmem:[#allocation8 + $0x420] sm:$0xf]  ;;  %v2777_v41 = vpop.f32.mrf.mxu1  ;;  %v2764_v17 = vpop.f32.mrf.mxu3  ;;  %v2789_v35 = vadd.f32 %v8975_v47, %v2776_v46  ;;  %v6709_v21 = vld [vmem:[#allocation8 + $0x30] sm:$0xf0]  ;;  %v8276_v22 = vld [vmem:[#allocation8 + $0x4e4] sm:$0xf] }
 0x1a1   :  { %4468 = vmatpush.bf16.msrb.mxu2 %v7300_v10  ;;  %4481 = vmatpush.bf16.msrb.mxu0 %v7428_v56  ;;  %v7411_v10 = vld [vmem:[#allocation8 + $0x5a0] sm:$0xf]  ;;  %v7220_v25 = vor.u32 %v8254_v57, %v7219_v7  ;;  %v8286_v7 = vld [vmem:[#allocation8 + $0x52c] sm:$0xf0]  ;;  %v8168_v57 = vld [vmem:[#allocation8 + $0x184] sm:$0xf] }
 0x1a2   :  { %4456 = vmatpush.bf16.msra.mxu3 %v7156_v8  ;;  %v8420_v8 = vpop.eup %8419  ;;  %v7412_v12 = vor.u32 %v8302_v37, %v7411_v10  ;;  %v7363_v56 = vld [vmem:[#allocation8 + $0x540] sm:$0xf]  ;;  %v6885_v41 = vld [vmem:[#allocation8 + $0x190] sm:$0xf0]  ;;  %v7348_v10 = vor.u32 %v8286_v7, %v7347_v6  ;;  %v8282_v17 = vld [vmem:[#allocation8 + $0x50c] sm:$0xf0] }
 0x1a3   :  { %v2790_v33 = vpop.f32.mrf.mxu2  ;;  %v8156_v52 = vld [vmem:[#allocation8 + $0x124] sm:$0xf] }
 0x1a4   :  { %4443 = vmatpush.bf16.msrb.mxu1 %v7028_v18  ;;  %v8186_v18 = vld [vmem:[#allocation8 + $0x20c] sm:$0xf0] }
 0x1a5   :  { %4469 = vmatpush.bf16.msrb.mxu2 %v7284_v53  ;;  %v3042_v53 = vmul.f32 0.5, %v8420_v8  ;;  %4482 = vmatpush.bf16.msrb.mxu0 %v7412_v12  ;;  %v6948_v29 = vor.u32 %v8186_v18, %v6947_v15  ;;  %v2802_v8 = vadd.f32 %v8971_v30, %v2789_v35  ;;  %v6725_v12 = vld [vmem:[#allocation8 + $0x50] sm:$0xf0]  ;;  %v6888_v15 = vor.u32 %v8168_v57, %v6885_v41  ;;  %v8164_v18 = vld [vmem:[#allocation8 + $0x164] sm:$0xf] }
 0x1a6   :  { %4457 = vmatpush.bf16.msra.mxu3 %v7140_v16  ;;  %v8144_v16 = vld [vmem:[#allocation8 + $0xc4] sm:$0xf]  ;;  %v6869_v30 = vld [vmem:[#allocation8 + $0x170] sm:$0xf0] }
 0x1a7   :  { %v3049_v34 = vadd.f32 0.5, %v3042_v53  ;;  %v6792_v38 = vor.u32 %v8144_v16, %v6789_v26  ;;  %v7331_v16 = vld [vmem:[#allocation8 + $0x500] sm:$0xf] }
 0x1a8   :  { %4444 = vmatpush.bf16.msrb.mxu1 %v7012_v28  ;;  %v8250_v28 = vld [vmem:[#allocation8 + $0x40c] sm:$0xf0]  ;;  %v7332_v45 = vor.u32 %v8282_v17, %v7331_v16  ;;  %v612_v17 = vperm.slane %v8951_v20, 5 }
 0x1a9   :  { %4470 = vmatpush.bf16.msrb.mxu2 %v7268_v31  ;;  %v8180_v31 = vld [vmem:[#allocation8 + $0x1e4] sm:$0xf]  ;;  %v7204_v55 = vor.u32 %v8250_v28, %v7203_v27  ;;  %v8982_v2 = vpack.c.bf16 %v3049_v34, %v3049_v34  ;;  %v6728_v28 = vor.u32 %v8128_v11, %v6725_v12  ;;  %v7045_v34 = vld [vmem:[#allocation8 + $0x2d0] sm:$0xf0] }
 0x1aa   :  { %4458 = vmatpush.bf16.msra.mxu3 %v7124_v4  ;;  %v7395_v4 = vld [vmem:[#allocation8 + $0x580] sm:$0xf]  ;;  %v8268_v11 = vld [vmem:[#allocation8 + $0x4a4] sm:$0xf]  ;;  %v7285_v12 = vld [vmem:[#allocation8 + $0x4b0] sm:$0xf0] }
 0x1ab   :  { %v7396_v32 = vor.u32 %v8298_v9, %v7395_v4  ;;  %v2840_v50 = vpop.f32.mrf.mxu2  ;;  %v6872_v4 = vor.u32 %v8164_v18, %v6869_v30  ;;  %v8124_v9 = vld [vmem:[#allocation8 + $0x24] sm:$0xf]  ;;  %v8342_v30 = vld [vmem:[#allocation8 + $0x6ec] sm:$0xf0] }
 0x1ac   :  { %4445 = vmatpush.bf16.msrb.mxu1 %v6996_v39  ;;  %v8140_v39 = vld [vmem:[#allocation8 + $0xa4] sm:$0xf] }
 0x1ad   :  { %4471 = vmatpush.bf16.msrb.mxu2 %v7252_v48  ;;  %4483 = vmatpush.bf16.msrb.mxu0 %v7396_v32  ;;  %v8294_v48 = vld [vmem:[#allocation8 + $0x56c] sm:$0xf0]  ;;  %v6776_v51 = vor.u32 %v8140_v39, %v6773_v43  ;;  %v6853_v32 = vld [vmem:[#allocation8 + $0x150] sm:$0xf0]  ;;  %v6712_v39 = vor.u32 %v8124_v9, %v6709_v21  ;;  %v8192_v9 = vld [vmem:[#allocation8 + $0x244] sm:$0xf] }
 0x1ae   :  { %4459 = vmatpush.bf16.msra.mxu3 %v7108_v42  ;;  %v6936_v42 = vor.u32 %v8180_v31, %v6933_v19  ;;  %v7380_v49 = vor.u32 %v8294_v48, %v7379_v44  ;;  %v8160_v31 = vld [vmem:[#allocation8 + $0x144] sm:$0xf]  ;;  %v6693_v43 = vld [vmem:[#allocation8 + $0x10] sm:$0xf0] }
 0x1af   :  { %v6856_v46 = vor.u32 %v8160_v31, %v6853_v32  ;;  %v6981_v21 = vld [vmem:[#allocation8 + $0x250] sm:$0xf0]  ;;  %v8338_v32 = vld [vmem:[#allocation8 + $0x6cc] sm:$0xf0] }
 0x1b0   :  { %4446 = vmatpush.bf16.msrb.mxu1 %v6980_v59  ;;  %v8290_v59 = vld [vmem:[#allocation8 + $0x54c] sm:$0xf0]  ;;  %v6984_v20 = vor.u32 %v8192_v9, %v6981_v21  ;;  %v7491_v9 = vld [vmem:[#allocation8 + $0x640] sm:$0xf] }
 0x1b1   :  { %4472 = vmatpush.bf16.msrb.mxu2 %v7236_v1  ;;  %4484 = vmatpush.bf16.msrb.mxu0 %v7380_v49  ;;  %v7364_v62 = vor.u32 %v8290_v59, %v7363_v56  ;;  %v6741_v1 = vld [vmem:[#allocation8 + $0x70] sm:$0xf0]  ;;  %v8204_v49 = vld [vmem:[#allocation8 + $0x2a4] sm:$0xf]  ;;  %v8322_v21 = vld [vmem:[#allocation8 + $0x64c] sm:$0xf0] }
 0x1b2   :  { %4460 = vmatpush.bf16.msra.mxu3 %v7092_v60  ;;  %v8172_v60 = vld [vmem:[#allocation8 + $0x1a4] sm:$0xf]  ;;  %v6744_v37 = vor.u32 %v8132_v58, %v6741_v1  ;;  %v6821_v58 = vld [vmem:[#allocation8 + $0x110] sm:$0xf0] }
 0x1b3   :  { %v6904_v0 = vor.u32 %v8172_v60, %v6901_v61  ;;  %v2842_v47 = vpop.f32.mrf.mxu2  ;;  %v8272_v61 = vld [vmem:[#allocation8 + $0x4c4] sm:$0xf]  ;;  %v7013_v1 = vld [vmem:[#allocation8 + $0x290] sm:$0xf0] }
 0x1b4   :  { %4447 = vmatpush.bf16.msrb.mxu1 %v6964_v13  ;;  %v8987_v13 = vpop.f32.mrf.mxu0 }
 0x1b5   :  { %4473 = vmatpush.bf16.msrb.mxu2 %v7220_v25  ;;  %4485 = vmatpush.bf16.msrb.mxu0 %v7364_v62  ;;  %v7061_v25 = vld [vmem:[#allocation8 + $0x2f0] sm:$0xf0] }
 0x1b6   :  { %4461 = vmatpush.bf16.msra.mxu3 %v7076_v14  ;;  %v7301_v62 = vld [vmem:[#allocation8 + $0x4d0] sm:$0xf0] }
 0x1b8   :  { %4448 = vmatpush.bf16.msrb.mxu1 %v6948_v29  ;;  %v2814_v14 = vpop.f32.mrf.mxu3  ;;  %v2827_v53 = vpop.f32.mrf.mxu1  ;;  %v8208_v29 = vld [vmem:[#allocation8 + $0x2c4] sm:$0xf] }
 0x1b9   :  { %4462 = vmatmul.bf16.vlgmr.msra.gmra.mxu3 %v8978_v36  ;;  %4474 = vmatpush.bf16.msrb.mxu2 %v7204_v55  ;;  %v2815_v33 = vadd.f32 %v2814_v14, %v2802_v8  ;;  %v8308_v8 = vld [vmem:[#allocation8 + $0x5e4] sm:$0xf] }
 0x1ba   :  { %4506 = vmatpush.bf16.msrb.mxu3 %v6808_v23  ;;  %4486 = vmatpush.bf16.msrb.mxu0 %v7348_v10  ;;  %v8212_v23 = vld [vmem:[#allocation8 + $0x2e4] sm:$0xf]  ;;  %v7304_v10 = vor.u32 %v8272_v61, %v7301_v62  ;;  %v6949_v61 = vld [vmem:[#allocation8 + $0x210] sm:$0xf0] }
 0x1bb   :  { %4449 = vmatmul.bf16.vlgmr.msrb.gmra.mxu1 %v8982_v2  ;;  %v7064_v26 = vor.u32 %v8212_v23, %v7061_v25  ;;  %v2828_v27 = vadd.f32 %v2827_v53, %v2815_v33  ;;  %v8196_v14 = vld [vmem:[#allocation8 + $0x264] sm:$0xf]  ;;  %v7571_v53 = vld [vmem:[#allocation8 + $0x6e0] sm:$0xf]  ;;  %v7288_v23 = vor.u32 %v8268_v11, %v7285_v12 }
 0x1bc   :  { %v2855_v48 = vpop.f32.mrf.mxu0  ;;  %v8304_v25 = vld [vmem:[#allocation8 + $0x5c4] sm:$0xf]  ;;  %v7507_v12 = vld [vmem:[#allocation8 + $0x660] sm:$0xf] }
 0x1bd   :  { %4519 = vmatpush.bf16.msra.mxu2 %v6936_v42  ;;  %v2841_v19 = vadd.f32 %v2840_v50, %v2828_v27  ;;  %v8120_v42 = vld [vmem:[#allocation8 + $0x4] sm:$0xf]  ;;  %v7317_v50 = vld [vmem:[#allocation8 + $0x4f0] sm:$0xf0] }
 0x1be   :  { %4507 = vmatpush.bf16.msrb.mxu3 %v6792_v38  ;;  %4487 = vmatpush.bf16.msrb.mxu0 %v7332_v45  ;;  %v7048_v38 = vor.u32 %v8208_v29, %v7045_v34  ;;  %v6696_v59 = vor.u32 %v8120_v42, %v6693_v43  ;;  %v7320_v35 = vor.u32 %v8276_v22, %v7317_v50  ;;  %v8264_v27 = vld [vmem:[#allocation8 + $0x484] sm:$0xf]  ;;  %v7253_v43 = vld [vmem:[#allocation8 + $0x470] sm:$0xf0] }
 0x1bf   :  { %v3030_v55 = vmul.f32 0.5, %v2841_v19  ;;  %v8989_v44 = vpop.f32.mrf.mxu2  ;;  %v7555_v19 = vld [vmem:[#allocation8 + $0x6c0] sm:$0xf]  ;;  %v2854_v29 = vadd.f32 %v8987_v13, %v612_v17  ;;  %v8188_v48 = vld [vmem:[#allocation8 + $0x224] sm:$0xf] }
 0x1c0   :  { %v2816_v3 = vpop.f32.mrf.mxu3  ;;  %v2829_v54 = vpop.f32.mrf.mxu1  ;;  %v7556_v42 = vor.u32 %v8338_v32, %v7555_v19  ;;  %v7365_v17 = vld [vmem:[#allocation8 + $0x550] sm:$0xf0]  ;;  %v8284_v19 = vld [vmem:[#allocation8 + $0x524] sm:$0xf] }
 0x1c1   :  { %4520 = vmatpush.bf16.msra.mxu2 %v6920_v24  ;;  %8421 = vtanh.f32 %v3030_v55  ;;  %v6837_v24 = vld [vmem:[#allocation8 + $0x130] sm:$0xf0]  ;;  %v2867_v50 = vadd.f32 %v8989_v44, %v2854_v29  ;;  %v8256_v54 = vld [vmem:[#allocation8 + $0x444] sm:$0xf]  ;;  %v7492_v29 = vor.u32 %v8322_v21, %v7491_v9  ;;  %v8203_v9 = vld [vmem:[#allocation8 + $0x294] sm:$0xf0] }
 0x1c2   :  { %4508 = vmatpush.bf16.msrb.mxu3 %v6776_v51  ;;  %4532 = vmatpush.bf16.msra.mxu0 %v7064_v26  ;;  %v7029_v51 = vld [vmem:[#allocation8 + $0x2b0] sm:$0xf0]  ;;  %v6840_v60 = vor.u32 %v8156_v52, %v6837_v24  ;;  %v8296_v52 = vld [vmem:[#allocation8 + $0x584] sm:$0xf] }
 0x1c3   :  { %v7032_v56 = vor.u32 %v8204_v49, %v7029_v51  ;;  %v7429_v26 = vld [vmem:[#allocation8 + $0x5d0] sm:$0xf0]  ;;  %v7539_v49 = vld [vmem:[#allocation8 + $0x6a0] sm:$0xf]  ;;  %v8334_v51 = vld [vmem:[#allocation8 + $0x6ac] sm:$0xf0] }
 0x1c4   :  { %v7432_v31 = vor.u32 %v8304_v25, %v7429_v26  ;;  %v7413_v55 = vld [vmem:[#allocation8 + $0x5b0] sm:$0xf0]  ;;  %v6939_v25 = vld [vmem:[#allocation8 + $0x1e8] sm:$0xf]  ;;  %v8183_v26 = vld [vmem:[#allocation8 + $0x1f4] sm:$0xf0] }
 0x1c5   :  { %4521 = vmatpush.bf16.msra.mxu2 %v6904_v0  ;;  %v8200_v0 = vld [vmem:[#allocation8 + $0x284] sm:$0xf]  ;;  %v7397_v24 = vld [vmem:[#allocation8 + $0x590] sm:$0xf0] }
 0x1c6   :  { %4509 = vmatpush.bf16.msrb.mxu3 %v6760_v63  ;;  %4533 = vmatpush.bf16.msra.mxu0 %v7048_v38  ;;  %v8152_v63 = vld [vmem:[#allocation8 + $0x104] sm:$0xf]  ;;  %v7016_v6 = vor.u32 %v8200_v0, %v7013_v1  ;;  %v7400_v0 = vor.u32 %v8296_v52, %v7397_v24  ;;  %v7523_v1 = vld [vmem:[#allocation8 + $0x680] sm:$0xf]  ;;  %v7349_v32 = vld [vmem:[#allocation8 + $0x530] sm:$0xf0] }
 0x1c7   :  { %v8422_v7 = vpop.eup %8421  ;;  %v2868_v57 = vpop.f32.mrf.mxu2  ;;  %v6824_v47 = vor.u32 %v8152_v63, %v6821_v58  ;;  %v8300_v38 = vld [vmem:[#allocation8 + $0x5a4] sm:$0xf]  ;;  %v8215_v52 = vld [vmem:[#allocation8 + $0x2f4] sm:$0xf0] }
 0x1c8   :  { %v3044_v41 = vmul.f32 0.5, %v8422_v7  ;;  %v7416_v22 = vor.u32 %v8300_v38, %v7413_v55  ;;  %v7381_v57 = vld [vmem:[#allocation8 + $0x570] sm:$0xf0]  ;;  %v6923_v38 = vld [vmem:[#allocation8 + $0x1c8] sm:$0xf] }
 0x1c9   :  { %4522 = vmatpush.bf16.msra.mxu2 %v6888_v15  ;;  %v6997_v15 = vld [vmem:[#allocation8 + $0x270] sm:$0xf0]  ;;  %v8179_v55 = vld [vmem:[#allocation8 + $0x1d4] sm:$0xf0] }
 0x1ca   :  { %4510 = vmatpush.bf16.msrb.mxu3 %v6744_v37  ;;  %4534 = vmatpush.bf16.msra.mxu0 %v7032_v56  ;;  %v7445_v37 = vld [vmem:[#allocation8 + $0x5f0] sm:$0xf0]  ;;  %v3051_v18 = vadd.f32 0.5, %v3044_v41  ;;  %v7000_v16 = vor.u32 %v8196_v14, %v6997_v15  ;;  %v7540_v56 = vor.u32 %v8334_v51, %v7539_v49  ;;  %v8326_v14 = vld [vmem:[#allocation8 + $0x66c] sm:$0xf0] }
 0x1cb   :  { %v7448_v33 = vor.u32 %v8308_v8, %v7445_v37  ;;  %v8292_v8 = vld [vmem:[#allocation8 + $0x564] sm:$0xf] }
 0x1cc   :  { %v8993_v45 = vpack.c.bf16 %v3051_v18, %v3051_v18  ;;  %v7384_v11 = vor.u32 %v8292_v8, %v7381_v57  ;;  %v8171_v8 = vld [vmem:[#allocation8 + $0x194] sm:$0xf0] }
 0x1cd   :  { %4523 = vmatpush.bf16.msra.mxu2 %v6872_v4  ;;  %v7269_v4 = vld [vmem:[#allocation8 + $0x490] sm:$0xf0] }
 0x1ce   :  { %4511 = vmatpush.bf16.msrb.mxu3 %v6728_v28  ;;  %4535 = vmatpush.bf16.msra.mxu0 %v7016_v6  ;;  %v7572_v28 = vor.u32 %v8342_v30, %v7571_v53  ;;  %v7272_v34 = vor.u32 %v8264_v27, %v7269_v4  ;;  %v8330_v6 = vld [vmem:[#allocation8 + $0x68c] sm:$0xf0]  ;;  %v8248_v30 = vld [vmem:[#allocation8 + $0x404] sm:$0xf] }
 0x1cf   :  { %4475 = vmatmul.bf16.vlgmr.msrb.gmra.mxu2 %v8993_v45  ;;  %v7524_v41 = vor.u32 %v8330_v6, %v7523_v1  ;;  %v8211_v1 = vld [vmem:[#allocation8 + $0x2d4] sm:$0xf0]  ;;  %v8244_v6 = vld [vmem:[#allocation8 + $0x3e4] sm:$0xf] }
 0x1d0   :  { %4493 = vmatpush.bf16.msra.mxu1 %v7572_v28 }
 0x1d1   :  { %4524 = vmatpush.bf16.msra.mxu2 %v6856_v46  ;;  %v6965_v46 = vld [vmem:[#allocation8 + $0x230] sm:$0xf0] }
 0x1d2   :  { %4512 = vmatpush.bf16.msrb.mxu3 %v6712_v39  ;;  %4536 = vmatpush.bf16.msra.mxu0 %v7000_v16  ;;  %v8260_v39 = vld [vmem:[#allocation8 + $0x464] sm:$0xf]  ;;  %v6968_v3 = vor.u32 %v8188_v48, %v6965_v46  ;;  %v8318_v48 = vld [vmem:[#allocation8 + $0x62c] sm:$0xf0] }
 0x1d3   :  { %v7256_v13 = vor.u32 %v8260_v39, %v7253_v43  ;;  %v2905_v63 = vpop.f32.mrf.mxu0  ;;  %v8288_v16 = vld [vmem:[#allocation8 + $0x544] sm:$0xf]  ;;  %v7352_v39 = vor.u32 %v8284_v19, %v7349_v32  ;;  %v7475_v43 = vld [vmem:[#allocation8 + $0x620] sm:$0xf] }
 0x1d4   :  { %4494 = vmatpush.bf16.msra.mxu1 %v7556_v42  ;;  %v7368_v4 = vor.u32 %v8288_v16, %v7365_v17  ;;  %v7476_v49 = vor.u32 %v8318_v48, %v7475_v43  ;;  %v8167_v16 = vld [vmem:[#allocation8 + $0x174] sm:$0xf0]  ;;  %v8340_v17 = vld [vmem:[#allocation8 + $0x6e4] sm:$0xf] }
 0x1d5   :  { %4525 = vmatpush.bf16.msra.mxu2 %v6840_v60  ;;  %v8184_v60 = vld [vmem:[#allocation8 + $0x204] sm:$0xf] }
 0x1d6   :  { %4513 = vmatpush.bf16.msrb.mxu3 %v6696_v59  ;;  %4537 = vmatpush.bf16.msra.mxu0 %v6984_v20  ;;  %v6952_v58 = vor.u32 %v8184_v60, %v6949_v61  ;;  %v8314_v60 = vld [vmem:[#allocation8 + $0x60c] sm:$0xf0] }
 0x1d8   :  { %v2879_v59 = vpop.f32.mrf.mxu3  ;;  %v2892_v62 = vpop.f32.mrf.mxu1  ;;  %4495 = vmatpush.bf16.msra.mxu1 %v7540_v56  ;;  %v8175_v56 = vld [vmem:[#allocation8 + $0x1b4] sm:$0xf0] }
 0x1d9   :  { %4514 = vmatmul.bf16.vlgmr.msrb.gmra.mxu3 %v8963_v5  ;;  %4526 = vmatpush.bf16.msra.mxu2 %v6824_v47  ;;  %v2880_v44 = vadd.f32 %v2879_v59, %v2867_v50  ;;  %v7221_v47 = vld [vmem:[#allocation8 + $0x430] sm:$0xf0]  ;;  %v6924_v50 = vor.u32 %v8179_v55, %v6923_v38  ;;  %v8336_v38 = vld [vmem:[#allocation8 + $0x6c4] sm:$0xf] }
 0x1da   :  { %4558 = vmatpush.bf16.msra.mxu3 %v7320_v35  ;;  %v7237_v35 = vld [vmem:[#allocation8 + $0x450] sm:$0xf0]  ;;  %4538 = vmatpush.bf16.msra.mxu0 %v6968_v3  ;;  %v8280_v3 = vld [vmem:[#allocation8 + $0x504] sm:$0xf] }
 0x1db   :  { %v7240_v7 = vor.u32 %v8256_v54, %v7237_v35  ;;  %v2893_v15 = vadd.f32 %v2892_v62, %v2880_v44  ;;  %v2907_v27 = vpop.f32.mrf.mxu0  ;;  %v6907_v54 = vld [vmem:[#allocation8 + $0x1a8] sm:$0xf]  ;;  %v7459_v35 = vld [vmem:[#allocation8 + $0x600] sm:$0xf]  ;;  %v7189_v44 = vld [vmem:[#allocation8 + $0x3f0] sm:$0xf0] }
 0x1dc   :  { %4496 = vmatpush.bf16.msra.mxu1 %v7524_v41  ;;  %v7192_v57 = vor.u32 %v8244_v6, %v7189_v44  ;;  %v7557_v55 = vld [vmem:[#allocation8 + $0x6d0] sm:$0xf0]  ;;  %v7451_v44 = vld [vmem:[#allocation8 + $0x5e8] sm:$0xf] }
 0x1dd   :  { %4571 = vmatpush.bf16.msrb.mxu2 %v7448_v33  ;;  %v7508_v33 = vor.u32 %v8326_v14, %v7507_v12  ;;  %v2906_v20 = vadd.f32 %v2905_v63, %v2893_v15  ;;  %v7051_v63 = vld [vmem:[#allocation8 + $0x2c8] sm:$0xf]  ;;  %v8207_v14 = vld [vmem:[#allocation8 + $0x2b4] sm:$0xf0] }
 0x1de   :  { %4559 = vmatpush.bf16.msra.mxu3 %v7304_v10  ;;  %v8252_v10 = vld [vmem:[#allocation8 + $0x424] sm:$0xf]  ;;  %4539 = vmatpush.bf16.msra.mxu0 %v6952_v58  ;;  %v7460_v58 = vor.u32 %v8314_v60, %v7459_v35  ;;  %v7052_v41 = vor.u32 %v8211_v1, %v7051_v63  ;;  %v7035_v12 = vld [vmem:[#allocation8 + $0x2a8] sm:$0xf]  ;;  %v7541_v60 = vld [vmem:[#allocation8 + $0x6b0] sm:$0xf0] }
 0x1df   :  { %v2918_v37 = vpop.f32.mrf.mxu2  ;;  %v7224_v18 = vor.u32 %v8252_v10, %v7221_v47  ;;  %4527 = vmatmul.bf16.vlgmr.msra.gmra.mxu2 %v8965_v40  ;;  %v8240_v10 = vld [vmem:[#allocation8 + $0x3c4] sm:$0xf]  ;;  %v7173_v47 = vld [vmem:[#allocation8 + $0x3d0] sm:$0xf0]  ;;  %v8155_v1 = vld [vmem:[#allocation8 + $0x114] sm:$0xf0] }
 0x1e0   :  { %v2881_v53 = vpop.f32.mrf.mxu3  ;;  %v2894_v28 = vpop.f32.mrf.mxu1  ;;  %4497 = vmatpush.bf16.msra.mxu1 %v7508_v33  ;;  %v2919_v46 = vadd.f32 %v2918_v37, %v2906_v20  ;;  %v7176_v15 = vor.u32 %v8240_v10, %v7173_v47  ;;  %v6859_v20 = vld [vmem:[#allocation8 + $0x148] sm:$0xf]  ;;  %v7109_v10 = vld [vmem:[#allocation8 + $0x350] sm:$0xf0] }
 0x1e1   :  { %4572 = vmatpush.bf16.msrb.mxu2 %v7432_v31 }
 0x1e2   :  { %4560 = vmatpush.bf16.msra.mxu3 %v7288_v23  ;;  %v7205_v23 = vld [vmem:[#allocation8 + $0x410] sm:$0xf0] }
 0x1e3   :  { %v7208_v31 = vor.u32 %v8248_v30, %v7205_v23  ;;  %v7036_v30 = vor.u32 %v8207_v14, %v7035_v12  ;;  %v7573_v23 = vld [vmem:[#allocation8 + $0x6f0] sm:$0xf0] }
 0x1e4   :  { %4498 = vmatpush.bf16.msra.mxu1 %v7492_v29  ;;  %v7576_v29 = vor.u32 %v8340_v17, %v7573_v23  ;;  %v7525_v12 = vld [vmem:[#allocation8 + $0x690] sm:$0xf0]  ;;  %v8442_v17 = vld [vmem:[#allocation7] sm:$0xff] }
 0x1e5   :  { %4573 = vmatpush.bf16.msrb.mxu2 %v7416_v22  ;;  %v7333_v22 = vld [vmem:[#allocation8 + $0x510] sm:$0xf0]  ;;  %v8307_v23 = vld [vmem:[#allocation8 + $0x5d4] sm:$0xf0] }
 0x1e6   :  { %4561 = vmatpush.bf16.msra.mxu3 %v7272_v34  ;;  %v6940_v34 = vor.u32 %v8183_v26, %v6939_v25  ;;  %v7336_v59 = vor.u32 %v8280_v3, %v7333_v22  ;;  %v8236_v25 = vld [vmem:[#allocation8 + $0x3a4] sm:$0xf]  ;;  %v7157_v26 = vld [vmem:[#allocation8 + $0x3b0] sm:$0xf0]  ;;  %v8199_v3 = vld [vmem:[#allocation8 + $0x274] sm:$0xf0] }
 0x1e7   :  { %v2920_v42 = vpop.f32.mrf.mxu2  ;;  %v7160_v21 = vor.u32 %v8236_v25, %v7157_v26  ;;  %v7141_v22 = vld [vmem:[#allocation8 + $0x390] sm:$0xf0] }
 0x1e8   :  { %v2931_v51 = vpop.f32.mrf.mxu3  ;;  %4499 = vmatpush.bf16.msra.mxu1 %v7476_v49  ;;  %v6843_v49 = vld [vmem:[#allocation8 + $0x128] sm:$0xf] }
 0x1e9   :  { %4574 = vmatpush.bf16.msrb.mxu2 %v7400_v0  ;;  %v2932_v24 = vadd.f32 %v2931_v51, %v2919_v46  ;;  %v6908_v0 = vor.u32 %v8175_v56, %v6907_v54  ;;  %v7003_v46 = vld [vmem:[#allocation8 + $0x268] sm:$0xf]  ;;  %v8159_v51 = vld [vmem:[#allocation8 + $0x134] sm:$0xf0]  ;;  %v8332_v54 = vld [vmem:[#allocation8 + $0x6a4] sm:$0xf] }
 0x1ea   :  { %4562 = vmatpush.bf16.msra.mxu3 %v7256_v13  ;;  %v7067_v13 = vld [vmem:[#allocation8 + $0x2e8] sm:$0xf]  ;;  %v8228_v56 = vld [vmem:[#allocation8 + $0x364] sm:$0xf]  ;;  %v6844_v35 = vor.u32 %v8159_v51, %v6843_v49  ;;  %v7077_v49 = vld [vmem:[#allocation8 + $0x310] sm:$0xf0] }
 0x1eb   :  { %v3031_v61 = vmul.f32 0.5, %v2932_v24  ;;  %v7068_v62 = vor.u32 %v8215_v52, %v7067_v13  ;;  %v7560_v52 = vor.u32 %v8336_v38, %v7557_v55  ;;  %v7004_v24 = vor.u32 %v8199_v3, %v7003_v46  ;;  %v7579_v38 = vld [vmem:[#allocation8 + $0x6e8] sm:$0xf]  ;;  %v8303_v46 = vld [vmem:[#allocation8 + $0x5b4] sm:$0xf0] }
 0x1ec   :  { %4500 = vmatpush.bf16.msra.mxu1 %v7460_v58 }
 0x1ed   :  { %4575 = vmatpush.bf16.msrb.mxu2 %v7384_v11  ;;  %8423 = vtanh.f32 %v3031_v61  ;;  %v6987_v61 = vld [vmem:[#allocation8 + $0x248] sm:$0xf] }
 0x1ee   :  { %4563 = vmatpush.bf16.msra.mxu3 %v7240_v7  ;;  %v6891_v7 = vld [vmem:[#allocation8 + $0x188] sm:$0xf] }
 0x1ef   :  { %v6892_v37 = vor.u32 %v8171_v8, %v6891_v7  ;;  %v8311_v7 = vld [vmem:[#allocation8 + $0x5f4] sm:$0xf0]  ;;  %v7544_v8 = vor.u32 %v8332_v54, %v7541_v60 }
 0x1f0   :  { %4545 = vmatpush.bf16.msrb.mxu1 %v7192_v57  ;;  %v2933_v11 = vpop.f32.mrf.mxu3  ;;  %v8299_v60 = vld [vmem:[#allocation8 + $0x594] sm:$0xf0] }
 0x1f1   :  { %4576 = vmatpush.bf16.msrb.mxu2 %v7368_v4  ;;  %v7019_v4 = vld [vmem:[#allocation8 + $0x288] sm:$0xf]  ;;  %v8328_v11 = vld [vmem:[#allocation8 + $0x684] sm:$0xf] }
 0x1f2   :  { %4564 = vmatpush.bf16.msra.mxu3 %v7224_v18  ;;  %v6875_v18 = vld [vmem:[#allocation8 + $0x168] sm:$0xf]  ;;  %v7528_v26 = vor.u32 %v8328_v11, %v7525_v12 }
 0x1f3   :  { %v8424_v33 = vpop.eup %8423  ;;  %v9000_v53 = vpop.f32.mrf.mxu0  ;;  %v6876_v28 = vor.u32 %v8167_v16, %v6875_v18  ;;  %v6971_v18 = vld [vmem:[#allocation8 + $0x228] sm:$0xf]  ;;  %v8191_v16 = vld [vmem:[#allocation8 + $0x234] sm:$0xf0] }
 0x1f4   :  { %4546 = vmatpush.bf16.msrb.mxu1 %v7176_v15  ;;  %v3045_v27 = vmul.f32 0.5, %v8424_v33  ;;  %v7452_v15 = vor.u32 %v8311_v7, %v7451_v44  ;;  %v613_v33 = vperm.slane %v8442_v17, 6  ;;  %v7547_v44 = vld [vmem:[#allocation8 + $0x6a8] sm:$0xf]  ;;  %v8291_v17 = vld [vmem:[#allocation8 + $0x554] sm:$0xf0] }
 0x1f5   :  { %4577 = vmatpush.bf16.msrb.mxu2 %v7352_v39  ;;  %v8232_v39 = vld [vmem:[#allocation8 + $0x384] sm:$0xf]  ;;  %v7195_v12 = vld [vmem:[#allocation8 + $0x3e8] sm:$0xf] }
 0x1f6   :  { %4565 = vmatpush.bf16.msra.mxu3 %v7208_v31  ;;  %v8163_v31 = vld [vmem:[#allocation8 + $0x154] sm:$0xf0]  ;;  %v3052_v19 = vadd.f32 0.5, %v3045_v27  ;;  %v8220_v27 = vld [vmem:[#allocation8 + $0x324] sm:$0xf] }
 0x1f7   :  { %v6860_v43 = vor.u32 %v8163_v31, %v6859_v20 }
 0x1f8   :  { %v9002_v32 = vpop.f32.mrf.mxu1  ;;  %4547 = vmatpush.bf16.msrb.mxu1 %v7160_v21  ;;  %v9004_v42 = vpack.c.bf16 %v3052_v19, %v3052_v19  ;;  %v7509_v21 = vld [vmem:[#allocation8 + $0x670] sm:$0xf0] }
 0x1f9   :  { %4566 = vmatmul.bf16.vlgmr.msra.gmra.mxu3 %v8993_v45  ;;  %4578 = vmatpush.bf16.msrb.mxu2 %v7336_v59  ;;  %v7125_v59 = vld [vmem:[#allocation8 + $0x370] sm:$0xf0]  ;;  %v2945_v55 = vadd.f32 %v9002_v32, %v613_v33 }
 0x1fa   :  { %4610 = vmatpush.bf16.msrb.mxu3 %v6940_v34  ;;  %v7020_v34 = vor.u32 %v8203_v9, %v7019_v4  ;;  %4488 = vmatmul.bf16.vlgmr.msrb.gmra.mxu0 %v9004_v42  ;;  %v7128_v58 = vor.u32 %v8228_v56, %v7125_v59  ;;  %v6972_v4 = vor.u32 %v8191_v16, %v6971_v18  ;;  %v8324_v9 = vld [vmem:[#allocation8 + $0x664] sm:$0xf]  ;;  %v7563_v56 = vld [vmem:[#allocation8 + $0x6c8] sm:$0xf]  ;;  %v8339_v59 = vld [vmem:[#allocation8 + $0x6d4] sm:$0xf0] }
 0x1fb   :  { %v2972_v13 = vpop.f32.mrf.mxu0  ;;  %4584 = vmatpush.bf16.msrb.mxu0 %v7576_v29  ;;  %v6955_v29 = vld [vmem:[#allocation8 + $0x208] sm:$0xf]  ;;  %v7512_v3 = vor.u32 %v8324_v9, %v7509_v21  ;;  %v8331_v16 = vld [vmem:[#allocation8 + $0x694] sm:$0xf0] }
 0x1fc   :  { %v9006_v48 = vpop.f32.mrf.mxu3  ;;  %4579 = vmatmul.bf16.vlgmr.msrb.gmra.mxu2 %v9004_v42  ;;  %v7493_v13 = vld [vmem:[#allocation8 + $0x650] sm:$0xf0]  ;;  %v7179_v21 = vld [vmem:[#allocation8 + $0x3c8] sm:$0xf] }
 0x1fd   :  { %4623 = vmatpush.bf16.msra.mxu2 %v7068_v62  ;;  %v8195_v62 = vld [vmem:[#allocation8 + $0x254] sm:$0xf0]  ;;  %v2958_v32 = vadd.f32 %v9006_v48, %v2945_v55 }
 0x1fe   :  { %4611 = vmatpush.bf16.msrb.mxu3 %v6924_v50  ;;  %v7144_v50 = vor.u32 %v8232_v39, %v7141_v22  ;;  %v6988_v57 = vor.u32 %v8195_v62, %v6987_v61  ;;  %v8343_v39 = vld [vmem:[#allocation8 + $0x6f4] sm:$0xf0]  ;;  %v8216_v22 = vld [vmem:[#allocation8 + $0x304] sm:$0xf] }
 0x1ff   :  { %v9010_v63 = vpop.f32.mrf.mxu2  ;;  %4585 = vmatpush.bf16.msrb.mxu0 %v7560_v52  ;;  %v7080_v52 = vor.u32 %v8216_v22, %v7077_v49  ;;  %v2971_v7 = vadd.f32 %v9000_v53, %v2958_v32  ;;  %v8335_v48 = vld [vmem:[#allocation8 + $0x6b4] sm:$0xf0]  ;;  %v7371_v53 = vld [vmem:[#allocation8 + $0x548] sm:$0xf] }
 0x200   :  { %4548 = vmatpush.bf16.msrb.mxu1 %v7144_v50  ;;  %v2946_v6 = vpop.f32.mrf.mxu1  ;;  %v8320_v50 = vld [vmem:[#allocation8 + $0x644] sm:$0xf]  ;;  %v7372_v9 = vor.u32 %v8291_v17, %v7371_v53  ;;  %v7163_v22 = vld [vmem:[#allocation8 + $0x3a8] sm:$0xf]  ;;  %v8239_v49 = vld [vmem:[#allocation8 + $0x3b4] sm:$0xf0] }
 0x201   :  { %4624 = vmatpush.bf16.msra.mxu2 %v7052_v41  ;;  %v8224_v41 = vld [vmem:[#allocation8 + $0x344] sm:$0xf]  ;;  %v7496_v62 = vor.u32 %v8320_v50, %v7493_v13  ;;  %v2984_v18 = vadd.f32 %v9010_v63, %v2971_v7  ;;  %v8327_v63 = vld [vmem:[#allocation8 + $0x674] sm:$0xf0]  ;;  %v7483_v7 = vld [vmem:[#allocation8 + $0x628] sm:$0xf] }
 0x202   :  { %4612 = vmatpush.bf16.msrb.mxu3 %v6908_v0  ;;  %v6827_v0 = vld [vmem:[#allocation8 + $0x108] sm:$0xf]  ;;  %v7112_v14 = vor.u32 %v8224_v41, %v7109_v10  ;;  %v8312_v10 = vld [vmem:[#allocation8 + $0x604] sm:$0xf]  ;;  %v8323_v13 = vld [vmem:[#allocation8 + $0x654] sm:$0xf0] }
 0x203   :  { %v6828_v47 = vor.u32 %v8155_v1, %v6827_v0  ;;  %v9012_v25 = vpop.f32.mrf.mxu0  ;;  %4586 = vmatpush.bf16.msrb.mxu0 %v7544_v8  ;;  %v7477_v0 = vld [vmem:[#allocation8 + $0x630] sm:$0xf0]  ;;  %v7564_v1 = vor.u32 %v8339_v59, %v7563_v56  ;;  %v7387_v8 = vld [vmem:[#allocation8 + $0x568] sm:$0xf]  ;;  %v8213_v59 = vld [vmem:[#allocation8 + $0x2ec] sm:$0xf] }
 0x204   :  { %4549 = vmatpush.bf16.msrb.mxu1 %v7128_v58  ;;  %v8316_v58 = vld [vmem:[#allocation8 + $0x624] sm:$0xf]  ;;  %v7197_v53 = vld [vmem:[#allocation8 + $0x3f8] sm:$0xf0] }
 0x205   :  { %4625 = vmatpush.bf16.msra.mxu2 %v7036_v30  ;;  %v7435_v30 = vld [vmem:[#allocation8 + $0x5c8] sm:$0xf]  ;;  %v7480_v41 = vor.u32 %v8316_v58, %v7477_v0  ;;  %v8235_v0 = vld [vmem:[#allocation8 + $0x394] sm:$0xf0] }
 0x206   :  { %4613 = vmatpush.bf16.msrb.mxu3 %v6892_v37  ;;  %v2959_v37 = vpop.f32.mrf.mxu3  ;;  %v7436_v19 = vor.u32 %v8307_v23, %v7435_v30  ;;  %v7147_v58 = vld [vmem:[#allocation8 + $0x388] sm:$0xf] }
 0x207   :  { %v2985_v20 = vpop.f32.mrf.mxu2  ;;  %4587 = vmatpush.bf16.msrb.mxu0 %v7528_v26  ;;  %v7548_v37 = vor.u32 %v8335_v48, %v7547_v44  ;;  %v8319_v48 = vld [vmem:[#allocation8 + $0x634] sm:$0xf0] }
 0x208   :  { %4550 = vmatpush.bf16.msrb.mxu1 %v7112_v14  ;;  %v8247_v14 = vld [vmem:[#allocation8 + $0x3f4] sm:$0xf0] }
 0x209   :  { %4626 = vmatpush.bf16.msra.mxu2 %v7020_v34  ;;  %v8187_v34 = vld [vmem:[#allocation8 + $0x214] sm:$0xf0] }
 0x20a   :  { %4614 = vmatpush.bf16.msrb.mxu3 %v6876_v28  ;;  %v7093_v28 = vld [vmem:[#allocation8 + $0x330] sm:$0xf0]  ;;  %v6956_v51 = vor.u32 %v8187_v34, %v6955_v29  ;;  %4540 = vmatmul.bf16.vlgmr.msra.gmra.mxu0 %v8982_v2  ;;  %v8243_v20 = vld [vmem:[#allocation8 + $0x3d4] sm:$0xf0]  ;;  %v7355_v29 = vld [vmem:[#allocation8 + $0x528] sm:$0xf] }
 0x20b   :  { %v7096_v31 = vor.u32 %v8220_v27, %v7093_v28  ;;  %v3024_v61 = vpop.f32.mrf.mxu0  ;;  %4588 = vmatpush.bf16.msrb.mxu0 %v7512_v3  ;;  %v7196_v27 = vor.u32 %v8247_v14, %v7195_v12  ;;  %v9021_v28 = vld [vmem:[#allocation10] sm:$0xf]  ;;  %v8287_v34 = vld [vmem:[#allocation8 + $0x534] sm:$0xf0]  ;;  %v7467_v14 = vld [vmem:[#allocation8 + $0x608] sm:$0xf] }
 0x20c   :  { %v3287_v55 = vperm.slane %v9021_v28, 0  ;;  %v7356_v3 = vor.u32 %v8287_v34, %v7355_v29  ;;  %v7164_v61 = vor.u32 %v8239_v49, %v7163_v22  ;;  %v7181_v29 = vld [vmem:[#allocation8 + $0x3d8] sm:$0xf0]  ;;  %v7099_v49 = vld [vmem:[#allocation8 + $0x328] sm:$0xf] }
 0x20d   :  { %4627 = vmatpush.bf16.msra.mxu2 %v7004_v24  ;;  %4551 = vmatpush.bf16.msrb.mxu1 %v7096_v31  ;;  %v7580_v24 = vor.u32 %v8343_v39, %v7579_v38  ;;  %v7515_v31 = vld [vmem:[#allocation8 + $0x668] sm:$0xf]  ;;  %v7180_v39 = vor.u32 %v8243_v20, %v7179_v21 }
 0x20e   :  { %4615 = vmatpush.bf16.msrb.mxu3 %v6860_v43  ;;  %v7419_v43 = vld [vmem:[#allocation8 + $0x5a8] sm:$0xf] }
 0x20f   :  { %v7420_v54 = vor.u32 %v8303_v46, %v7419_v43  ;;  %4589 = vmatpush.bf16.msrb.mxu0 %v7496_v62  ;;  %v7516_v46 = vor.u32 %v8327_v63, %v7515_v31  ;;  %v7115_v20 = vld [vmem:[#allocation8 + $0x348] sm:$0xf]  ;;  %v8227_v31 = vld [vmem:[#allocation8 + $0x354] sm:$0xf0]  ;;  %v8241_v63 = vld [vmem:[#allocation8 + $0x3cc] sm:$0xf] }
 0x210   :  { %v7184_v22 = vor.u32 %v8241_v63, %v7181_v29 }
 0x211   :  { %4628 = vmatpush.bf16.msra.mxu2 %v6988_v57  ;;  %4552 = vmatpush.bf16.msrb.mxu1 %v7080_v52  ;;  %v8295_v57 = vld [vmem:[#allocation8 + $0x574] sm:$0xf0]  ;;  %v7339_v52 = vld [vmem:[#allocation8 + $0x508] sm:$0xf] }
 0x212   :  { %4616 = vmatpush.bf16.msrb.mxu3 %v6844_v35  ;;  %v7403_v35 = vld [vmem:[#allocation8 + $0x588] sm:$0xf]  ;;  %v7388_v11 = vor.u32 %v8295_v57, %v7387_v8  ;;  %v8209_v8 = vld [vmem:[#allocation8 + $0x2cc] sm:$0xf]  ;;  %v7053_v57 = vld [vmem:[#allocation8 + $0x2d8] sm:$0xf0] }
 0x213   :  { %v7404_v6 = vor.u32 %v8299_v60, %v7403_v35  ;;  %4590 = vmatpush.bf16.msrb.mxu0 %v7480_v41  ;;  %v7069_v35 = vld [vmem:[#allocation8 + $0x2f8] sm:$0xf0]  ;;  %v7148_v41 = vor.u32 %v8235_v0, %v7147_v58  ;;  %v7056_v12 = vor.u32 %v8209_v8, %v7053_v57  ;;  %v8139_v8 = vld [vmem:[#allocation8 + $0x94] sm:$0xf0] }
 0x214   :  { %v7072_v44 = vor.u32 %v8213_v59, %v7069_v35  ;;  %v8197_v59 = vld [vmem:[#allocation8 + $0x26c] sm:$0xf]  ;;  %v7005_v35 = vld [vmem:[#allocation8 + $0x278] sm:$0xf0] }
 0x215   :  { %4629 = vmatpush.bf16.msra.mxu2 %v6972_v4  ;;  %v6813_v0 = vld [vmem:[#allocation8 + $0xf8] sm:$0xf0] }
 0x216   :  { %4617 = vmatpush.bf16.msrb.mxu3 %v6828_v47  ;;  %v7461_v47 = vld [vmem:[#allocation8 + $0x610] sm:$0xf0] }
 0x217   :  { %v7464_v30 = vor.u32 %v8312_v10, %v7461_v47  ;;  %v4437_v26 = vpop.f32.mrf.mxu0  ;;  %v7484_v10 = vor.u32 %v8319_v48, %v7483_v7  ;;  %v7131_v47 = vld [vmem:[#allocation8 + $0x368] sm:$0xf]  ;;  %v7008_v7 = vor.u32 %v8197_v59, %v7005_v35 }
 0x218   :  { %v2996_v33 = vpop.f32.mrf.mxu1  ;;  %v6763_v48 = vld [vmem:[#allocation8 + $0x88] sm:$0xf] }
 0x219   :  { %4618 = vmatmul.bf16.vlgmr.msrb.gmra.mxu3 %v8965_v40  ;;  %4630 = vmatpush.bf16.msra.mxu2 %v6956_v51  ;;  %v2997_v23 = vadd.f32 %v2996_v33, %v2984_v18  ;;  %v7499_v51 = vld [vmem:[#allocation8 + $0x648] sm:$0xf] }
 0x21a   :  { %4662 = vmatpush.bf16.msra.mxu3 %v7452_v15  ;;  %v7531_v15 = vld [vmem:[#allocation8 + $0x688] sm:$0xf]  ;;  %4591 = vmatpush.bf16.msrb.mxu0 %v7464_v30 }
 0x21b   :  { %v7532_v4 = vor.u32 %v8331_v16, %v7531_v15  ;;  %v8315_v15 = vld [vmem:[#allocation8 + $0x614] sm:$0xf0]  ;;  %v8245_v16 = vld [vmem:[#allocation8 + $0x3ec] sm:$0xf]  ;;  %v6811_v30 = vld [vmem:[#allocation8 + $0xe8] sm:$0xf] }
 0x21c   :  { %4631 = vmatmul.bf16.vlgmr.msra.gmra.mxu2 %v8982_v2  ;;  %v7200_v21 = vor.u32 %v8245_v16, %v7197_v53  ;;  %v6797_v16 = vld [vmem:[#allocation8 + $0xd8] sm:$0xf0]  ;;  %v8229_v53 = vld [vmem:[#allocation8 + $0x36c] sm:$0xf]  ;;  %v6715_v35 = vld [vmem:[#allocation8 + $0x28] sm:$0xf] }
 0x21d   :  { %4675 = vmatpush.bf16.msrb.mxu2 %v7580_v24  ;;  %v8283_v24 = vld [vmem:[#allocation8 + $0x514] sm:$0xf0] }
 0x21e   :  { %4663 = vmatpush.bf16.msra.mxu3 %v7436_v19  ;;  %v3009_v19 = vpop.f32.mrf.mxu3  ;;  %4636 = vmatpush.bf16.msra.mxu0 %v7196_v27  ;;  %v7340_v62 = vor.u32 %v8283_v24, %v7339_v52  ;;  %v8205_v27 = vld [vmem:[#allocation8 + $0x2ac] sm:$0xf]  ;;  %v7165_v52 = vld [vmem:[#allocation8 + $0x3b8] sm:$0xf0] }
 0x21f   :  { %v3010_v38 = vadd.f32 %v3009_v19, %v2997_v23  ;;  %v4424_v50 = vpop.f32.mrf.mxu2  ;;  %v4439_v60 = vpop.f32.mrf.mxu0  ;;  %v8151_v23 = vld [vmem:[#allocation8 + $0xf4] sm:$0xf0] }
 0x220   :  { %v4425_v56 = vadd.f32 %v4424_v50, %v3287_v55  ;;  %v2998_v32 = vpop.f32.mrf.mxu1  ;;  %v6812_v19 = vor.u32 %v8151_v23, %v6811_v30  ;;  %v6795_v55 = vld [vmem:[#allocation8 + $0xc8] sm:$0xf] }
 0x221   :  { %4676 = vmatpush.bf16.msrb.mxu2 %v7564_v1  ;;  %v3023_v43 = vadd.f32 %v9012_v25, %v3010_v38  ;;  %v7500_v25 = vor.u32 %v8323_v13, %v7499_v51  ;;  %v8223_v51 = vld [vmem:[#allocation8 + $0x334] sm:$0xf0]  ;;  %v8237_v13 = vld [vmem:[#allocation8 + $0x3ac] sm:$0xf]  ;;  %v6747_v23 = vld [vmem:[#allocation8 + $0x68] sm:$0xf] }
 0x222   :  { %4664 = vmatpush.bf16.msra.mxu3 %v7420_v54  ;;  %4637 = vmatpush.bf16.msra.mxu0 %v7180_v39  ;;  %v9025_v1 = vadd.f32 %v4437_v26, %v4425_v56  ;;  %v7468_v26 = vor.u32 %v8315_v15, %v7467_v14  ;;  %v8147_v39 = vld [vmem:[#allocation8 + $0xd4] sm:$0xf0]  ;;  %v7100_v32 = vor.u32 %v8223_v51, %v7099_v49  ;;  %v8145_v14 = vld [vmem:[#allocation8 + $0xcc] sm:$0xf]  ;;  %v7581_v51 = vld [vmem:[#allocation8 + $0x6f8] sm:$0xf0] }
 0x223   :  { %v3032_v54 = vmul.f32 0.5, %v3023_v43  ;;  %v7116_v43 = vor.u32 %v8227_v31, %v7115_v20  ;;  %v6796_v50 = vor.u32 %v8147_v39, %v6795_v55  ;;  %v8143_v56 = vld [vmem:[#allocation8 + $0xb4] sm:$0xf0]  ;;  %v7168_v60 = vor.u32 %v8237_v13, %v7165_v52  ;;  %v6781_v20 = vld [vmem:[#allocation8 + $0xb8] sm:$0xf0] }
 0x224   :  { %v8225_v31 = vld [vmem:[#allocation8 + $0x34c] sm:$0xf]  ;;  %v8131_v39 = vld [vmem:[#allocation8 + $0x54] sm:$0xf0]  ;;  %v6765_v52 = vld [vmem:[#allocation8 + $0x98] sm:$0xf0] }
 0x225   :  { %4677 = vmatpush.bf16.msrb.mxu2 %v7548_v37  ;;  %8425 = vtanh.f32 %v3032_v54  ;;  %v8231_v37 = vld [vmem:[#allocation8 + $0x374] sm:$0xf0]  ;;  %v6779_v54 = vld [vmem:[#allocation8 + $0xa8] sm:$0xf]  ;;  %v8341_v49 = vld [vmem:[#allocation8 + $0x6ec] sm:$0xf] }
 0x226   :  { %4665 = vmatpush.bf16.msra.mxu3 %v7404_v6  ;;  %v3011_v6 = vpop.f32.mrf.mxu3  ;;  %4638 = vmatpush.bf16.msra.mxu0 %v7164_v61  ;;  %v7132_v33 = vor.u32 %v8231_v37, %v7131_v47  ;;  %v7083_v61 = vld [vmem:[#allocation8 + $0x308] sm:$0xf]  ;;  %v6780_v58 = vor.u32 %v8143_v56, %v6779_v54  ;;  %v6989_v47 = vld [vmem:[#allocation8 + $0x258] sm:$0xf0]  ;;  %v7584_v59 = vor.u32 %v8341_v49, %v7581_v51  ;;  %v8267_v51 = vld [vmem:[#allocation8 + $0x494] sm:$0xf0] }
 0x227   :  { %v8233_v6 = vld [vmem:[#allocation8 + $0x38c] sm:$0xf]  ;;  %v7101_v54 = vld [vmem:[#allocation8 + $0x338] sm:$0xf0] }
 0x229   :  { %4678 = vmatpush.bf16.msrb.mxu2 %v7532_v4  ;;  %v7037_v4 = vld [vmem:[#allocation8 + $0x2b8] sm:$0xf0] }
 0x22a   :  { %4666 = vmatpush.bf16.msra.mxu3 %v7388_v11  ;;  %v4426_v11 = vpop.f32.mrf.mxu2  ;;  %4639 = vmatpush.bf16.msra.mxu0 %v7148_v41  ;;  %v7040_v38 = vor.u32 %v8205_v27, %v7037_v4  ;;  %v8189_v27 = vld [vmem:[#allocation8 + $0x22c] sm:$0xf]  ;;  %v6973_v4 = vld [vmem:[#allocation8 + $0x238] sm:$0xf0] }
 0x22b   :  { %v8426_v18 = vpop.eup %8425  ;;  %v6976_v29 = vor.u32 %v8189_v27, %v6973_v4  ;;  %v8329_v27 = vld [vmem:[#allocation8 + $0x68c] sm:$0xf]  ;;  %v7533_v4 = vld [vmem:[#allocation8 + $0x698] sm:$0xf0] }
 0x22c   :  { %v3046_v17 = vmul.f32 0.5, %v8426_v18  ;;  %v6764_v18 = vor.u32 %v8139_v8, %v6763_v48 }
 0x22d   :  { %4679 = vmatpush.bf16.msrb.mxu2 %v7516_v46  ;;  %v8201_v46 = vld [vmem:[#allocation8 + $0x28c] sm:$0xf] }
 0x22e   :  { %4667 = vmatpush.bf16.msra.mxu3 %v7372_v9  ;;  %v3053_v9 = vadd.f32 0.5, %v3046_v17  ;;  %4640 = vmatpush.bf16.msra.mxu0 %v7132_v33  ;;  %v7133_v17 = vld [vmem:[#allocation8 + $0x378] sm:$0xf0] }
 0x230   :  { %v9028_v34 = vpack.c.bf16 %v3053_v9, %v3053_v9  ;;  %v7136_v9 = vor.u32 %v8229_v53, %v7133_v17 }
 0x231   :  { %4680 = vmatpush.bf16.msrb.mxu2 %v7500_v25  ;;  %v8219_v25 = vld [vmem:[#allocation8 + $0x314] sm:$0xf0] }
 0x232   :  { %4668 = vmatpush.bf16.msra.mxu3 %v7356_v3  ;;  %v7021_v3 = vld [vmem:[#allocation8 + $0x298] sm:$0xf0]  ;;  %4501 = vmatmul.bf16.vlgmr.msra.gmra.mxu1 %v9028_v34  ;;  %v7084_v41 = vor.u32 %v8219_v25, %v7083_v61 }
 0x233   :  { %4592 = vmatmul.bf16.vlgmr.msrb.gmra.mxu0 %v9028_v34  ;;  %4597 = vmatpush.bf16.msra.mxu1 %v6812_v19  ;;  %v7024_v24 = vor.u32 %v8201_v46, %v7021_v3  ;;  %v7117_v19 = vld [vmem:[#allocation8 + $0x358] sm:$0xf0] }
 0x234   :  { %4641 = vmatpush.bf16.msra.mxu0 %v7116_v43  ;;  %v8185_v43 = vld [vmem:[#allocation8 + $0x20c] sm:$0xf]  ;;  %v6957_v46 = vld [vmem:[#allocation8 + $0x218] sm:$0xf0] }
 0x235   :  { %4681 = vmatpush.bf16.msrb.mxu2 %v7484_v10  ;;  %v8193_v10 = vld [vmem:[#allocation8 + $0x24c] sm:$0xf] }
 0x236   :  { %4669 = vmatpush.bf16.msra.mxu3 %v7340_v62  ;;  %v8149_v62 = vld [vmem:[#allocation8 + $0xec] sm:$0xf]  ;;  %v6992_v30 = vor.u32 %v8193_v10, %v6989_v47  ;;  %v7323_v10 = vld [vmem:[#allocation8 + $0x4e8] sm:$0xf] }
 0x237   :  { %4598 = vmatpush.bf16.msra.mxu1 %v6796_v50  ;;  %v6816_v11 = vor.u32 %v8149_v62, %v6813_v0  ;;  %v8137_v50 = vld [vmem:[#allocation8 + $0x8c] sm:$0xf] }
 0x238   :  { %v4450_v57 = vpop.f32.mrf.mxu1  ;;  %4642 = vmatpush.bf16.msra.mxu0 %v7100_v32  ;;  %v6960_v32 = vor.u32 %v8185_v43, %v6957_v46  ;;  %v6768_v61 = vor.u32 %v8137_v50, %v6765_v52  ;;  %v8337_v62 = vld [vmem:[#allocation8 + $0x6cc] sm:$0xf]  ;;  %v7325_v43 = vld [vmem:[#allocation8 + $0x4f8] sm:$0xf0] }
 0x239   :  { %4670 = vmatmul.bf16.vlgmr.msra.gmra.mxu3 %v9004_v42  ;;  %4682 = vmatpush.bf16.msrb.mxu2 %v7468_v26  ;;  %v4451_v37 = vadd.f32 %v4450_v57, %v9025_v1  ;;  %v8135_v26 = vld [vmem:[#allocation8 + $0x74] sm:$0xf0]  ;;  %v6800_v1 = vor.u32 %v8145_v14, %v6797_v16  ;;  %v8133_v0 = vld [vmem:[#allocation8 + $0x6c] sm:$0xf]  ;;  %v6699_v57 = vld [vmem:[#allocation8 + $0x8] sm:$0xf] }
 0x23a   :  { %4714 = vmatpush.bf16.msrb.mxu3 %v7072_v44  ;;  %v7149_v44 = vld [vmem:[#allocation8 + $0x398] sm:$0xf0]  ;;  %v6748_v63 = vor.u32 %v8135_v26, %v6747_v23  ;;  %v8275_v26 = vld [vmem:[#allocation8 + $0x4d4] sm:$0xf0] }
 0x23b   :  { %4599 = vmatpush.bf16.msra.mxu1 %v6780_v58  ;;  %v7565_v58 = vld [vmem:[#allocation8 + $0x6d8] sm:$0xf0] }
 0x23c   :  { %4683 = vmatmul.bf16.vlgmr.msrb.gmra.mxu2 %v9028_v34  ;;  %v4463_v15 = vpop.f32.mrf.mxu3  ;;  %4643 = vmatpush.bf16.msra.mxu0 %v7084_v41  ;;  %v7568_v8 = vor.u32 %v8337_v62, %v7565_v58  ;;  %v8123_v41 = vld [vmem:[#allocation8 + $0x14] sm:$0xf0]  ;;  %v7549_v14 = vld [vmem:[#allocation8 + $0x6b8] sm:$0xf0]  ;;  %v8269_v58 = vld [vmem:[#allocation8 + $0x4ac] sm:$0xf] }
 0x23d   :  { %4727 = vmatpush.bf16.msra.mxu2 %v7200_v21  ;;  %v9034_v33 = vadd.f32 %v4463_v15, %v4451_v37  ;;  %v8141_v21 = vld [vmem:[#allocation8 + $0xac] sm:$0xf]  ;;  %v6700_v16 = vor.u32 %v8123_v41, %v6699_v57  ;;  %v7501_v50 = vld [vmem:[#allocation8 + $0x658] sm:$0xf0] }
 0x23e   :  { %4715 = vmatpush.bf16.msrb.mxu3 %v7056_v12  ;;  %v7152_v12 = vor.u32 %v8233_v6, %v7149_v44  ;;  %v6784_v3 = vor.u32 %v8141_v21, %v6781_v20  ;;  %v6749_v6 = vld [vmem:[#allocation8 + $0x78] sm:$0xf0]  ;;  %v8217_v44 = vld [vmem:[#allocation8 + $0x30c] sm:$0xf]  ;;  %v7536_v21 = vor.u32 %v8329_v27, %v7533_v4  ;;  %v7291_v20 = vld [vmem:[#allocation8 + $0x4a8] sm:$0xf] }
 0x23f   :  { %4600 = vmatpush.bf16.msra.mxu1 %v6764_v18  ;;  %v6752_v47 = vor.u32 %v8133_v0, %v6749_v6  ;;  %v8129_v15 = vld [vmem:[#allocation8 + $0x4c] sm:$0xf]  ;;  %v6733_v18 = vld [vmem:[#allocation8 + $0x58] sm:$0xf0] }
 0x240   :  { %4688 = vmatpush.bf16.msrb.mxu0 %v6816_v11  ;;  %v4452_v55 = vpop.f32.mrf.mxu1  ;;  %v8279_v11 = vld [vmem:[#allocation8 + $0x4f4] sm:$0xf0]  ;;  %v6736_v23 = vor.u32 %v8129_v15, %v6733_v18  ;;  %v7293_v0 = vld [vmem:[#allocation8 + $0x4b8] sm:$0xf0]  ;;  %v8313_v57 = vld [vmem:[#allocation8 + $0x60c] sm:$0xf] }
 0x241   :  { %4728 = vmatpush.bf16.msra.mxu2 %v7184_v22  ;;  %v7120_v22 = vor.u32 %v8225_v31, %v7117_v19  ;;  %v7324_v53 = vor.u32 %v8279_v11, %v7323_v10  ;;  %v8271_v19 = vld [vmem:[#allocation8 + $0x4b4] sm:$0xf0]  ;;  %v6701_v55 = vld [vmem:[#allocation8 + $0x18] sm:$0xf0]  ;;  %v7296_v10 = vor.u32 %v8269_v58, %v7293_v0  ;;  %v7227_v15 = vld [vmem:[#allocation8 + $0x428] sm:$0xf] }
 0x242   :  { %4716 = vmatpush.bf16.msrb.mxu3 %v7040_v38  ;;  %v6731_v38 = vld [vmem:[#allocation8 + $0x48] sm:$0xf]  ;;  %4553 = vmatmul.bf16.vlgmr.msrb.gmra.mxu1 %v8978_v36  ;;  %v7292_v46 = vor.u32 %v8271_v19, %v7291_v20  ;;  %v7469_v41 = vld [vmem:[#allocation8 + $0x618] sm:$0xf0]  ;;  %v8181_v4 = vld [vmem:[#allocation8 + $0x1ec] sm:$0xf] }
 0x243   :  { %4644 = vmatmul.bf16.vlgmr.msra.gmra.mxu0 %v8978_v36  ;;  %4601 = vmatpush.bf16.msra.mxu1 %v6748_v63  ;;  %v6732_v56 = vor.u32 %v8131_v39, %v6731_v38  ;;  %v8325_v63 = vld [vmem:[#allocation8 + $0x66c] sm:$0xf]  ;;  %v7277_v11 = vld [vmem:[#allocation8 + $0x498] sm:$0xf0] }
 0x244   :  { %4689 = vmatpush.bf16.msrb.mxu0 %v6800_v1  ;;  %v4465_v13 = vpop.f32.mrf.mxu3  ;;  %v8125_v1 = vld [vmem:[#allocation8 + $0x2c] sm:$0xf] }
 0x245   :  { %4729 = vmatpush.bf16.msra.mxu2 %v7168_v60  ;;  %v8127_v60 = vld [vmem:[#allocation8 + $0x34] sm:$0xf0]  ;;  %v8121_v38 = vld [vmem:[#allocation8 + $0xc] sm:$0xf] }
 0x246   :  { %4717 = vmatpush.bf16.msrb.mxu3 %v7024_v24  ;;  %v8221_v24 = vld [vmem:[#allocation8 + $0x32c] sm:$0xf]  ;;  %v6716_v48 = vor.u32 %v8127_v60, %v6715_v35  ;;  %v6704_v49 = vor.u32 %v8121_v38, %v6701_v55  ;;  %v8263_v35 = vld [vmem:[#allocation8 + $0x474] sm:$0xf0] }
 0x247   :  { %v7104_v25 = vor.u32 %v8221_v24, %v7101_v54  ;;  %4602 = vmatpush.bf16.msra.mxu1 %v6732_v56  ;;  %v8277_v39 = vld [vmem:[#allocation8 + $0x4ec] sm:$0xf]  ;;  %v7309_v54 = vld [vmem:[#allocation8 + $0x4d8] sm:$0xf0] }
 0x248   :  { %4690 = vmatpush.bf16.msrb.mxu0 %v6784_v3  ;;  %v7328_v13 = vor.u32 %v8277_v39, %v7325_v43  ;;  %v8273_v24 = vld [vmem:[#allocation8 + $0x4cc] sm:$0xf]  ;;  %v7229_v39 = vld [vmem:[#allocation8 + $0x438] sm:$0xf0] }
 0x249   :  { %4730 = vmatpush.bf16.msra.mxu2 %v7152_v12  ;;  %v8333_v12 = vld [vmem:[#allocation8 + $0x6ac] sm:$0xf] }
 0x24a   :  { %4718 = vmatpush.bf16.msrb.mxu3 %v7008_v7  ;;  %v7085_v7 = vld [vmem:[#allocation8 + $0x318] sm:$0xf0]  ;;  %v7552_v17 = vor.u32 %v8333_v12, %v7549_v14  ;;  %v8317_v60 = vld [vmem:[#allocation8 + $0x62c] sm:$0xf]  ;;  %v7472_v14 = vor.u32 %v8313_v57, %v7469_v41 }
 0x24b   :  { %v7088_v37 = vor.u32 %v8217_v44, %v7085_v7  ;;  %4603 = vmatpush.bf16.msra.mxu1 %v6716_v48  ;;  %v7243_v48 = vld [vmem:[#allocation8 + $0x448] sm:$0xf]  ;;  %v8253_v55 = vld [vmem:[#allocation8 + $0x42c] sm:$0xf]  ;;  %v6829_v57 = vld [vmem:[#allocation8 + $0x118] sm:$0xf0] }
 0x24c   :  { %4691 = vmatpush.bf16.msrb.mxu0 %v6768_v61  ;;  %v7485_v61 = vld [vmem:[#allocation8 + $0x638] sm:$0xf0]  ;;  %v8157_v0 = vld [vmem:[#allocation8 + $0x12c] sm:$0xf] }
 0x24d   :  { %4731 = vmatpush.bf16.msra.mxu2 %v7136_v9  ;;  %v6717_v9 = vld [vmem:[#allocation8 + $0x38] sm:$0xf0]  ;;  %v7488_v7 = vor.u32 %v8317_v60, %v7485_v61  ;;  %v8161_v60 = vld [vmem:[#allocation8 + $0x14c] sm:$0xf] }
 0x24e   :  { %4719 = vmatpush.bf16.msrb.mxu3 %v6992_v30  ;;  %v7307_v30 = vld [vmem:[#allocation8 + $0x4c8] sm:$0xf]  ;;  %v6720_v31 = vor.u32 %v8125_v1, %v6717_v9  ;;  %v6941_v1 = vld [vmem:[#allocation8 + $0x1f8] sm:$0xf0]  ;;  %v8257_v9 = vld [vmem:[#allocation8 + $0x44c] sm:$0xf] }
 0x24f   :  { %4604 = vmatpush.bf16.msra.mxu1 %v6700_v16  ;;  %v6944_v20 = vor.u32 %v8181_v4, %v6941_v1  ;;  %v6861_v61 = vld [vmem:[#allocation8 + $0x158] sm:$0xf0]  ;;  %v8309_v41 = vld [vmem:[#allocation8 + $0x5ec] sm:$0xf] }
 0x250   :  { %4692 = vmatpush.bf16.msrb.mxu0 %v6752_v47  ;;  %v8347_v1 = vld [vmem:[#allocation11 + $0x18] sm:$0xff] }
 0x251   :  { %4732 = vmatpush.bf16.msra.mxu2 %v7120_v22  ;;  %v7275_v22 = vld [vmem:[#allocation8 + $0x488] sm:$0xf] }
 0x252   :  { %4720 = vmatpush.bf16.msrb.mxu3 %v6976_v29  ;;  %v7517_v29 = vld [vmem:[#allocation8 + $0x678] sm:$0xf0]  ;;  %4605 = vmatmul.bf16.vlgmr.msra.gmra.mxu1 %v8963_v5  ;;  %v7276_v56 = vor.u32 %v8267_v51, %v7275_v22  ;;  %v4476_v62 = vpop.f32.mrf.mxu2 }
 0x253   :  { %4649 = vmatpush.bf16.msrb.mxu1 %v7324_v53  ;;  %v7520_v3 = vor.u32 %v8325_v63, %v7517_v29  ;;  %v9042_v6 = vadd.f32 %v4476_v62, %v9034_v33  ;;  %v8255_v33 = vld [vmem:[#allocation8 + $0x434] sm:$0xf0]  ;;  %v8261_v53 = vld [vmem:[#allocation8 + $0x46c] sm:$0xf]  ;;  %v6925_v29 = vld [vmem:[#allocation8 + $0x1d8] sm:$0xf0]  ;;  %v6864_v62 = vor.u32 %v8161_v60, %v6861_v61 }
 0x254   :  { %4693 = vmatpush.bf16.msrb.mxu0 %v6736_v23  ;;  %v8251_v23 = vld [vmem:[#allocation8 + $0x414] sm:$0xf0]  ;;  %v8177_v63 = vld [vmem:[#allocation8 + $0x1cc] sm:$0xf]  ;;  %v6909_v22 = vld [vmem:[#allocation8 + $0x1b8] sm:$0xf0] }
 0x255   :  { %4733 = vmatpush.bf16.msra.mxu2 %v7104_v25  ;;  %v7312_v25 = vor.u32 %v8273_v24, %v7309_v54  ;;  %v7213_v51 = vld [vmem:[#allocation8 + $0x418] sm:$0xf0] }
 0x256   :  { %4721 = vmatpush.bf16.msrb.mxu3 %v6960_v32 }
 0x258   :  { %4694 = vmatpush.bf16.msrb.mxu0 %v6720_v31 }
 0x259   :  { %4722 = vmatmul.bf16.vlgmr.msrb.gmra.mxu3 %v8982_v2  ;;  %4734 = vmatpush.bf16.msra.mxu2 %v7088_v37  ;;  %v7308_v2 = vor.u32 %v8275_v26, %v7307_v30  ;;  %v8265_v37 = vld [vmem:[#allocation8 + $0x48c] sm:$0xf]  ;;  %v7211_v30 = vld [vmem:[#allocation8 + $0x408] sm:$0xf]  ;;  %v3288_v26 = vperm.slane %v9021_v28, 1 }
 0x25a   :  { %4766 = vmatpush.bf16.msra.mxu3 %v7584_v59  ;;  %v7259_v59 = vld [vmem:[#allocation8 + $0x468] sm:$0xf]  ;;  %v7280_v18 = vor.u32 %v8265_v37, %v7277_v11  ;;  %v4478_v16 = vpop.f32.mrf.mxu2  ;;  %v8350_v37 = vld [vmem:[#allocation11 + $0x30] sm:$0xff] }
 0x25b   :  { %4650 = vmatpush.bf16.msrb.mxu1 %v7308_v2  ;;  %v7260_v44 = vor.u32 %v8263_v35, %v7259_v59  ;;  %v7245_v2 = vld [vmem:[#allocation8 + $0x458] sm:$0xf0]  ;;  %v8301_v16 = vld [vmem:[#allocation8 + $0x5ac] sm:$0xf] }
 0x25c   :  { %4735 = vmatmul.bf16.vlgmr.msra.gmra.mxu2 %v8978_v36  ;;  %v8321_v36 = vld [vmem:[#allocation8 + $0x64c] sm:$0xf]  ;;  %v4515_v52 = vpop.f32.mrf.mxu3  ;;  %4695 = vmatpush.bf16.msrb.mxu0 %v6704_v49  ;;  %v7248_v19 = vor.u32 %v8257_v9, %v7245_v2  ;;  %v6877_v59 = vld [vmem:[#allocation8 + $0x178] sm:$0xf0] }
 0x25d   :  { %v7504_v32 = vor.u32 %v8321_v36, %v7501_v50  ;;  %v4516_v31 = vadd.f32 %v4515_v52, %v3288_v26  ;;  %v8249_v49 = vld [vmem:[#allocation8 + $0x40c] sm:$0xf]  ;;  %v6893_v52 = vld [vmem:[#allocation8 + $0x198] sm:$0xf0] }
 0x25e   :  { %4767 = vmatpush.bf16.msra.mxu3 %v7568_v8  ;;  %v8259_v8 = vld [vmem:[#allocation8 + $0x454] sm:$0xf0]  ;;  %v7216_v50 = vor.u32 %v8249_v49, %v7213_v51  ;;  %v8297_v26 = vld [vmem:[#allocation8 + $0x58c] sm:$0xf]  ;;  %v8344_v49 = vld [vmem:[#allocation11] sm:$0xff] }
 0x25f   :  { %4651 = vmatpush.bf16.msrb.mxu1 %v7292_v46  ;;  %4696 = vmatmul.bf16.vlgmr.msrb.gmra.mxu0 %v8963_v5  ;;  %v7244_v12 = vor.u32 %v8259_v8, %v7243_v48  ;;  %v7228_v5 = vor.u32 %v8255_v33, %v7227_v15  ;;  %v6928_v46 = vor.u32 %v8177_v63, %v6925_v29  ;;  %v8351_v48 = vld [vmem:[#allocation11 + $0x38] sm:$0xff]  ;;  %v8153_v8 = vld [vmem:[#allocation8 + $0x10c] sm:$0xf] }
 0x260   :  { %4740 = vmatpush.bf16.msra.mxu0 %v7328_v13  ;;  %v8169_v13 = vld [vmem:[#allocation8 + $0x18c] sm:$0xf]  ;;  %5059 = vmatpush.bf16.msrb.mxu2 %v8351_v48  ;;  %v7437_v15 = vld [vmem:[#allocation8 + $0x5d8] sm:$0xf0] }
 0x261   :  { %v8349_v33 = vld [vmem:[#allocation11 + $0x28] sm:$0xff]  ;;  %v7373_v63 = vld [vmem:[#allocation8 + $0x558] sm:$0xf0] }
 0x262   :  { %4768 = vmatpush.bf16.msra.mxu3 %v7552_v17  ;;  %v7261_v17 = vld [vmem:[#allocation8 + $0x478] sm:$0xf0]  ;;  %v4528_v38 = vpop.f32.mrf.mxu2  ;;  %v8293_v2 = vld [vmem:[#allocation8 + $0x56c] sm:$0xf] }
 0x263   :  { %4652 = vmatpush.bf16.msrb.mxu1 %v7276_v56  ;;  %v7264_v27 = vor.u32 %v8261_v53, %v7261_v17  ;;  %v9047_v43 = vadd.f32 %v4528_v38, %v4516_v31  ;;  %v6896_v56 = vor.u32 %v8169_v13, %v6893_v52  ;;  %v7421_v53 = vld [vmem:[#allocation8 + $0x5b8] sm:$0xf0]  ;;  %v8348_v17 = vld [vmem:[#allocation11 + $0x20] sm:$0xff]  ;;  %v8357_v13 = vld [vmem:[#allocation11 + $0x68] sm:$0xff] }
 0x264   :  { %4741 = vmatpush.bf16.msra.mxu0 %v7312_v25  ;;  %v4517_v47 = vpop.f32.mrf.mxu3  ;;  %5060 = vmatpush.bf16.msrb.mxu2 %v8350_v37  ;;  %v8359_v29 = vld [vmem:[#allocation11 + $0x78] sm:$0xff] }
 0x266   :  { %4769 = vmatpush.bf16.msra.mxu3 %v7536_v21  ;;  %v7212_v21 = vor.u32 %v8251_v23, %v7211_v30  ;;  %v7424_v23 = vor.u32 %v8301_v16, %v7421_v53 }
 0x267   :  { %4653 = vmatpush.bf16.msrb.mxu1 %v7260_v44  ;;  %v6845_v44 = vld [vmem:[#allocation8 + $0x138] sm:$0xf0] }
 0x268   :  { %4742 = vmatpush.bf16.msra.mxu0 %v7296_v10  ;;  %v7453_v10 = vld [vmem:[#allocation8 + $0x5f8] sm:$0xf0]  ;;  %5061 = vmatpush.bf16.msrb.mxu2 %v8349_v33 }
 0x26a   :  { %4770 = vmatpush.bf16.msra.mxu3 %v7520_v3  ;;  %v8173_v3 = vld [vmem:[#allocation8 + $0x1ac] sm:$0xf]  ;;  %v4530_v24 = vpop.f32.mrf.mxu2 }
 0x26b   :  { %4654 = vmatpush.bf16.msrb.mxu1 %v7244_v12  ;;  %v6912_v36 = vor.u32 %v8173_v3, %v6909_v22  ;;  %v7456_v12 = vor.u32 %v8309_v41, %v7453_v10  ;;  %v7357_v3 = vld [vmem:[#allocation8 + $0x538] sm:$0xf0]  ;;  %v8358_v22 = vld [vmem:[#allocation11 + $0x70] sm:$0xff] }
 0x26c   :  { %4743 = vmatpush.bf16.msra.mxu0 %v7280_v18  ;;  %5062 = vmatpush.bf16.msrb.mxu2 %v8348_v17 }
 0x26e   :  { %4771 = vmatpush.bf16.msra.mxu3 %v7504_v32  ;;  %v8165_v32 = vld [vmem:[#allocation8 + $0x16c] sm:$0xf] }
 0x26f   :  { %4655 = vmatpush.bf16.msrb.mxu1 %v7228_v5  ;;  %v6880_v35 = vor.u32 %v8165_v32, %v6877_v59  ;;  %v8355_v32 = vld [vmem:[#allocation11 + $0x58] sm:$0xff]  ;;  %v8354_v59 = vld [vmem:[#allocation11 + $0x50] sm:$0xff] }
 0x270   :  { %4744 = vmatpush.bf16.msra.mxu0 %v7264_v27  ;;  %v7405_v27 = vld [vmem:[#allocation8 + $0x598] sm:$0xf0]  ;;  %5063 = vmatpush.bf16.msrb.mxu2 %v8347_v1 }
 0x271   :  { %v7408_v9 = vor.u32 %v8297_v26, %v7405_v27  ;;  %v8365_v26 = vld [vmem:[#allocation11 + $0xa8] sm:$0xff]  ;;  %v8364_v27 = vld [vmem:[#allocation11 + $0xa0] sm:$0xff] }
 0x272   :  { %4772 = vmatpush.bf16.msra.mxu3 %v7488_v7  ;;  %v6848_v7 = vor.u32 %v8157_v0, %v6845_v44  ;;  %v8353_v0 = vld [vmem:[#allocation11 + $0x48] sm:$0xff] }
 0x273   :  { %4656 = vmatpush.bf16.msrb.mxu1 %v7212_v21  ;;  %v7389_v21 = vld [vmem:[#allocation8 + $0x578] sm:$0xf0] }
 0x274   :  { %4745 = vmatpush.bf16.msra.mxu0 %v7248_v19  ;;  %v8289_v19 = vld [vmem:[#allocation8 + $0x54c] sm:$0xf] }
 0x276   :  { %4773 = vmatpush.bf16.msra.mxu3 %v7472_v14  ;;  %4657 = vmatmul.bf16.vlgmr.msrb.gmra.mxu1 %v8993_v45  ;;  %v8305_v14 = vld [vmem:[#allocation8 + $0x5cc] sm:$0xf] }
 0x277   :  { %4701 = vmatpush.bf16.msra.mxu1 %v6944_v20  ;;  %v9053_v58 = vpop.f32.mrf.mxu0  ;;  %v7440_v18 = vor.u32 %v8305_v14, %v7437_v15  ;;  %v8346_v20 = vld [vmem:[#allocation11 + $0x10] sm:$0xff]  ;;  %v8367_v15 = vld [vmem:[#allocation11 + $0xb8] sm:$0xff] }
 0x278   :  { %5064 = vmatpush.bf16.msrb.mxu2 %v8346_v20 }
 0x279   :  { %4774 = vmatmul.bf16.vlgmr.msra.gmra.mxu3 %v9028_v34  ;;  %v7232_v34 = vor.u32 %v8253_v55, %v7229_v39  ;;  %v8345_v39 = vld [vmem:[#allocation11 + $0x8] sm:$0xff] }
 0x27b   :  { %4702 = vmatpush.bf16.msra.mxu1 %v6928_v46  ;;  %4746 = vmatpush.bf16.msra.mxu0 %v7232_v34  ;;  %v7376_v46 = vor.u32 %v8289_v19, %v7373_v63  ;;  %v8285_v34 = vld [vmem:[#allocation8 + $0x52c] sm:$0xf] }
 0x27c   :  { %v9050_v54 = vpop.f32.mrf.mxu3  ;;  %5065 = vmatpush.bf16.msrb.mxu2 %v8345_v39  ;;  %v7360_v51 = vor.u32 %v8285_v34, %v7357_v3  ;;  %v8360_v34 = vld [vmem:[#allocation11 + $0x80] sm:$0xff] }
 0x27f   :  { %4703 = vmatpush.bf16.msra.mxu1 %v6912_v36  ;;  %4747 = vmatpush.bf16.msra.mxu0 %v7216_v50  ;;  %v9055_v47 = vpop.f32.mrf.mxu2  ;;  %v4491_v11 = vpop.f32.mrf.mxu0  ;;  %v8281_v36 = vld [vmem:[#allocation8 + $0x50c] sm:$0xf]  ;;  %v7341_v50 = vld [vmem:[#allocation8 + $0x518] sm:$0xf0] }
 0x280   :  { %5066 = vmatpush.bf16.msrb.mxu2 %v8344_v49  ;;  %v7344_v24 = vor.u32 %v8281_v36, %v7341_v50  ;;  %v8375_v50 = vld [vmem:[#allocation11 + $0xf8] sm:$0xff] }
 0x281   :  { %5098 = vmatpush.bf16.msrb.mxu3 %v8375_v50 }
 0x282   :  { %4748 = vmatmul.bf16.vlgmr.msra.gmra.mxu0 %v8993_v45  ;;  %v6832_v45 = vor.u32 %v8153_v8, %v6829_v57 }
 0x283   :  { %4704 = vmatpush.bf16.msra.mxu1 %v6896_v56  ;;  %5072 = vmatpush.bf16.msrb.mxu0 %v8359_v29  ;;  %v8356_v56 = vld [vmem:[#allocation11 + $0x60] sm:$0xff]  ;;  %v8362_v29 = vld [vmem:[#allocation11 + $0x90] sm:$0xff] }
 0x284   :  { %v4569_v25 = vpop.f32.mrf.mxu3 }
 0x287   :  { %4705 = vmatpush.bf16.msra.mxu1 %v6880_v35  ;;  %v4582_v5 = vpop.f32.mrf.mxu2  ;;  %v9058_v30 = vpop.f32.mrf.mxu0  ;;  %5073 = vmatpush.bf16.msrb.mxu0 %v8358_v22  ;;  %v4490_v35 = vadd.f32 %v9053_v58, %v9042_v6 }
 0x288   :  { %v4542_v6 = vadd.f32 %v9058_v30, %v9047_v43  ;;  %v3289_v43 = vperm.slane %v9021_v28, 2  ;;  %v8361_v28 = vld [vmem:[#allocation11 + $0x88] sm:$0xff] }
 0x28b   :  { %4706 = vmatpush.bf16.msra.mxu1 %v6864_v62  ;;  %5074 = vmatpush.bf16.msrb.mxu0 %v8357_v13 }
 0x28f   :  { %4707 = vmatpush.bf16.msra.mxu1 %v6848_v7  ;;  %v4543_v31 = vpop.f32.mrf.mxu0  ;;  %5075 = vmatpush.bf16.msrb.mxu0 %v8356_v56  ;;  %v8352_v7 = vld [vmem:[#allocation11 + $0x40] sm:$0xff] }
 0x293   :  { %4708 = vmatpush.bf16.msra.mxu1 %v6832_v45  ;;  %5076 = vmatpush.bf16.msrb.mxu0 %v8355_v32 }
 0x296   :  { %4709 = vmatmul.bf16.vlgmr.msra.gmra.mxu1 %v8965_v40  ;;  %v7392_v40 = vor.u32 %v8293_v2, %v7389_v21  ;;  %v8363_v21 = vld [vmem:[#allocation11 + $0x98] sm:$0xff] }
 0x297   :  { %4753 = vmatpush.bf16.msrb.mxu1 %v7456_v12  ;;  %5077 = vmatpush.bf16.msrb.mxu0 %v8354_v59  ;;  %v8373_v59 = vld [vmem:[#allocation11 + $0xe8] sm:$0xff] }
 0x29b   :  { %4754 = vmatpush.bf16.msrb.mxu1 %v7440_v18  ;;  %5078 = vmatpush.bf16.msrb.mxu0 %v8353_v0  ;;  %v8366_v18 = vld [vmem:[#allocation11 + $0xb0] sm:$0xff] }
 0x29c   :  { %v9060_v4 = vpop.f32.mrf.mxu3 }
 0x29f   :  { %4755 = vmatpush.bf16.msrb.mxu1 %v7424_v23  ;;  %v9062_v38 = vpop.f32.mrf.mxu2  ;;  %5079 = vmatpush.bf16.msrb.mxu0 %v8352_v7  ;;  %v8372_v7 = vld [vmem:[#allocation11 + $0xe0] sm:$0xff] }
 0x2a3   :  { %4756 = vmatpush.bf16.msrb.mxu1 %v7408_v9 }
 0x2a4   :  { %v4621_v55 = vpop.f32.mrf.mxu3 }
 0x2a7   :  { %4757 = vmatpush.bf16.msrb.mxu1 %v7392_v40  ;;  %v4634_v52 = vpop.f32.mrf.mxu2 }
 0x2ab   :  { %4758 = vmatpush.bf16.msrb.mxu1 %v7376_v46 }
 0x2af   :  { %4759 = vmatpush.bf16.msrb.mxu1 %v7360_v51  ;;  %v4502_v60 = vpop.f32.mrf.mxu1 }
 0x2b0   :  { %v4503_v25 = vadd.f32 %v4502_v60, %v4490_v35  ;;  %v4593_v62 = vpop.f32.mrf.mxu0 }
 0x2b2   :  { %v4779_v44 = vmul.f32 0.5, %v4503_v25 }
 0x2b3   :  { %4760 = vmatpush.bf16.msrb.mxu1 %v7344_v24  ;;  %v8374_v24 = vld [vmem:[#allocation11 + $0xf0] sm:$0xff] }
 0x2b4   :  { %8427 = vtanh.f32 %v4779_v44  ;;  %5099 = vmatpush.bf16.msrb.mxu3 %v8374_v24  ;;  %v8443_v44 = vld [vmem:[#allocation10] sm:$0xf]  ;;  %v8385_v24 = vld [vmem:[#allocation17 + $0x8] sm:$0xff] }
 0x2b6   :  { %4761 = vmatmul.bf16.vlgmr.msrb.gmra.mxu1 %v9004_v42 }
 0x2b7   :  { %v4504_v8 = vpop.f32.mrf.mxu1  ;;  %5085 = vmatpush.bf16.msra.mxu1 %v8367_v15 }
 0x2b8   :  { %v4595_v42 = vpop.f32.mrf.mxu0  ;;  %5100 = vmatpush.bf16.msrb.mxu3 %v8373_v59 }
 0x2b9   :  { %v8371_v42 = vld [vmem:[#allocation11 + $0xd8] sm:$0xff] }
 0x2ba   :  { %v8428_v41 = vpop.eup %8427 }
 0x2bb   :  { %v4787_v10 = vmul.f32 0.5, %v8428_v41  ;;  %5086 = vmatpush.bf16.msra.mxu1 %v8366_v18 }
 0x2bc   :  { %v9067_v61 = vpop.f32.mrf.mxu3  ;;  %5101 = vmatpush.bf16.msrb.mxu3 %v8372_v7  ;;  %v8412_v7 = vld [vmem:[#allocation19] ss:$0 sm:$0xff] }
 0x2bd   :  { %v4791_v45 = vadd.f32 0.5, %v4787_v10  ;;  %v8370_v10 = vld [vmem:[#allocation11 + $0xd0] sm:$0xff] }
 0x2bf   :  { %v4684_v48 = vpop.f32.mrf.mxu2  ;;  %v4795_v58 = vpack.c.bf16 %v4791_v45, %v4791_v45  ;;  %v4554_v11 = vpop.f32.mrf.mxu1  ;;  %5087 = vmatpush.bf16.msra.mxu1 %v8365_v26 }
 0x2c0   :  { %v4645_v12 = vpop.f32.mrf.mxu0  ;;  %v4555_v14 = vadd.f32 %v4554_v11, %v4542_v6  ;;  %5102 = vmatpush.bf16.msrb.mxu3 %v8371_v42 }
 0x2c1   :  { %5067 = vmatmul.bf16.vlgmr.msrb.gmra.mxu2 %v4795_v58  ;;  %v8369_v58 = vld [vmem:[#allocation11 + $0xc8] sm:$0xff] }
 0x2c2   :  { %v4568_v33 = vadd.f32 %v9050_v54, %v4555_v14 }
 0x2c3   :  { %5088 = vmatpush.bf16.msra.mxu1 %v8364_v27 }
 0x2c4   :  { %v4673_v57 = vpop.f32.mrf.mxu3  ;;  %v4581_v16 = vadd.f32 %v9055_v47, %v4568_v33  ;;  %5103 = vmatpush.bf16.msrb.mxu3 %v8370_v10 }
 0x2c6   :  { %v4594_v53 = vadd.f32 %v4593_v62, %v4581_v16 }
 0x2c7   :  { %v4686_v37 = vpop.f32.mrf.mxu2  ;;  %v4556_v17 = vpop.f32.mrf.mxu1  ;;  %5089 = vmatpush.bf16.msra.mxu1 %v8363_v21  ;;  %v8381_v21 = vld [vmem:[#allocation14 + $0x28] sm:$0xff] }
 0x2c8   :  { %v4647_v5 = vpop.f32.mrf.mxu0  ;;  %v4780_v23 = vmul.f32 0.5, %v4594_v53  ;;  %5104 = vmatpush.bf16.msrb.mxu3 %v8369_v58  ;;  %v8368_v37 = vld [vmem:[#allocation11 + $0xc0] sm:$0xff] }
 0x2ca   :  { %8429 = vtanh.f32 %v4780_v23 }
 0x2cb   :  { %5090 = vmatpush.bf16.msra.mxu1 %v8362_v29  ;;  %v8376_v29 = vld [vmem:[#allocation14] sm:$0xff] }
 0x2cc   :  { %5105 = vmatpush.bf16.msrb.mxu3 %v8368_v37 }
 0x2cf   :  { %v4606_v1 = vpop.f32.mrf.mxu1  ;;  %5091 = vmatpush.bf16.msra.mxu1 %v8361_v28  ;;  %v8390_v28 = vld [vmem:[#allocation17 + $0x30] sm:$0xff] }
 0x2d0   :  { %v8430_v9 = vpop.eup %8429  ;;  %v4607_v54 = vadd.f32 %v4606_v1, %v3289_v43  ;;  %v8410_v43 = vld [vmem:[#allocation13] ss:$0 sm:$0xff] }
 0x2d1   :  { %v4788_v2 = vmul.f32 0.5, %v8430_v9 }
 0x2d2   :  { %v4620_v47 = vadd.f32 %v9060_v4, %v4607_v54  ;;  %v8383_v54 = vld [vmem:[#allocation14 + $0x38] sm:$0xff] }
 0x2d3   :  { %v4792_v20 = vadd.f32 0.5, %v4788_v2  ;;  %5092 = vmatpush.bf16.msra.mxu1 %v8360_v34  ;;  %5184 = vmatpush.bf16.msra.mxu2 %v8383_v54  ;;  %v8382_v2 = vld [vmem:[#allocation14 + $0x30] sm:$0xff] }
 0x2d4   :  { %v4633_v40 = vadd.f32 %v9062_v38, %v4620_v47  ;;  %v8380_v47 = vld [vmem:[#allocation14 + $0x20] sm:$0xff] }
 0x2d5   :  { %v4796_v19 = vpack.c.bf16 %v4792_v20, %v4792_v20 }
 0x2d6   :  { %v4646_v4 = vadd.f32 %v4645_v12, %v4633_v40  ;;  %v8379_v40 = vld [vmem:[#allocation14 + $0x18] sm:$0xff] }
 0x2d7   :  { %v4608_v55 = vpop.f32.mrf.mxu1  ;;  %5080 = vmatmul.bf16.vlgmr.msrb.gmra.mxu0 %v4796_v19  ;;  %5185 = vmatpush.bf16.msra.mxu2 %v8382_v2  ;;  %v8378_v19 = vld [vmem:[#allocation14 + $0x10] sm:$0xff] }
 0x2d8   :  { %v8391_v55 = vld [vmem:[#allocation17 + $0x38] sm:$0xff] }
 0x2d9   :  { %5270 = vmatpush.bf16.msra.mxu0 %v8391_v55 }
 0x2db   :  { %5186 = vmatpush.bf16.msra.mxu2 %v8381_v21 }
 0x2dc   :  { %v4723_v30 = vpop.f32.mrf.mxu3  ;;  %v4697_v39 = vpop.f32.mrf.mxu0 }
 0x2dd   :  { %5271 = vmatpush.bf16.msra.mxu0 %v8390_v28 }
 0x2df   :  { %v4736_v31 = vpop.f32.mrf.mxu2  ;;  %5187 = vmatpush.bf16.msra.mxu2 %v8380_v47 }
 0x2e3   :  { %5188 = vmatpush.bf16.msra.mxu2 %v8379_v40 }
 0x2e4   :  { %v4725_v63 = vpop.f32.mrf.mxu3  ;;  %v4699_v3 = vpop.f32.mrf.mxu0 }
 0x2e5   :  { %v8377_v63 = vld [vmem:[#allocation14 + $0x8] sm:$0xff] }
 0x2e7   :  { %v4738_v46 = vpop.f32.mrf.mxu2  ;;  %5189 = vmatpush.bf16.msra.mxu2 %v8378_v19 }
 0x2e8   :  { %v8388_v46 = vld [vmem:[#allocation17 + $0x20] sm:$0xff] }
 0x2eb   :  { %5190 = vmatpush.bf16.msra.mxu2 %v8377_v63 }
 0x2ef   :  { %5191 = vmatpush.bf16.msra.mxu2 %v8376_v29 }
 0x2f3   :  { %v4658_v49 = vpop.f32.mrf.mxu1 }
 0x2f4   :  { %v4659_v51 = vadd.f32 %v4658_v49, %v4646_v4 }
 0x2f6   :  { %v4672_v36 = vadd.f32 %v9067_v61, %v4659_v51  ;;  %v3290_v61 = vperm.slane %v8443_v44, 3 }
 0x2f8   :  { %v4685_v38 = vadd.f32 %v4684_v48, %v4672_v36  ;;  %v4698_v48 = vadd.f32 %v4697_v39, %v3290_v61  ;;  %v8389_v39 = vld [vmem:[#allocation17 + $0x28] sm:$0xff] }
 0x2f9   :  { %5272 = vmatpush.bf16.msra.mxu0 %v8389_v39 }
 0x2fa   :  { %v4781_v52 = vmul.f32 0.5, %v4685_v38 }
 0x2fb   :  { %v4660_v56 = vpop.f32.mrf.mxu1 }
 0x2fc   :  { %v4775_v22 = vpop.f32.mrf.mxu3  ;;  %8431 = vtanh.f32 %v4781_v52  ;;  %v8386_v52 = vld [vmem:[#allocation17 + $0x10] sm:$0xff]  ;;  %v8384_v56 = vld [vmem:[#allocation17] sm:$0xff] }
 0x2fd   :  { %5273 = vmatpush.bf16.msra.mxu0 %v8388_v46 }
 0x2ff   :  { %v4749_v32 = vpop.f32.mrf.mxu0 }
 0x302   :  { %v8432_v35 = vpop.eup %8431 }
 0x303   :  { %v4789_v60 = vmul.f32 0.5, %v8432_v35 }
 0x304   :  { %v4777_v13 = vpop.f32.mrf.mxu3 }
 0x305   :  { %v4793_v25 = vadd.f32 0.5, %v4789_v60  ;;  %v8387_v13 = vld [vmem:[#allocation17 + $0x18] sm:$0xff] }
 0x306   :  { %5274 = vmatpush.bf16.msra.mxu0 %v8387_v13 }
 0x307   :  { %v4751_v62 = vpop.f32.mrf.mxu0  ;;  %v4797_v0 = vpack.c.bf16 %v4793_v25, %v4793_v25 }
 0x309   :  { %5093 = vmatmul.bf16.vlgmr.msra.gmra.mxu1 %v4797_v0 }
 0x30a   :  { %5275 = vmatpush.bf16.msra.mxu0 %v8386_v52 }
 0x30e   :  { %5276 = vmatpush.bf16.msra.mxu0 %v8385_v24 }
 0x312   :  { %5277 = vmatpush.bf16.msra.mxu0 %v8384_v56 }
 0x313   :  { %v4710_v8 = vpop.f32.mrf.mxu1 }
 0x314   :  { %v4711_v57 = vadd.f32 %v4710_v8, %v4698_v48 }
 0x316   :  { %v4724_v41 = vadd.f32 %v4723_v30, %v4711_v57 }
 0x318   :  { %v4737_v45 = vadd.f32 %v4736_v31, %v4724_v41 }
 0x31a   :  { %v4750_v11 = vadd.f32 %v4749_v32, %v4737_v45  ;;  %v8411_v32 = vld [vmem:[#allocation16] ss:$0 sm:$0xff] }
 0x31b   :  { %v4712_v6 = vpop.f32.mrf.mxu1 }
 0x333   :  { %v4762_v12 = vpop.f32.mrf.mxu1 }
 0x334   :  { %v4763_v14 = vadd.f32 %v4762_v12, %v4750_v11 }
 0x336   :  { %v4776_v15 = vadd.f32 %v4775_v22, %v4763_v14 }
 0x338   :  { %v4782_v33 = vmul.f32 0.5, %v4776_v15 }
 0x33a   :  { %8433 = vtanh.f32 %v4782_v33 }
 0x33b   :  { %v4764_v18 = vpop.f32.mrf.mxu1 }
 0x340   :  { %v8434_v16 = vpop.eup %8433 }
 0x341   :  { %v4790_v53 = vmul.f32 0.5, %v8434_v16 }
 0x343   :  { %v4794_v17 = vadd.f32 0.5, %v4790_v53 }
 0x344   :  { %v5068_v23 = vpop.f32.mrf.mxu2 }
 0x345   :  { %v4798_v5 = vpack.c.bf16 %v4794_v17, %v4794_v17  ;;  %v5069_v30 = vadd.f32 %v8410_v43, %v5068_v23 }
 0x347   :  { %5106 = vmatmul.bf16.vlgmr.msrb.gmra.mxu3 %v4798_v5 }
 0x34c   :  { %v5070_v26 = vpop.f32.mrf.mxu2 }
 0x354   :  { %v5081_v27 = vpop.f32.mrf.mxu0 }
 0x355   :  { %v5082_v1 = vadd.f32 %v5081_v27, %v5069_v30 }
 0x35c   :  { %v5083_v9 = vpop.f32.mrf.mxu0 }
 0x386   :  { %v5094_v20 = vpop.f32.mrf.mxu1 }
 0x387   :  { %v5095_v34 = vadd.f32 %v5094_v20, %v5082_v1 }
 0x38e   :  { %v5096_v31 = vpop.f32.mrf.mxu1 }
 0x3ca   :  { %v5107_v3 = vpop.f32.mrf.mxu3 }
 0x3cb   :  { %v5108_v22 = vadd.f32 %v5107_v3, %v5095_v34 }
 0x3cd   :  { %v5111_v4 = vmul.f32 0.5, %v5108_v22 }
 0x3cf   :  { %8435 = vtanh.f32 %v5111_v4 }
 0x3d2   :  { %v5109_v49 = vpop.f32.mrf.mxu3 }
 0x3d5   :  { %v8436_v51 = vpop.eup %8435 }
 0x3d6   :  { %v5113_v36 = vmul.f32 0.5, %v8436_v51 }
 0x3d8   :  { %v5114_v38 = vadd.f32 0.5, %v5113_v36 }
 0x3da   :  { %v5115_v50 = vpack.c.bf16 %v5114_v38, %v5114_v38 }
 0x3dc   :  { %5192 = vmatmul.bf16.vlgmr.msra.gmra.mxu2 %v5115_v50 }
 0x45f   :  { %v5193_v59 = vpop.f32.mrf.mxu2 }
 0x460   :  { %v5194_v35 = vadd.f32 %v8411_v32, %v5193_v59 }
 0x462   :  { %v5197_v60 = vmul.f32 0.5, %v5194_v35 }
 0x464   :  { %8437 = vtanh.f32 %v5197_v60 }
 0x467   :  { %v5195_v25 = vpop.f32.mrf.mxu2 }
 0x46a   :  { %v8438_v62 = vpop.eup %8437 }
 0x46b   :  { %v5199_v0 = vmul.f32 0.5, %v8438_v62 }
 0x46d   :  { %v5200_v44 = vadd.f32 0.5, %v5199_v0 }
 0x46f   :  { %v5201_v61 = vpack.c.bf16 %v5200_v44, %v5200_v44 }
 0x471   :  { %5278 = vmatmul.bf16.vlgmr.msra.gmra.mxu0 %v5201_v61 }
 0x4ee   :  { %v5279_v48 = vpop.f32.mrf.mxu0 }
 0x4ef   :  { %v5280_v8 = vadd.f32 %v8412_v7, %v5279_v48 }
 0x4f1   :  { %v5283_v42 = vmul.f32 0.5, %v5280_v8 }
 0x4f3   :  { %8439 = vtanh.f32 %v5283_v42 }
 0x4f6   :  { %v5281_v57 = vpop.f32.mrf.mxu0 }
 0x4f9   :  { %v8440_v41 = vpop.eup %8439 }
 0x4fa   :  { %v5285_v10 = vmul.f32 0.5, %v8440_v41 }
 0x4fc   :  { %v5286_v45 = vadd.f32 0.5, %v5285_v10 }
 0x4fe   :  { %5287 = vst [vmem:[#allocation20] sm:$0xff] %v5286_v45 }
 0x4ff   :  { %5298 = dma.vmem_to_hbm [thread:$0]  %s5294_s10, 128, %s5296_s29, [#allocation4]  }
 0x500   :  { %8744 = dma.done.wait [#allocation4], 128  }
 0x501   :  { %8745 = vsyncadd [#allocation4], 4294967168 }
 0x502   :  { %5303 = vsyncpa [#allocation3], 1 }
 0x503   :  { %5304 = vsyncpa [#allocation6], 1 }
 0x504   :  { %5305 = vsyncpa [#allocation9], 1 }
 0x505   :  { %5306 = vsyncpa [#allocation12], 1 }
 0x506   :  { %5307 = vsyncpa [#allocation15], 1 }
 0x507   :  { %5308 = vsyncpa [#allocation18], 1 }
 0x508   :  { %5309 = vsyncpa [#allocation4], 1 }

</bundles_post_ra>
